<compile_context>
chip_gen: v7x
topology: tpu7x:2x2x1
jax: 0.10.0
libtpu: 0.0.40
codegen_flags: <defaults>
</compile_context>

<pallas_src>
import functools
import math

import jax
import jax.numpy as jnp
from jax import lax
from jax.experimental import pallas as pl
from jax.experimental.pallas import tpu as pltpu


_COMPILER_PARAMS = pltpu.CompilerParams(vmem_limit_bytes=32 * 1024 * 1024)
_LN_EPS = 1e-5
_NUM_HEADS = 8


# ----------------------------------------------------------------------------
# In-kernel helpers (traced inside the Pallas body)
# ----------------------------------------------------------------------------

def _layernorm(y, g, b, eps):
    mu = jnp.mean(y, axis=-1, keepdims=True)
    yc = y - mu
    var = jnp.mean(yc * yc, axis=-1, keepdims=True)
    return yc * lax.rsqrt(var + eps) * g + b


def _softmax_last(s):
    s = s - jnp.max(s, axis=-1, keepdims=True)
    e = jnp.exp(s)
    return e / jnp.sum(e, axis=-1, keepdims=True)


def _bdot(a, w_bf16):
    """f32 activation @ bf16 weight on the MXU, f32 accumulation."""
    return jnp.dot(a.astype(jnp.bfloat16), w_bf16,
                   preferred_element_type=jnp.float32)


def _bdot_t(a, b):
    """a @ b.T in bf16 (no transpose materialized), f32 accumulation."""
    return lax.dot_general(a.astype(jnp.bfloat16), b.astype(jnp.bfloat16),
                           (((1,), (1,)), ((), ())),
                           preferred_element_type=jnp.float32)


def _dot_t_f32(a, b):
    return lax.dot_general(a, b, (((1,), (1,)), ((), ())),
                           preferred_element_type=jnp.float32)


# ----------------------------------------------------------------------------
# Single fused forward kernel
# ----------------------------------------------------------------------------

def _fused_forward_kernel(
        x_ref,
        hw_ref, hb_ref,
        sa_in_w_ref, sa_in_b_ref, sa_out_w_ref, sa_out_b_ref,
        l_in_w_ref, l_in_b_ref, l_out_w_ref, l_out_b_ref,
        l_w1_ref, l_b1_ref, l_w2_ref, l_b2_ref,
        l_g1_ref, l_beta1_ref, l_g2_ref, l_beta2_ref,
        ga_wa_ref, ga_ba_ref, ga_wb_ref, ga_bb_ref, ga_wc_ref, ga_bc_ref,
        rho_w_ref, rho_b_ref, cls_w_ref, cls_b_ref,
        y_ref, attn_ref, apath_ref,
        ctx_scr,
        *, embed_dim, num_heads, n_layers, eps):
    e = embed_dim

    # ---- stem: H projection + ReLU + single-head self-attention -------------
    x = x_ref[...]                                               # (N, 1024) f32
    h = _bdot(x, hw_ref[...]) + hb_ref[...]
    h = jnp.maximum(h, 0.0)                                      # Dropout = id (eval)

    qkv = _bdot(h, sa_in_w_ref[...]) + sa_in_b_ref[...]          # (N, 3E) f32
    q = qkv[:, :e] * (1.0 / math.sqrt(e))                        # 1 head -> head_dim == E
    k = qkv[:, e:2 * e]
    v = qkv[:, 2 * e:]
    p = _softmax_last(_bdot_t(q, k))                             # (N, N) f32
    attn_ref[...] = p                                            # avg over 1 head == itself
    ctx = jnp.dot(p.astype(jnp.bfloat16), v.astype(jnp.bfloat16),
                  preferred_element_type=jnp.float32)            # (N, E)
    xcur = _bdot(ctx, sa_out_w_ref[...]) + sa_out_b_ref[...]     # H_coattn

    # ---- path_transformer: n_layers fused post-norm encoder layers ----------
    d = e // num_heads
    hscale = 1.0 / math.sqrt(d)
    for l in range(n_layers):                                    # static unroll (2)
        qkv = _bdot(xcur, l_in_w_ref[l]) + l_in_b_ref[l]         # (N, 3E)
        q = qkv[:, :e] * hscale
        k = qkv[:, e:2 * e]
        v = qkv[:, 2 * e:]
        # Per-head attention; ctx assembled lane-wise so the out-projection is
        # one K=E matmul instead of num_heads K=d matmuls.
        for hh in range(num_heads):
            lo = hh * d
            hi = lo + d
            sh = _bdot_t(q[:, lo:hi], k[:, lo:hi])               # (N, N)
            ph = _softmax_last(sh)                               # probs stay in-kernel
            ctx_scr[:, lo:hi] = jnp.dot(ph.astype(jnp.bfloat16),
                                        v[:, lo:hi].astype(jnp.bfloat16),
                                        preferred_element_type=jnp.float32)
        sa = _bdot(ctx_scr[...], l_out_w_ref[l]) + l_out_b_ref[l]

        # residual + LN1
        y1 = _layernorm(xcur + sa, l_g1_ref[l], l_beta1_ref[l], eps)

        # feed-forward (512) + ReLU + proj
        f = jnp.maximum(_bdot(y1, l_w1_ref[l]) + l_b1_ref[l], 0.0)
        f = _bdot(f, l_w2_ref[l]) + l_b2_ref[l]

        # residual + LN2
        xcur = _layernorm(y1 + f, l_g2_ref[l], l_beta2_ref[l], eps)

    # ---- AttentionNetGated + softmax pooling + rho + classifier --------------
    a = jnp.tanh(_bdot(xcur, ga_wa_ref[...]) + ga_ba_ref[...])
    g = jax.nn.sigmoid(_bdot(xcur, ga_wb_ref[...]) + ga_bb_ref[...])
    ag = a * g                                                   # (N, E)

    # Gate scores directly lane-dense as (1, N): wc_row (1,E) . ag^T
    A = _dot_t_f32(ga_wc_ref[...], ag) + ga_bc_ref[...]          # (1, N) pre-softmax
    apath_ref[...] = A                                           # == A_path.T of module

    pa = _softmax_last(A)                                        # (1, N)
    pooled = jnp.dot(pa, xcur, preferred_element_type=jnp.float32)   # (1, E)

    r = jnp.maximum(_bdot(pooled, rho_w_ref[...]) + rho_b_ref[...], 0.0)
    logits = jnp.dot(r, cls_w_ref[...], preferred_element_type=jnp.float32) + cls_b_ref[...]
    y_ref[...] = _softmax_last(logits)


# ----------------------------------------------------------------------------
# Forward wrapper (single pallas_call)
# ----------------------------------------------------------------------------

def forward(wsi, params):
    """wsi: (1, N, 1024).  Returns (Y (n_classes,), attention_scores dict)."""
    x2d = wsi[0]                                                 # (N, 1024)
    n = x2d.shape[0]
    e = params["h_w"].shape[1]
    n_classes = params["cls_w"].shape[1]
    n_layers = params["l_in_w"].shape[0]

    y, a_coattn, a_path = pl.pallas_call(
        functools.partial(_fused_forward_kernel, embed_dim=e,
                          num_heads=_NUM_HEADS, n_layers=n_layers, eps=_LN_EPS),
        out_shape=(jax.ShapeDtypeStruct((1, n_classes), jnp.float32),
                   jax.ShapeDtypeStruct((n, n), jnp.float32),
                   jax.ShapeDtypeStruct((1, n), jnp.float32)),
        scratch_shapes=[pltpu.VMEM((n, e), jnp.float32)],
        compiler_params=_COMPILER_PARAMS,
    )(x2d,
      params["h_w"], params["h_b"],
      params["sa_in_w"], params["sa_in_b"], params["sa_out_w"], params["sa_out_b"],
      params["l_in_w"], params["l_in_b"], params["l_out_w"], params["l_out_b"],
      params["l_w1"], params["l_b1"], params["l_w2"], params["l_b2"],
      params["l_g1"], params["l_beta1"], params["l_g2"], params["l_beta2"],
      params["ga_wa"], params["ga_ba"], params["ga_wb"], params["ga_bb"],
      params["ga_wc"], params["ga_bc"],
      params["rho_w"], params["rho_b"], params["cls_w"], params["cls_b"])

    attention_scores = {"attn": a_coattn, "path": a_path}
    return y[0], attention_scores


# ----------------------------------------------------------------------------
# Deterministic synthetic parameters: (in, out) layout, bf16 matmul weights
# ----------------------------------------------------------------------------

def _init_linear(key, in_d, out_d, w_dtype=jnp.bfloat16):
    """PyTorch-Linear-like uniform init; w:(in,out) in w_dtype, b:(1,out) f32."""
    k1, k2 = jax.random.split(key)
    bound = 1.0 / math.sqrt(in_d)
    w = jax.random.uniform(k1, (in_d, out_d), jnp.float32, -bound, bound)
    b = jax.random.uniform(k2, (1, out_d), jnp.float32, -bound, bound)
    return w.astype(w_dtype), b


def init_params(key, model_size="small", n_classes=3, in_dim=1024,
                ffn_dim=512, n_layers=2):
    e = {"small": 128, "medium": 256, "big": 512}[model_size]
    keys = jax.random.split(key, 8 + n_layers)
    p = {}
    p["h_w"], p["h_b"] = _init_linear(keys[0], in_dim, e)
    p["sa_in_w"], p["sa_in_b"] = _init_linear(keys[1], e, 3 * e)
    p["sa_out_w"], p["sa_out_b"] = _init_linear(keys[2], e, e)

    in_w, in_b, out_w, out_b = [], [], [], []
    w1s, b1s, w2s, b2s = [], [], [], []
    for i in range(n_layers):
        lk = jax.random.split(keys[3 + i], 4)
        w, b = _init_linear(lk[0], e, 3 * e); in_w.append(w); in_b.append(b)
        w, b = _init_linear(lk[1], e, e);      out_w.append(w); out_b.append(b)
        w, b = _init_linear(lk[2], e, ffn_dim); w1s.append(w); b1s.append(b)
        w, b = _init_linear(lk[3], ffn_dim, e); w2s.append(w); b2s.append(b)
    p["l_in_w"] = jnp.stack(in_w);   p["l_in_b"] = jnp.stack(in_b)
    p["l_out_w"] = jnp.stack(out_w); p["l_out_b"] = jnp.stack(out_b)
    p["l_w1"] = jnp.stack(w1s);      p["l_b1"] = jnp.stack(b1s)
    p["l_w2"] = jnp.stack(w2s);      p["l_b2"] = jnp.stack(b2s)
    p["l_g1"] = jnp.ones((n_layers, 1, e), jnp.float32)
    p["l_beta1"] = jnp.zeros((n_layers, 1, e), jnp.float32)
    p["l_g2"] = jnp.ones((n_layers, 1, e), jnp.float32)
    p["l_beta2"] = jnp.zeros((n_layers, 1, e), jnp.float32)

    k = 3 + n_layers
    p["ga_wa"], p["ga_ba"] = _init_linear(keys[k + 0], e, e)
    p["ga_wb"], p["ga_bb"] = _init_linear(keys[k + 1], e, e)
    wc, bc = _init_linear(keys[k + 2], e, 1, w_dtype=jnp.float32)
    p["ga_wc"] = wc.T                      # (1, E) row -> lane-dense gate scores
    p["ga_bc"] = bc                        # (1, 1)
    p["rho_w"], p["rho_b"] = _init_linear(keys[k + 3], e, e)
    p["cls_w"], p["cls_b"] = _init_linear(keys[k + 4], e, n_classes,
                                          w_dtype=jnp.float32)
    return p


# ----------------------------------------------------------------------------
# Main
# ----------------------------------------------------------------------------

if __name__ == "__main__":
    key = jax.random.PRNGKey(0)
    pkey, xkey = jax.random.split(key)

    model_size = "small"   # model_sizes = [128, 128]
    n_classes = 3
    N = 16                 # small synthetic WSI patch bag

    params = init_params(pkey, model_size=model_size, n_classes=n_classes)
    wsi = jax.random.normal(xkey, (1, N, 1024), dtype=jnp.float32)

    fwd = jax.jit(forward)
    Y, scores = fwd(wsi, params)
    (Y, scores) = jax.block_until_ready((Y, scores))

    assert Y.shape == (n_classes,)
    assert scores["attn"].shape == (N, N)
    assert scores["path"].shape == (1, N)
    assert jnp.isfinite(Y).all()
    assert jnp.isfinite(scores["attn"]).all()
    assert jnp.isfinite(scores["path"]).all()
    # Y is a softmax distribution over classes; attention rows sum to 1.
    assert abs(float(jnp.sum(Y)) - 1.0) < 1e-4
    assert jnp.allclose(jnp.sum(scores["attn"], axis=-1), 1.0, atol=1e-4)

    print("KERNEL_OK")
</pallas_src>

<mosaic_0001>
module attributes {stable_mosaic.version = 11 : i64} {
  func.func @_fused_forward_kernel(%arg0: memref<16x1024xf32, #tpu.memory_space<vmem>>, %arg1: memref<1024x128xbf16, #tpu.memory_space<vmem>>, %arg2: memref<1x128xf32, #tpu.memory_space<vmem>>, %arg3: memref<128x384xbf16, #tpu.memory_space<vmem>>, %arg4: memref<1x384xf32, #tpu.memory_space<vmem>>, %arg5: memref<128x128xbf16, #tpu.memory_space<vmem>>, %arg6: memref<1x128xf32, #tpu.memory_space<vmem>>, %arg7: memref<2x128x384xbf16, #tpu.memory_space<vmem>>, %arg8: memref<2x1x384xf32, #tpu.memory_space<vmem>>, %arg9: memref<2x128x128xbf16, #tpu.memory_space<vmem>>, %arg10: memref<2x1x128xf32, #tpu.memory_space<vmem>>, %arg11: memref<2x128x512xbf16, #tpu.memory_space<vmem>>, %arg12: memref<2x1x512xf32, #tpu.memory_space<vmem>>, %arg13: memref<2x512x128xbf16, #tpu.memory_space<vmem>>, %arg14: memref<2x1x128xf32, #tpu.memory_space<vmem>>, %arg15: memref<2x1x128xf32, #tpu.memory_space<vmem>>, %arg16: memref<2x1x128xf32, #tpu.memory_space<vmem>>, %arg17: memref<2x1x128xf32, #tpu.memory_space<vmem>>, %arg18: memref<2x1x128xf32, #tpu.memory_space<vmem>>, %arg19: memref<128x128xbf16, #tpu.memory_space<vmem>>, %arg20: memref<1x128xf32, #tpu.memory_space<vmem>>, %arg21: memref<128x128xbf16, #tpu.memory_space<vmem>>, %arg22: memref<1x128xf32, #tpu.memory_space<vmem>>, %arg23: memref<1x128xf32, #tpu.memory_space<vmem>>, %arg24: memref<1x1xf32, #tpu.memory_space<vmem>>, %arg25: memref<128x128xbf16, #tpu.memory_space<vmem>>, %arg26: memref<1x128xf32, #tpu.memory_space<vmem>>, %arg27: memref<128x3xf32, #tpu.memory_space<vmem>>, %arg28: memref<1x3xf32, #tpu.memory_space<vmem>>, %arg29: memref<1x3xf32, #tpu.memory_space<vmem>>, %arg30: memref<16x16xf32, #tpu.memory_space<vmem>>, %arg31: memref<1x16xf32, #tpu.memory_space<vmem>>, %arg32: memref<16x128xf32, #tpu.memory_space<vmem>>) attributes {dimension_semantics = [], scalar_prefetch = 0 : i64, scratch_operands = 1 : i64, tpu.core_type = #tpu.core_type<tc>} {
    %c0 = arith.constant 0 : index
    %c0_0 = arith.constant 0 : index
    %0 = vector.load %arg0[%c0, %c0_0] : memref<16x1024xf32, #tpu.memory_space<vmem>>, vector<16x1024xf32>
    %c0_1 = arith.constant 0 : index
    %c0_2 = arith.constant 0 : index
    %1 = vector.load %arg1[%c0_1, %c0_2] : memref<1024x128xbf16, #tpu.memory_space<vmem>>, vector<1024x128xbf16>
    %2 = arith.truncf %0 : vector<16x1024xf32> to vector<16x1024xbf16>
    %cst = arith.constant dense<0.000000e+00> : vector<16x128xf32>
    %3 = tpu.matmul %2, %1, %cst {dimension_numbers = #tpu.dot_dimension_numbers<[1], [0], [0], [1], [0, 0, 1, 1], [], []>} : vector<16x1024xbf16>, vector<1024x128xbf16>, vector<16x128xf32> -> vector<16x128xf32>
    %c0_3 = arith.constant 0 : index
    %c0_4 = arith.constant 0 : index
    %4 = vector.load %arg2[%c0_3, %c0_4] : memref<1x128xf32, #tpu.memory_space<vmem>>, vector<1x128xf32>
    %5 = vector.broadcast %4 : vector<1x128xf32> to vector<16x128xf32>
    %6 = arith.addf %3, %5 : vector<16x128xf32>
    %cst_5 = arith.constant 0.000000e+00 : f32
    %7 = vector.broadcast %cst_5 : f32 to vector<16x128xf32>
    %8 = arith.maximumf %6, %7 : vector<16x128xf32>
    %c0_6 = arith.constant 0 : index
    %c0_7 = arith.constant 0 : index
    %9 = vector.load %arg3[%c0_6, %c0_7] : memref<128x384xbf16, #tpu.memory_space<vmem>>, vector<128x384xbf16>
    %10 = arith.truncf %8 : vector<16x128xf32> to vector<16x128xbf16>
    %cst_8 = arith.constant dense<0.000000e+00> : vector<16x384xf32>
    %11 = tpu.matmul %10, %9, %cst_8 {dimension_numbers = #tpu.dot_dimension_numbers<[1], [0], [0], [1], [0, 0, 1, 1], [], []>} : vector<16x128xbf16>, vector<128x384xbf16>, vector<16x384xf32> -> vector<16x384xf32>
    %c0_9 = arith.constant 0 : index
    %c0_10 = arith.constant 0 : index
    %12 = vector.load %arg4[%c0_9, %c0_10] : memref<1x384xf32, #tpu.memory_space<vmem>>, vector<1x384xf32>
    %13 = vector.broadcast %12 : vector<1x384xf32> to vector<16x384xf32>
    %14 = arith.addf %11, %13 : vector<16x384xf32>
    %15 = vector.extract_strided_slice %14 {offsets = [0, 0], sizes = [16, 128], strides = [1, 1]} : vector<16x384xf32> to vector<16x128xf32>
    %cst_11 = arith.constant 0.0883883461 : f32
    %16 = vector.broadcast %cst_11 : f32 to vector<16x128xf32>
    %17 = arith.mulf %15, %16 : vector<16x128xf32>
    %18 = vector.extract_strided_slice %14 {offsets = [0, 128], sizes = [16, 128], strides = [1, 1]} : vector<16x384xf32> to vector<16x128xf32>
    %19 = vector.extract_strided_slice %14 {offsets = [0, 256], sizes = [16, 128], strides = [1, 1]} : vector<16x384xf32> to vector<16x128xf32>
    %20 = arith.truncf %17 : vector<16x128xf32> to vector<16x128xbf16>
    %21 = arith.truncf %18 : vector<16x128xf32> to vector<16x128xbf16>
    %cst_12 = arith.constant dense<0.000000e+00> : vector<16x16xf32>
    %22 = tpu.matmul %20, %21, %cst_12 {dimension_numbers = #tpu.dot_dimension_numbers<[1], [1], [0], [0], [0, 0, 1, 0], [], []>} : vector<16x128xbf16>, vector<16x128xbf16>, vector<16x16xf32> -> vector<16x16xf32>
    %cst_13 = arith.constant dense<0xFF800000> : vector<16xf32>
    %23 = vector.multi_reduction <maximumf>, %22, %cst_13 [1] : vector<16x16xf32> to vector<16xf32>
    %24 = vector.shape_cast %23 : vector<16xf32> to vector<16x1xf32>
    %25 = vector.broadcast %24 : vector<16x1xf32> to vector<16x16xf32>
    %26 = arith.subf %22, %25 : vector<16x16xf32>
    %27 = math.exp %26 : vector<16x16xf32>
    %cst_14 = arith.constant dense<0.000000e+00> : vector<16xf32>
    %28 = vector.multi_reduction <add>, %27, %cst_14 [1] : vector<16x16xf32> to vector<16xf32>
    %29 = vector.shape_cast %28 : vector<16xf32> to vector<16x1xf32>
    %30 = vector.broadcast %29 : vector<16x1xf32> to vector<16x16xf32>
    %31 = arith.divf %27, %30 : vector<16x16xf32>
    %c0_15 = arith.constant 0 : index
    %c0_16 = arith.constant 0 : index
    %32 = vector.load %arg30[%c0_15, %c0_16] : memref<16x16xf32, #tpu.memory_space<vmem>>, vector<16x16xf32>
    tpu.vector_store %arg30[%c0_15, %c0_16], %31 {strides = array<i32>} : memref<16x16xf32, #tpu.memory_space<vmem>>, vector<16x16xf32>,
    %33 = arith.truncf %31 : vector<16x16xf32> to vector<16x16xbf16>
    %34 = arith.truncf %19 : vector<16x128xf32> to vector<16x128xbf16>
    %cst_17 = arith.constant dense<0.000000e+00> : vector<16x128xf32>
    %35 = tpu.matmul %33, %34, %cst_17 {dimension_numbers = #tpu.dot_dimension_numbers<[1], [0], [0], [1], [0, 0, 1, 1], [], []>} : vector<16x16xbf16>, vector<16x128xbf16>, vector<16x128xf32> -> vector<16x128xf32>
    %c0_18 = arith.constant 0 : index
    %c0_19 = arith.constant 0 : index
    %36 = vector.load %arg5[%c0_18, %c0_19] : memref<128x128xbf16, #tpu.memory_space<vmem>>, vector<128x128xbf16>
    %37 = arith.truncf %35 : vector<16x128xf32> to vector<16x128xbf16>
    %cst_20 = arith.constant dense<0.000000e+00> : vector<16x128xf32>
    %38 = tpu.matmul %37, %36, %cst_20 {dimension_numbers = #tpu.dot_dimension_numbers<[1], [0], [0], [1], [0, 0, 1, 1], [], []>} : vector<16x128xbf16>, vector<128x128xbf16>, vector<16x128xf32> -> vector<16x128xf32>
    %c0_21 = arith.constant 0 : index
    %c0_22 = arith.constant 0 : index
    %39 = vector.load %arg6[%c0_21, %c0_22] : memref<1x128xf32, #tpu.memory_space<vmem>>, vector<1x128xf32>
    %40 = vector.broadcast %39 : vector<1x128xf32> to vector<16x128xf32>
    %41 = arith.addf %38, %40 : vector<16x128xf32>
    %c0_23 = arith.constant 0 : index
    %c0_24 = arith.constant 0 : index
    %c0_25 = arith.constant 0 : index
    %42 = vector.load %arg7[%c0_23, %c0_24, %c0_25] : memref<2x128x384xbf16, #tpu.memory_space<vmem>>, vector<1x128x384xbf16>
    %43 = vector.shape_cast %42 : vector<1x128x384xbf16> to vector<128x384xbf16>
    %44 = arith.truncf %41 : vector<16x128xf32> to vector<16x128xbf16>
    %cst_26 = arith.constant dense<0.000000e+00> : vector<16x384xf32>
    %45 = tpu.matmul %44, %43, %cst_26 {dimension_numbers = #tpu.dot_dimension_numbers<[1], [0], [0], [1], [0, 0, 1, 1], [], []>} : vector<16x128xbf16>, vector<128x384xbf16>, vector<16x384xf32> -> vector<16x384xf32>
    %c0_27 = arith.constant 0 : index
    %c0_28 = arith.constant 0 : index
    %c0_29 = arith.constant 0 : index
    %46 = vector.load %arg8[%c0_27, %c0_28, %c0_29] : memref<2x1x384xf32, #tpu.memory_space<vmem>>, vector<1x1x384xf32>
    %47 = vector.shape_cast %46 : vector<1x1x384xf32> to vector<1x384xf32>
    %48 = vector.broadcast %47 : vector<1x384xf32> to vector<16x384xf32>
    %49 = arith.addf %45, %48 : vector<16x384xf32>
    %50 = vector.extract_strided_slice %49 {offsets = [0, 0], sizes = [16, 128], strides = [1, 1]} : vector<16x384xf32> to vector<16x128xf32>
    %cst_30 = arith.constant 2.500000e-01 : f32
    %51 = vector.broadcast %cst_30 : f32 to vector<16x128xf32>
    %52 = arith.mulf %50, %51 : vector<16x128xf32>
    %53 = vector.extract_strided_slice %49 {offsets = [0, 128], sizes = [16, 128], strides = [1, 1]} : vector<16x384xf32> to vector<16x128xf32>
    %54 = vector.extract_strided_slice %49 {offsets = [0, 256], sizes = [16, 128], strides = [1, 1]} : vector<16x384xf32> to vector<16x128xf32>
    %55 = vector.extract_strided_slice %52 {offsets = [0, 0], sizes = [16, 16], strides = [1, 1]} : vector<16x128xf32> to vector<16x16xf32>
    %56 = vector.extract_strided_slice %53 {offsets = [0, 0], sizes = [16, 16], strides = [1, 1]} : vector<16x128xf32> to vector<16x16xf32>
    %57 = arith.truncf %55 : vector<16x16xf32> to vector<16x16xbf16>
    %58 = arith.truncf %56 : vector<16x16xf32> to vector<16x16xbf16>
    %cst_31 = arith.constant dense<0.000000e+00> : vector<16x16xf32>
    %59 = tpu.matmul %57, %58, %cst_31 {dimension_numbers = #tpu.dot_dimension_numbers<[1], [1], [0], [0], [0, 0, 1, 0], [], []>} : vector<16x16xbf16>, vector<16x16xbf16>, vector<16x16xf32> -> vector<16x16xf32>
    %cst_32 = arith.constant dense<0xFF800000> : vector<16xf32>
    %60 = vector.multi_reduction <maximumf>, %59, %cst_32 [1] : vector<16x16xf32> to vector<16xf32>
    %61 = vector.shape_cast %60 : vector<16xf32> to vector<16x1xf32>
    %62 = vector.broadcast %61 : vector<16x1xf32> to vector<16x16xf32>
    %63 = arith.subf %59, %62 : vector<16x16xf32>
    %64 = math.exp %63 : vector<16x16xf32>
    %cst_33 = arith.constant dense<0.000000e+00> : vector<16xf32>
    %65 = vector.multi_reduction <add>, %64, %cst_33 [1] : vector<16x16xf32> to vector<16xf32>
    %66 = vector.shape_cast %65 : vector<16xf32> to vector<16x1xf32>
    %67 = vector.broadcast %66 : vector<16x1xf32> to vector<16x16xf32>
    %68 = arith.divf %64, %67 : vector<16x16xf32>
    %69 = arith.truncf %68 : vector<16x16xf32> to vector<16x16xbf16>
    %70 = vector.extract_strided_slice %54 {offsets = [0, 0], sizes = [16, 16], strides = [1, 1]} : vector<16x128xf32> to vector<16x16xf32>
    %71 = arith.truncf %70 : vector<16x16xf32> to vector<16x16xbf16>
    %cst_34 = arith.constant dense<0.000000e+00> : vector<16x16xf32>
    %72 = tpu.matmul %69, %71, %cst_34 {dimension_numbers = #tpu.dot_dimension_numbers<[1], [0], [0], [1], [0, 0, 1, 1], [], []>} : vector<16x16xbf16>, vector<16x16xbf16>, vector<16x16xf32> -> vector<16x16xf32>
    %c0_35 = arith.constant 0 : index
    %c0_36 = arith.constant 0 : index
    %73 = vector.load %arg32[%c0_35, %c0_36] : memref<16x128xf32, #tpu.memory_space<vmem>>, vector<16x16xf32>
    tpu.vector_store %arg32[%c0_35, %c0_36], %72 {strides = array<i32>} : memref<16x128xf32, #tpu.memory_space<vmem>>, vector<16x16xf32>,
    %74 = vector.extract_strided_slice %52 {offsets = [0, 16], sizes = [16, 16], strides = [1, 1]} : vector<16x128xf32> to vector<16x16xf32>
    %75 = vector.extract_strided_slice %53 {offsets = [0, 16], sizes = [16, 16], strides = [1, 1]} : vector<16x128xf32> to vector<16x16xf32>
    %76 = arith.truncf %74 : vector<16x16xf32> to vector<16x16xbf16>
    %77 = arith.truncf %75 : vector<16x16xf32> to vector<16x16xbf16>
    %cst_37 = arith.constant dense<0.000000e+00> : vector<16x16xf32>
    %78 = tpu.matmul %76, %77, %cst_37 {dimension_numbers = #tpu.dot_dimension_numbers<[1], [1], [0], [0], [0, 0, 1, 0], [], []>} : vector<16x16xbf16>, vector<16x16xbf16>, vector<16x16xf32> -> vector<16x16xf32>
    %cst_38 = arith.constant dense<0xFF800000> : vector<16xf32>
    %79 = vector.multi_reduction <maximumf>, %78, %cst_38 [1] : vector<16x16xf32> to vector<16xf32>
    %80 = vector.shape_cast %79 : vector<16xf32> to vector<16x1xf32>
    %81 = vector.broadcast %80 : vector<16x1xf32> to vector<16x16xf32>
    %82 = arith.subf %78, %81 : vector<16x16xf32>
    %83 = math.exp %82 : vector<16x16xf32>
    %cst_39 = arith.constant dense<0.000000e+00> : vector<16xf32>
    %84 = vector.multi_reduction <add>, %83, %cst_39 [1] : vector<16x16xf32> to vector<16xf32>
    %85 = vector.shape_cast %84 : vector<16xf32> to vector<16x1xf32>
    %86 = vector.broadcast %85 : vector<16x1xf32> to vector<16x16xf32>
    %87 = arith.divf %83, %86 : vector<16x16xf32>
    %88 = arith.truncf %87 : vector<16x16xf32> to vector<16x16xbf16>
    %89 = vector.extract_strided_slice %54 {offsets = [0, 16], sizes = [16, 16], strides = [1, 1]} : vector<16x128xf32> to vector<16x16xf32>
    %90 = arith.truncf %89 : vector<16x16xf32> to vector<16x16xbf16>
    %cst_40 = arith.constant dense<0.000000e+00> : vector<16x16xf32>
    %91 = tpu.matmul %88, %90, %cst_40 {dimension_numbers = #tpu.dot_dimension_numbers<[1], [0], [0], [1], [0, 0, 1, 1], [], []>} : vector<16x16xbf16>, vector<16x16xbf16>, vector<16x16xf32> -> vector<16x16xf32>
    %c0_41 = arith.constant 0 : index
    %c16 = arith.constant 16 : index
    %92 = vector.load %arg32[%c0_41, %c16] : memref<16x128xf32, #tpu.memory_space<vmem>>, vector<16x16xf32>
    tpu.vector_store %arg32[%c0_41, %c16], %91 {strides = array<i32>} : memref<16x128xf32, #tpu.memory_space<vmem>>, vector<16x16xf32>,
    %93 = vector.extract_strided_slice %52 {offsets = [0, 32], sizes = [16, 16], strides = [1, 1]} : vector<16x128xf32> to vector<16x16xf32>
    %94 = vector.extract_strided_slice %53 {offsets = [0, 32], sizes = [16, 16], strides = [1, 1]} : vector<16x128xf32> to vector<16x16xf32>
    %95 = arith.truncf %93 : vector<16x16xf32> to vector<16x16xbf16>
    %96 = arith.truncf %94 : vector<16x16xf32> to vector<16x16xbf16>
    %cst_42 = arith.constant dense<0.000000e+00> : vector<16x16xf32>
    %97 = tpu.matmul %95, %96, %cst_42 {dimension_numbers = #tpu.dot_dimension_numbers<[1], [1], [0], [0], [0, 0, 1, 0], [], []>} : vector<16x16xbf16>, vector<16x16xbf16>, vector<16x16xf32> -> vector<16x16xf32>
    %cst_43 = arith.constant dense<0xFF800000> : vector<16xf32>
    %98 = vector.multi_reduction <maximumf>, %97, %cst_43 [1] : vector<16x16xf32> to vector<16xf32>
    %99 = vector.shape_cast %98 : vector<16xf32> to vector<16x1xf32>
    %100 = vector.broadcast %99 : vector<16x1xf32> to vector<16x16xf32>
    %101 = arith.subf %97, %100 : vector<16x16xf32>
    %102 = math.exp %101 : vector<16x16xf32>
    %cst_44 = arith.constant dense<0.000000e+00> : vector<16xf32>
    %103 = vector.multi_reduction <add>, %102, %cst_44 [1] : vector<16x16xf32> to vector<16xf32>
    %104 = vector.shape_cast %103 : vector<16xf32> to vector<16x1xf32>
    %105 = vector.broadcast %104 : vector<16x1xf32> to vector<16x16xf32>
    %106 = arith.divf %102, %105 : vector<16x16xf32>
    %107 = arith.truncf %106 : vector<16x16xf32> to vector<16x16xbf16>
    %108 = vector.extract_strided_slice %54 {offsets = [0, 32], sizes = [16, 16], strides = [1, 1]} : vector<16x128xf32> to vector<16x16xf32>
    %109 = arith.truncf %108 : vector<16x16xf32> to vector<16x16xbf16>
    %cst_45 = arith.constant dense<0.000000e+00> : vector<16x16xf32>
    %110 = tpu.matmul %107, %109, %cst_45 {dimension_numbers = #tpu.dot_dimension_numbers<[1], [0], [0], [1], [0, 0, 1, 1], [], []>} : vector<16x16xbf16>, vector<16x16xbf16>, vector<16x16xf32> -> vector<16x16xf32>
    %c0_46 = arith.constant 0 : index
    %c32 = arith.constant 32 : index
    %111 = vector.load %arg32[%c0_46, %c32] : memref<16x128xf32, #tpu.memory_space<vmem>>, vector<16x16xf32>
    tpu.vector_store %arg32[%c0_46, %c32], %110 {strides = array<i32>} : memref<16x128xf32, #tpu.memory_space<vmem>>, vector<16x16xf32>,
    %112 = vector.extract_strided_slice %52 {offsets = [0, 48], sizes = [16, 16], strides = [1, 1]} : vector<16x128xf32> to vector<16x16xf32>
    %113 = vector.extract_strided_slice %53 {offsets = [0, 48], sizes = [16, 16], strides = [1, 1]} : vector<16x128xf32> to vector<16x16xf32>
    %114 = arith.truncf %112 : vector<16x16xf32> to vector<16x16xbf16>
    %115 = arith.truncf %113 : vector<16x16xf32> to vector<16x16xbf16>
    %cst_47 = arith.constant dense<0.000000e+00> : vector<16x16xf32>
    %116 = tpu.matmul %114, %115, %cst_47 {dimension_numbers = #tpu.dot_dimension_numbers<[1], [1], [0], [0], [0, 0, 1, 0], [], []>} : vector<16x16xbf16>, vector<16x16xbf16>, vector<16x16xf32> -> vector<16x16xf32>
    %cst_48 = arith.constant dense<0xFF800000> : vector<16xf32>
    %117 = vector.multi_reduction <maximumf>, %116, %cst_48 [1] : vector<16x16xf32> to vector<16xf32>
    %118 = vector.shape_cast %117 : vector<16xf32> to vector<16x1xf32>
    %119 = vector.broadcast %118 : vector<16x1xf32> to vector<16x16xf32>
    %120 = arith.subf %116, %119 : vector<16x16xf32>
    %121 = math.exp %120 : vector<16x16xf32>
    %cst_49 = arith.constant dense<0.000000e+00> : vector<16xf32>
    %122 = vector.multi_reduction <add>, %121, %cst_49 [1] : vector<16x16xf32> to vector<16xf32>
    %123 = vector.shape_cast %122 : vector<16xf32> to vector<16x1xf32>
    %124 = vector.broadcast %123 : vector<16x1xf32> to vector<16x16xf32>
    %125 = arith.divf %121, %124 : vector<16x16xf32>
    %126 = arith.truncf %125 : vector<16x16xf32> to vector<16x16xbf16>
    %127 = vector.extract_strided_slice %54 {offsets = [0, 48], sizes = [16, 16], strides = [1, 1]} : vector<16x128xf32> to vector<16x16xf32>
    %128 = arith.truncf %127 : vector<16x16xf32> to vector<16x16xbf16>
    %cst_50 = arith.constant dense<0.000000e+00> : vector<16x16xf32>
    %129 = tpu.matmul %126, %128, %cst_50 {dimension_numbers = #tpu.dot_dimension_numbers<[1], [0], [0], [1], [0, 0, 1, 1], [], []>} : vector<16x16xbf16>, vector<16x16xbf16>, vector<16x16xf32> -> vector<16x16xf32>
    %c0_51 = arith.constant 0 : index
    %c48 = arith.constant 48 : index
    %130 = vector.load %arg32[%c0_51, %c48] : memref<16x128xf32, #tpu.memory_space<vmem>>, vector<16x16xf32>
    tpu.vector_store %arg32[%c0_51, %c48], %129 {strides = array<i32>} : memref<16x128xf32, #tpu.memory_space<vmem>>, vector<16x16xf32>,
    %131 = vector.extract_strided_slice %52 {offsets = [0, 64], sizes = [16, 16], strides = [1, 1]} : vector<16x128xf32> to vector<16x16xf32>
    %132 = vector.extract_strided_slice %53 {offsets = [0, 64], sizes = [16, 16], strides = [1, 1]} : vector<16x128xf32> to vector<16x16xf32>
    %133 = arith.truncf %131 : vector<16x16xf32> to vector<16x16xbf16>
    %134 = arith.truncf %132 : vector<16x16xf32> to vector<16x16xbf16>
    %cst_52 = arith.constant dense<0.000000e+00> : vector<16x16xf32>
    %135 = tpu.matmul %133, %134, %cst_52 {dimension_numbers = #tpu.dot_dimension_numbers<[1], [1], [0], [0], [0, 0, 1, 0], [], []>} : vector<16x16xbf16>, vector<16x16xbf16>, vector<16x16xf32> -> vector<16x16xf32>
    %cst_53 = arith.constant dense<0xFF800000> : vector<16xf32>
    %136 = vector.multi_reduction <maximumf>, %135, %cst_53 [1] : vector<16x16xf32> to vector<16xf32>
    %137 = vector.shape_cast %136 : vector<16xf32> to vector<16x1xf32>
    %138 = vector.broadcast %137 : vector<16x1xf32> to vector<16x16xf32>
    %139 = arith.subf %135, %138 : vector<16x16xf32>
    %140 = math.exp %139 : vector<16x16xf32>
    %cst_54 = arith.constant dense<0.000000e+00> : vector<16xf32>
    %141 = vector.multi_reduction <add>, %140, %cst_54 [1] : vector<16x16xf32> to vector<16xf32>
    %142 = vector.shape_cast %141 : vector<16xf32> to vector<16x1xf32>
    %143 = vector.broadcast %142 : vector<16x1xf32> to vector<16x16xf32>
    %144 = arith.divf %140, %143 : vector<16x16xf32>
    %145 = arith.truncf %144 : vector<16x16xf32> to vector<16x16xbf16>
    %146 = vector.extract_strided_slice %54 {offsets = [0, 64], sizes = [16, 16], strides = [1, 1]} : vector<16x128xf32> to vector<16x16xf32>
    %147 = arith.truncf %146 : vector<16x16xf32> to vector<16x16xbf16>
    %cst_55 = arith.constant dense<0.000000e+00> : vector<16x16xf32>
    %148 = tpu.matmul %145, %147, %cst_55 {dimension_numbers = #tpu.dot_dimension_numbers<[1], [0], [0], [1], [0, 0, 1, 1], [], []>} : vector<16x16xbf16>, vector<16x16xbf16>, vector<16x16xf32> -> vector<16x16xf32>
    %c0_56 = arith.constant 0 : index
    %c64 = arith.constant 64 : index
    %149 = vector.load %arg32[%c0_56, %c64] : memref<16x128xf32, #tpu.memory_space<vmem>>, vector<16x16xf32>
    tpu.vector_store %arg32[%c0_56, %c64], %148 {strides = array<i32>} : memref<16x128xf32, #tpu.memory_space<vmem>>, vector<16x16xf32>,
    %150 = vector.extract_strided_slice %52 {offsets = [0, 80], sizes = [16, 16], strides = [1, 1]} : vector<16x128xf32> to vector<16x16xf32>
    %151 = vector.extract_strided_slice %53 {offsets = [0, 80], sizes = [16, 16], strides = [1, 1]} : vector<16x128xf32> to vector<16x16xf32>
    %152 = arith.truncf %150 : vector<16x16xf32> to vector<16x16xbf16>
    %153 = arith.truncf %151 : vector<16x16xf32> to vector<16x16xbf16>
    %cst_57 = arith.constant dense<0.000000e+00> : vector<16x16xf32>
    %154 = tpu.matmul %152, %153, %cst_57 {dimension_numbers = #tpu.dot_dimension_numbers<[1], [1], [0], [0], [0, 0, 1, 0], [], []>} : vector<16x16xbf16>, vector<16x16xbf16>, vector<16x16xf32> -> vector<16x16xf32>
    %cst_58 = arith.constant dense<0xFF800000> : vector<16xf32>
    %155 = vector.multi_reduction <maximumf>, %154, %cst_58 [1] : vector<16x16xf32> to vector<16xf32>
    %156 = vector.shape_cast %155 : vector<16xf32> to vector<16x1xf32>
    %157 = vector.broadcast %156 : vector<16x1xf32> to vector<16x16xf32>
    %158 = arith.subf %154, %157 : vector<16x16xf32>
    %159 = math.exp %158 : vector<16x16xf32>
    %cst_59 = arith.constant dense<0.000000e+00> : vector<16xf32>
    %160 = vector.multi_reduction <add>, %159, %cst_59 [1] : vector<16x16xf32> to vector<16xf32>
    %161 = vector.shape_cast %160 : vector<16xf32> to vector<16x1xf32>
    %162 = vector.broadcast %161 : vector<16x1xf32> to vector<16x16xf32>
    %163 = arith.divf %159, %162 : vector<16x16xf32>
    %164 = arith.truncf %163 : vector<16x16xf32> to vector<16x16xbf16>
    %165 = vector.extract_strided_slice %54 {offsets = [0, 80], sizes = [16, 16], strides = [1, 1]} : vector<16x128xf32> to vector<16x16xf32>
    %166 = arith.truncf %165 : vector<16x16xf32> to vector<16x16xbf16>
    %cst_60 = arith.constant dense<0.000000e+00> : vector<16x16xf32>
    %167 = tpu.matmul %164, %166, %cst_60 {dimension_numbers = #tpu.dot_dimension_numbers<[1], [0], [0], [1], [0, 0, 1, 1], [], []>} : vector<16x16xbf16>, vector<16x16xbf16>, vector<16x16xf32> -> vector<16x16xf32>
    %c0_61 = arith.constant 0 : index
    %c80 = arith.constant 80 : index
    %168 = vector.load %arg32[%c0_61, %c80] : memref<16x128xf32, #tpu.memory_space<vmem>>, vector<16x16xf32>
    tpu.vector_store %arg32[%c0_61, %c80], %167 {strides = array<i32>} : memref<16x128xf32, #tpu.memory_space<vmem>>, vector<16x16xf32>,
    %169 = vector.extract_strided_slice %52 {offsets = [0, 96], sizes = [16, 16], strides = [1, 1]} : vector<16x128xf32> to vector<16x16xf32>
    %170 = vector.extract_strided_slice %53 {offsets = [0, 96], sizes = [16, 16], strides = [1, 1]} : vector<16x128xf32> to vector<16x16xf32>
    %171 = arith.truncf %169 : vector<16x16xf32> to vector<16x16xbf16>
    %172 = arith.truncf %170 : vector<16x16xf32> to vector<16x16xbf16>
    %cst_62 = arith.constant dense<0.000000e+00> : vector<16x16xf32>
    %173 = tpu.matmul %171, %172, %cst_62 {dimension_numbers = #tpu.dot_dimension_numbers<[1], [1], [0], [0], [0, 0, 1, 0], [], []>} : vector<16x16xbf16>, vector<16x16xbf16>, vector<16x16xf32> -> vector<16x16xf32>
    %cst_63 = arith.constant dense<0xFF800000> : vector<16xf32>
    %174 = vector.multi_reduction <maximumf>, %173, %cst_63 [1] : vector<16x16xf32> to vector<16xf32>
    %175 = vector.shape_cast %174 : vector<16xf32> to vector<16x1xf32>
    %176 = vector.broadcast %175 : vector<16x1xf32> to vector<16x16xf32>
    %177 = arith.subf %173, %176 : vector<16x16xf32>
    %178 = math.exp %177 : vector<16x16xf32>
    %cst_64 = arith.constant dense<0.000000e+00> : vector<16xf32>
    %179 = vector.multi_reduction <add>, %178, %cst_64 [1] : vector<16x16xf32> to vector<16xf32>
    %180 = vector.shape_cast %179 : vector<16xf32> to vector<16x1xf32>
    %181 = vector.broadcast %180 : vector<16x1xf32> to vector<16x16xf32>
    %182 = arith.divf %178, %181 : vector<16x16xf32>
    %183 = arith.truncf %182 : vector<16x16xf32> to vector<16x16xbf16>
    %184 = vector.extract_strided_slice %54 {offsets = [0, 96], sizes = [16, 16], strides = [1, 1]} : vector<16x128xf32> to vector<16x16xf32>
    %185 = arith.truncf %184 : vector<16x16xf32> to vector<16x16xbf16>
    %cst_65 = arith.constant dense<0.000000e+00> : vector<16x16xf32>
    %186 = tpu.matmul %183, %185, %cst_65 {dimension_numbers = #tpu.dot_dimension_numbers<[1], [0], [0], [1], [0, 0, 1, 1], [], []>} : vector<16x16xbf16>, vector<16x16xbf16>, vector<16x16xf32> -> vector<16x16xf32>
    %c0_66 = arith.constant 0 : index
    %c96 = arith.constant 96 : index
    %187 = vector.load %arg32[%c0_66, %c96] : memref<16x128xf32, #tpu.memory_space<vmem>>, vector<16x16xf32>
    tpu.vector_store %arg32[%c0_66, %c96], %186 {strides = array<i32>} : memref<16x128xf32, #tpu.memory_space<vmem>>, vector<16x16xf32>,
    %188 = vector.extract_strided_slice %52 {offsets = [0, 112], sizes = [16, 16], strides = [1, 1]} : vector<16x128xf32> to vector<16x16xf32>
    %189 = vector.extract_strided_slice %53 {offsets = [0, 112], sizes = [16, 16], strides = [1, 1]} : vector<16x128xf32> to vector<16x16xf32>
    %190 = arith.truncf %188 : vector<16x16xf32> to vector<16x16xbf16>
    %191 = arith.truncf %189 : vector<16x16xf32> to vector<16x16xbf16>
    %cst_67 = arith.constant dense<0.000000e+00> : vector<16x16xf32>
    %192 = tpu.matmul %190, %191, %cst_67 {dimension_numbers = #tpu.dot_dimension_numbers<[1], [1], [0], [0], [0, 0, 1, 0], [], []>} : vector<16x16xbf16>, vector<16x16xbf16>, vector<16x16xf32> -> vector<16x16xf32>
    %cst_68 = arith.constant dense<0xFF800000> : vector<16xf32>
    %193 = vector.multi_reduction <maximumf>, %192, %cst_68 [1] : vector<16x16xf32> to vector<16xf32>
    %194 = vector.shape_cast %193 : vector<16xf32> to vector<16x1xf32>
    %195 = vector.broadcast %194 : vector<16x1xf32> to vector<16x16xf32>
    %196 = arith.subf %192, %195 : vector<16x16xf32>
    %197 = math.exp %196 : vector<16x16xf32>
    %cst_69 = arith.constant dense<0.000000e+00> : vector<16xf32>
    %198 = vector.multi_reduction <add>, %197, %cst_69 [1] : vector<16x16xf32> to vector<16xf32>
    %199 = vector.shape_cast %198 : vector<16xf32> to vector<16x1xf32>
    %200 = vector.broadcast %199 : vector<16x1xf32> to vector<16x16xf32>
    %201 = arith.divf %197, %200 : vector<16x16xf32>
    %202 = arith.truncf %201 : vector<16x16xf32> to vector<16x16xbf16>
    %203 = vector.extract_strided_slice %54 {offsets = [0, 112], sizes = [16, 16], strides = [1, 1]} : vector<16x128xf32> to vector<16x16xf32>
    %204 = arith.truncf %203 : vector<16x16xf32> to vector<16x16xbf16>
    %cst_70 = arith.constant dense<0.000000e+00> : vector<16x16xf32>
    %205 = tpu.matmul %202, %204, %cst_70 {dimension_numbers = #tpu.dot_dimension_numbers<[1], [0], [0], [1], [0, 0, 1, 1], [], []>} : vector<16x16xbf16>, vector<16x16xbf16>, vector<16x16xf32> -> vector<16x16xf32>
    %c0_71 = arith.constant 0 : index
    %c112 = arith.constant 112 : index
    %206 = vector.load %arg32[%c0_71, %c112] : memref<16x128xf32, #tpu.memory_space<vmem>>, vector<16x16xf32>
    tpu.vector_store %arg32[%c0_71, %c112], %205 {strides = array<i32>} : memref<16x128xf32, #tpu.memory_space<vmem>>, vector<16x16xf32>,
    %c0_72 = arith.constant 0 : index
    %c0_73 = arith.constant 0 : index
    %207 = vector.load %arg32[%c0_72, %c0_73] : memref<16x128xf32, #tpu.memory_space<vmem>>, vector<16x128xf32>
    %c0_74 = arith.constant 0 : index
    %c0_75 = arith.constant 0 : index
    %c0_76 = arith.constant 0 : index
    %208 = vector.load %arg9[%c0_74, %c0_75, %c0_76] : memref<2x128x128xbf16, #tpu.memory_space<vmem>>, vector<1x128x128xbf16>
    %209 = vector.shape_cast %208 : vector<1x128x128xbf16> to vector<128x128xbf16>
    %210 = arith.truncf %207 : vector<16x128xf32> to vector<16x128xbf16>
    %cst_77 = arith.constant dense<0.000000e+00> : vector<16x128xf32>
    %211 = tpu.matmul %210, %209, %cst_77 {dimension_numbers = #tpu.dot_dimension_numbers<[1], [0], [0], [1], [0, 0, 1, 1], [], []>} : vector<16x128xbf16>, vector<128x128xbf16>, vector<16x128xf32> -> vector<16x128xf32>
    %c0_78 = arith.constant 0 : index
    %c0_79 = arith.constant 0 : index
    %c0_80 = arith.constant 0 : index
    %212 = vector.load %arg10[%c0_78, %c0_79, %c0_80] : memref<2x1x128xf32, #tpu.memory_space<vmem>>, vector<1x1x128xf32>
    %213 = vector.shape_cast %212 : vector<1x1x128xf32> to vector<1x128xf32>
    %214 = vector.broadcast %213 : vector<1x128xf32> to vector<16x128xf32>
    %215 = arith.addf %211, %214 : vector<16x128xf32>
    %216 = arith.addf %41, %215 : vector<16x128xf32>
    %c0_81 = arith.constant 0 : index
    %c0_82 = arith.constant 0 : index
    %c0_83 = arith.constant 0 : index
    %217 = vector.load %arg15[%c0_81, %c0_82, %c0_83] : memref<2x1x128xf32, #tpu.memory_space<vmem>>, vector<1x1x128xf32>
    %218 = vector.shape_cast %217 : vector<1x1x128xf32> to vector<1x128xf32>
    %c0_84 = arith.constant 0 : index
    %c0_85 = arith.constant 0 : index
    %c0_86 = arith.constant 0 : index
    %219 = vector.load %arg16[%c0_84, %c0_85, %c0_86] : memref<2x1x128xf32, #tpu.memory_space<vmem>>, vector<1x1x128xf32>
    %220 = vector.shape_cast %219 : vector<1x1x128xf32> to vector<1x128xf32>
    %cst_87 = arith.constant dense<0.000000e+00> : vector<16xf32>
    %221 = vector.multi_reduction <add>, %216, %cst_87 [1] : vector<16x128xf32> to vector<16xf32>
    %222 = vector.shape_cast %221 : vector<16xf32> to vector<16x1xf32>
    %cst_88 = arith.constant 1.280000e+02 : f32
    %223 = vector.broadcast %cst_88 : f32 to vector<16x1xf32>
    %224 = arith.divf %222, %223 : vector<16x1xf32>
    %225 = vector.broadcast %224 : vector<16x1xf32> to vector<16x128xf32>
    %226 = arith.subf %216, %225 : vector<16x128xf32>
    %227 = arith.mulf %226, %226 : vector<16x128xf32>
    %cst_89 = arith.constant dense<0.000000e+00> : vector<16xf32>
    %228 = vector.multi_reduction <add>, %227, %cst_89 [1] : vector<16x128xf32> to vector<16xf32>
    %229 = vector.shape_cast %228 : vector<16xf32> to vector<16x1xf32>
    %cst_90 = arith.constant 1.280000e+02 : f32
    %230 = vector.broadcast %cst_90 : f32 to vector<16x1xf32>
    %231 = arith.divf %229, %230 : vector<16x1xf32>
    %cst_91 = arith.constant 9.99999974E-6 : f32
    %232 = vector.broadcast %cst_91 : f32 to vector<16x1xf32>
    %233 = arith.addf %231, %232 : vector<16x1xf32>
    %234 = math.rsqrt %233 : vector<16x1xf32>
    %235 = vector.broadcast %234 : vector<16x1xf32> to vector<16x128xf32>
    %236 = arith.mulf %226, %235 : vector<16x128xf32>
    %237 = vector.broadcast %218 : vector<1x128xf32> to vector<16x128xf32>
    %238 = arith.mulf %236, %237 : vector<16x128xf32>
    %239 = vector.broadcast %220 : vector<1x128xf32> to vector<16x128xf32>
    %240 = arith.addf %238, %239 : vector<16x128xf32>
    %c0_92 = arith.constant 0 : index
    %c0_93 = arith.constant 0 : index
    %c0_94 = arith.constant 0 : index
    %241 = vector.load %arg11[%c0_92, %c0_93, %c0_94] : memref<2x128x512xbf16, #tpu.memory_space<vmem>>, vector<1x128x512xbf16>
    %242 = vector.shape_cast %241 : vector<1x128x512xbf16> to vector<128x512xbf16>
    %243 = arith.truncf %240 : vector<16x128xf32> to vector<16x128xbf16>
    %cst_95 = arith.constant dense<0.000000e+00> : vector<16x512xf32>
    %244 = tpu.matmul %243, %242, %cst_95 {dimension_numbers = #tpu.dot_dimension_numbers<[1], [0], [0], [1], [0, 0, 1, 1], [], []>} : vector<16x128xbf16>, vector<128x512xbf16>, vector<16x512xf32> -> vector<16x512xf32>
    %c0_96 = arith.constant 0 : index
    %c0_97 = arith.constant 0 : index
    %c0_98 = arith.constant 0 : index
    %245 = vector.load %arg12[%c0_96, %c0_97, %c0_98] : memref<2x1x512xf32, #tpu.memory_space<vmem>>, vector<1x1x512xf32>
    %246 = vector.shape_cast %245 : vector<1x1x512xf32> to vector<1x512xf32>
    %247 = vector.broadcast %246 : vector<1x512xf32> to vector<16x512xf32>
    %248 = arith.addf %244, %247 : vector<16x512xf32>
    %cst_99 = arith.constant 0.000000e+00 : f32
    %249 = vector.broadcast %cst_99 : f32 to vector<16x512xf32>
    %250 = arith.maximumf %248, %249 : vector<16x512xf32>
    %c0_100 = arith.constant 0 : index
    %c0_101 = arith.constant 0 : index
    %c0_102 = arith.constant 0 : index
    %251 = vector.load %arg13[%c0_100, %c0_101, %c0_102] : memref<2x512x128xbf16, #tpu.memory_space<vmem>>, vector<1x512x128xbf16>
    %252 = vector.shape_cast %251 : vector<1x512x128xbf16> to vector<512x128xbf16>
    %253 = arith.truncf %250 : vector<16x512xf32> to vector<16x512xbf16>
    %cst_103 = arith.constant dense<0.000000e+00> : vector<16x128xf32>
    %254 = tpu.matmul %253, %252, %cst_103 {dimension_numbers = #tpu.dot_dimension_numbers<[1], [0], [0], [1], [0, 0, 1, 1], [], []>} : vector<16x512xbf16>, vector<512x128xbf16>, vector<16x128xf32> -> vector<16x128xf32>
    %c0_104 = arith.constant 0 : index
    %c0_105 = arith.constant 0 : index
    %c0_106 = arith.constant 0 : index
    %255 = vector.load %arg14[%c0_104, %c0_105, %c0_106] : memref<2x1x128xf32, #tpu.memory_space<vmem>>, vector<1x1x128xf32>
    %256 = vector.shape_cast %255 : vector<1x1x128xf32> to vector<1x128xf32>
    %257 = vector.broadcast %256 : vector<1x128xf32> to vector<16x128xf32>
    %258 = arith.addf %254, %257 : vector<16x128xf32>
    %259 = arith.addf %240, %258 : vector<16x128xf32>
    %c0_107 = arith.constant 0 : index
    %c0_108 = arith.constant 0 : index
    %c0_109 = arith.constant 0 : index
    %260 = vector.load %arg17[%c0_107, %c0_108, %c0_109] : memref<2x1x128xf32, #tpu.memory_space<vmem>>, vector<1x1x128xf32>
    %261 = vector.shape_cast %260 : vector<1x1x128xf32> to vector<1x128xf32>
    %c0_110 = arith.constant 0 : index
    %c0_111 = arith.constant 0 : index
    %c0_112 = arith.constant 0 : index
    %262 = vector.load %arg18[%c0_110, %c0_111, %c0_112] : memref<2x1x128xf32, #tpu.memory_space<vmem>>, vector<1x1x128xf32>
    %263 = vector.shape_cast %262 : vector<1x1x128xf32> to vector<1x128xf32>
    %cst_113 = arith.constant dense<0.000000e+00> : vector<16xf32>
    %264 = vector.multi_reduction <add>, %259, %cst_113 [1] : vector<16x128xf32> to vector<16xf32>
    %265 = vector.shape_cast %264 : vector<16xf32> to vector<16x1xf32>
    %cst_114 = arith.constant 1.280000e+02 : f32
    %266 = vector.broadcast %cst_114 : f32 to vector<16x1xf32>
    %267 = arith.divf %265, %266 : vector<16x1xf32>
    %268 = vector.broadcast %267 : vector<16x1xf32> to vector<16x128xf32>
    %269 = arith.subf %259, %268 : vector<16x128xf32>
    %270 = arith.mulf %269, %269 : vector<16x128xf32>
    %cst_115 = arith.constant dense<0.000000e+00> : vector<16xf32>
    %271 = vector.multi_reduction <add>, %270, %cst_115 [1] : vector<16x128xf32> to vector<16xf32>
    %272 = vector.shape_cast %271 : vector<16xf32> to vector<16x1xf32>
    %cst_116 = arith.constant 1.280000e+02 : f32
    %273 = vector.broadcast %cst_116 : f32 to vector<16x1xf32>
    %274 = arith.divf %272, %273 : vector<16x1xf32>
    %cst_117 = arith.constant 9.99999974E-6 : f32
    %275 = vector.broadcast %cst_117 : f32 to vector<16x1xf32>
    %276 = arith.addf %274, %275 : vector<16x1xf32>
    %277 = math.rsqrt %276 : vector<16x1xf32>
    %278 = vector.broadcast %277 : vector<16x1xf32> to vector<16x128xf32>
    %279 = arith.mulf %269, %278 : vector<16x128xf32>
    %280 = vector.broadcast %261 : vector<1x128xf32> to vector<16x128xf32>
    %281 = arith.mulf %279, %280 : vector<16x128xf32>
    %282 = vector.broadcast %263 : vector<1x128xf32> to vector<16x128xf32>
    %283 = arith.addf %281, %282 : vector<16x128xf32>
    %c1 = arith.constant 1 : index
    %c0_118 = arith.constant 0 : index
    %c0_119 = arith.constant 0 : index
    %284 = vector.load %arg7[%c1, %c0_118, %c0_119] : memref<2x128x384xbf16, #tpu.memory_space<vmem>>, vector<1x128x384xbf16>
    %285 = vector.shape_cast %284 : vector<1x128x384xbf16> to vector<128x384xbf16>
    %286 = arith.truncf %283 : vector<16x128xf32> to vector<16x128xbf16>
    %cst_120 = arith.constant dense<0.000000e+00> : vector<16x384xf32>
    %287 = tpu.matmul %286, %285, %cst_120 {dimension_numbers = #tpu.dot_dimension_numbers<[1], [0], [0], [1], [0, 0, 1, 1], [], []>} : vector<16x128xbf16>, vector<128x384xbf16>, vector<16x384xf32> -> vector<16x384xf32>
    %c1_121 = arith.constant 1 : index
    %c0_122 = arith.constant 0 : index
    %c0_123 = arith.constant 0 : index
    %288 = vector.load %arg8[%c1_121, %c0_122, %c0_123] : memref<2x1x384xf32, #tpu.memory_space<vmem>>, vector<1x1x384xf32>
    %289 = vector.shape_cast %288 : vector<1x1x384xf32> to vector<1x384xf32>
    %290 = vector.broadcast %289 : vector<1x384xf32> to vector<16x384xf32>
    %291 = arith.addf %287, %290 : vector<16x384xf32>
    %292 = vector.extract_strided_slice %291 {offsets = [0, 0], sizes = [16, 128], strides = [1, 1]} : vector<16x384xf32> to vector<16x128xf32>
    %cst_124 = arith.constant 2.500000e-01 : f32
    %293 = vector.broadcast %cst_124 : f32 to vector<16x128xf32>
    %294 = arith.mulf %292, %293 : vector<16x128xf32>
    %295 = vector.extract_strided_slice %291 {offsets = [0, 128], sizes = [16, 128], strides = [1, 1]} : vector<16x384xf32> to vector<16x128xf32>
    %296 = vector.extract_strided_slice %291 {offsets = [0, 256], sizes = [16, 128], strides = [1, 1]} : vector<16x384xf32> to vector<16x128xf32>
    %297 = vector.extract_strided_slice %294 {offsets = [0, 0], sizes = [16, 16], strides = [1, 1]} : vector<16x128xf32> to vector<16x16xf32>
    %298 = vector.extract_strided_slice %295 {offsets = [0, 0], sizes = [16, 16], strides = [1, 1]} : vector<16x128xf32> to vector<16x16xf32>
    %299 = arith.truncf %297 : vector<16x16xf32> to vector<16x16xbf16>
    %300 = arith.truncf %298 : vector<16x16xf32> to vector<16x16xbf16>
    %cst_125 = arith.constant dense<0.000000e+00> : vector<16x16xf32>
    %301 = tpu.matmul %299, %300, %cst_125 {dimension_numbers = #tpu.dot_dimension_numbers<[1], [1], [0], [0], [0, 0, 1, 0], [], []>} : vector<16x16xbf16>, vector<16x16xbf16>, vector<16x16xf32> -> vector<16x16xf32>
    %cst_126 = arith.constant dense<0xFF800000> : vector<16xf32>
    %302 = vector.multi_reduction <maximumf>, %301, %cst_126 [1] : vector<16x16xf32> to vector<16xf32>
    %303 = vector.shape_cast %302 : vector<16xf32> to vector<16x1xf32>
    %304 = vector.broadcast %303 : vector<16x1xf32> to vector<16x16xf32>
    %305 = arith.subf %301, %304 : vector<16x16xf32>
    %306 = math.exp %305 : vector<16x16xf32>
    %cst_127 = arith.constant dense<0.000000e+00> : vector<16xf32>
    %307 = vector.multi_reduction <add>, %306, %cst_127 [1] : vector<16x16xf32> to vector<16xf32>
    %308 = vector.shape_cast %307 : vector<16xf32> to vector<16x1xf32>
    %309 = vector.broadcast %308 : vector<16x1xf32> to vector<16x16xf32>
    %310 = arith.divf %306, %309 : vector<16x16xf32>
    %311 = arith.truncf %310 : vector<16x16xf32> to vector<16x16xbf16>
    %312 = vector.extract_strided_slice %296 {offsets = [0, 0], sizes = [16, 16], strides = [1, 1]} : vector<16x128xf32> to vector<16x16xf32>
    %313 = arith.truncf %312 : vector<16x16xf32> to vector<16x16xbf16>
    %cst_128 = arith.constant dense<0.000000e+00> : vector<16x16xf32>
    %314 = tpu.matmul %311, %313, %cst_128 {dimension_numbers = #tpu.dot_dimension_numbers<[1], [0], [0], [1], [0, 0, 1, 1], [], []>} : vector<16x16xbf16>, vector<16x16xbf16>, vector<16x16xf32> -> vector<16x16xf32>
    %c0_129 = arith.constant 0 : index
    %c0_130 = arith.constant 0 : index
    %315 = vector.load %arg32[%c0_129, %c0_130] : memref<16x128xf32, #tpu.memory_space<vmem>>, vector<16x16xf32>
    tpu.vector_store %arg32[%c0_129, %c0_130], %314 {strides = array<i32>} : memref<16x128xf32, #tpu.memory_space<vmem>>, vector<16x16xf32>,
    %316 = vector.extract_strided_slice %294 {offsets = [0, 16], sizes = [16, 16], strides = [1, 1]} : vector<16x128xf32> to vector<16x16xf32>
    %317 = vector.extract_strided_slice %295 {offsets = [0, 16], sizes = [16, 16], strides = [1, 1]} : vector<16x128xf32> to vector<16x16xf32>
    %318 = arith.truncf %316 : vector<16x16xf32> to vector<16x16xbf16>
    %319 = arith.truncf %317 : vector<16x16xf32> to vector<16x16xbf16>
    %cst_131 = arith.constant dense<0.000000e+00> : vector<16x16xf32>
    %320 = tpu.matmul %318, %319, %cst_131 {dimension_numbers = #tpu.dot_dimension_numbers<[1], [1], [0], [0], [0, 0, 1, 0], [], []>} : vector<16x16xbf16>, vector<16x16xbf16>, vector<16x16xf32> -> vector<16x16xf32>
    %cst_132 = arith.constant dense<0xFF800000> : vector<16xf32>
    %321 = vector.multi_reduction <maximumf>, %320, %cst_132 [1] : vector<16x16xf32> to vector<16xf32>
    %322 = vector.shape_cast %321 : vector<16xf32> to vector<16x1xf32>
    %323 = vector.broadcast %322 : vector<16x1xf32> to vector<16x16xf32>
    %324 = arith.subf %320, %323 : vector<16x16xf32>
    %325 = math.exp %324 : vector<16x16xf32>
    %cst_133 = arith.constant dense<0.000000e+00> : vector<16xf32>
    %326 = vector.multi_reduction <add>, %325, %cst_133 [1] : vector<16x16xf32> to vector<16xf32>
    %327 = vector.shape_cast %326 : vector<16xf32> to vector<16x1xf32>
    %328 = vector.broadcast %327 : vector<16x1xf32> to vector<16x16xf32>
    %329 = arith.divf %325, %328 : vector<16x16xf32>
    %330 = arith.truncf %329 : vector<16x16xf32> to vector<16x16xbf16>
    %331 = vector.extract_strided_slice %296 {offsets = [0, 16], sizes = [16, 16], strides = [1, 1]} : vector<16x128xf32> to vector<16x16xf32>
    %332 = arith.truncf %331 : vector<16x16xf32> to vector<16x16xbf16>
    %cst_134 = arith.constant dense<0.000000e+00> : vector<16x16xf32>
    %333 = tpu.matmul %330, %332, %cst_134 {dimension_numbers = #tpu.dot_dimension_numbers<[1], [0], [0], [1], [0, 0, 1, 1], [], []>} : vector<16x16xbf16>, vector<16x16xbf16>, vector<16x16xf32> -> vector<16x16xf32>
    %c0_135 = arith.constant 0 : index
    %c16_136 = arith.constant 16 : index
    %334 = vector.load %arg32[%c0_135, %c16_136] : memref<16x128xf32, #tpu.memory_space<vmem>>, vector<16x16xf32>
    tpu.vector_store %arg32[%c0_135, %c16_136], %333 {strides = array<i32>} : memref<16x128xf32, #tpu.memory_space<vmem>>, vector<16x16xf32>,
    %335 = vector.extract_strided_slice %294 {offsets = [0, 32], sizes = [16, 16], strides = [1, 1]} : vector<16x128xf32> to vector<16x16xf32>
    %336 = vector.extract_strided_slice %295 {offsets = [0, 32], sizes = [16, 16], strides = [1, 1]} : vector<16x128xf32> to vector<16x16xf32>
    %337 = arith.truncf %335 : vector<16x16xf32> to vector<16x16xbf16>
    %338 = arith.truncf %336 : vector<16x16xf32> to vector<16x16xbf16>
    %cst_137 = arith.constant dense<0.000000e+00> : vector<16x16xf32>
    %339 = tpu.matmul %337, %338, %cst_137 {dimension_numbers = #tpu.dot_dimension_numbers<[1], [1], [0], [0], [0, 0, 1, 0], [], []>} : vector<16x16xbf16>, vector<16x16xbf16>, vector<16x16xf32> -> vector<16x16xf32>
    %cst_138 = arith.constant dense<0xFF800000> : vector<16xf32>
    %340 = vector.multi_reduction <maximumf>, %339, %cst_138 [1] : vector<16x16xf32> to vector<16xf32>
    %341 = vector.shape_cast %340 : vector<16xf32> to vector<16x1xf32>
    %342 = vector.broadcast %341 : vector<16x1xf32> to vector<16x16xf32>
    %343 = arith.subf %339, %342 : vector<16x16xf32>
    %344 = math.exp %343 : vector<16x16xf32>
    %cst_139 = arith.constant dense<0.000000e+00> : vector<16xf32>
    %345 = vector.multi_reduction <add>, %344, %cst_139 [1] : vector<16x16xf32> to vector<16xf32>
    %346 = vector.shape_cast %345 : vector<16xf32> to vector<16x1xf32>
    %347 = vector.broadcast %346 : vector<16x1xf32> to vector<16x16xf32>
    %348 = arith.divf %344, %347 : vector<16x16xf32>
    %349 = arith.truncf %348 : vector<16x16xf32> to vector<16x16xbf16>
    %350 = vector.extract_strided_slice %296 {offsets = [0, 32], sizes = [16, 16], strides = [1, 1]} : vector<16x128xf32> to vector<16x16xf32>
    %351 = arith.truncf %350 : vector<16x16xf32> to vector<16x16xbf16>
    %cst_140 = arith.constant dense<0.000000e+00> : vector<16x16xf32>
    %352 = tpu.matmul %349, %351, %cst_140 {dimension_numbers = #tpu.dot_dimension_numbers<[1], [0], [0], [1], [0, 0, 1, 1], [], []>} : vector<16x16xbf16>, vector<16x16xbf16>, vector<16x16xf32> -> vector<16x16xf32>
    %c0_141 = arith.constant 0 : index
    %c32_142 = arith.constant 32 : index
    %353 = vector.load %arg32[%c0_141, %c32_142] : memref<16x128xf32, #tpu.memory_space<vmem>>, vector<16x16xf32>
    tpu.vector_store %arg32[%c0_141, %c32_142], %352 {strides = array<i32>} : memref<16x128xf32, #tpu.memory_space<vmem>>, vector<16x16xf32>,
    %354 = vector.extract_strided_slice %294 {offsets = [0, 48], sizes = [16, 16], strides = [1, 1]} : vector<16x128xf32> to vector<16x16xf32>
    %355 = vector.extract_strided_slice %295 {offsets = [0, 48], sizes = [16, 16], strides = [1, 1]} : vector<16x128xf32> to vector<16x16xf32>
    %356 = arith.truncf %354 : vector<16x16xf32> to vector<16x16xbf16>
    %357 = arith.truncf %355 : vector<16x16xf32> to vector<16x16xbf16>
    %cst_143 = arith.constant dense<0.000000e+00> : vector<16x16xf32>
    %358 = tpu.matmul %356, %357, %cst_143 {dimension_numbers = #tpu.dot_dimension_numbers<[1], [1], [0], [0], [0, 0, 1, 0], [], []>} : vector<16x16xbf16>, vector<16x16xbf16>, vector<16x16xf32> -> vector<16x16xf32>
    %cst_144 = arith.constant dense<0xFF800000> : vector<16xf32>
    %359 = vector.multi_reduction <maximumf>, %358, %cst_144 [1] : vector<16x16xf32> to vector<16xf32>
    %360 = vector.shape_cast %359 : vector<16xf32> to vector<16x1xf32>
    %361 = vector.broadcast %360 : vector<16x1xf32> to vector<16x16xf32>
    %362 = arith.subf %358, %361 : vector<16x16xf32>
    %363 = math.exp %362 : vector<16x16xf32>
    %cst_145 = arith.constant dense<0.000000e+00> : vector<16xf32>
    %364 = vector.multi_reduction <add>, %363, %cst_145 [1] : vector<16x16xf32> to vector<16xf32>
    %365 = vector.shape_cast %364 : vector<16xf32> to vector<16x1xf32>
    %366 = vector.broadcast %365 : vector<16x1xf32> to vector<16x16xf32>
    %367 = arith.divf %363, %366 : vector<16x16xf32>
    %368 = arith.truncf %367 : vector<16x16xf32> to vector<16x16xbf16>
    %369 = vector.extract_strided_slice %296 {offsets = [0, 48], sizes = [16, 16], strides = [1, 1]} : vector<16x128xf32> to vector<16x16xf32>
    %370 = arith.truncf %369 : vector<16x16xf32> to vector<16x16xbf16>
    %cst_146 = arith.constant dense<0.000000e+00> : vector<16x16xf32>
    %371 = tpu.matmul %368, %370, %cst_146 {dimension_numbers = #tpu.dot_dimension_numbers<[1], [0], [0], [1], [0, 0, 1, 1], [], []>} : vector<16x16xbf16>, vector<16x16xbf16>, vector<16x16xf32> -> vector<16x16xf32>
    %c0_147 = arith.constant 0 : index
    %c48_148 = arith.constant 48 : index
    %372 = vector.load %arg32[%c0_147, %c48_148] : memref<16x128xf32, #tpu.memory_space<vmem>>, vector<16x16xf32>
    tpu.vector_store %arg32[%c0_147, %c48_148], %371 {strides = array<i32>} : memref<16x128xf32, #tpu.memory_space<vmem>>, vector<16x16xf32>,
    %373 = vector.extract_strided_slice %294 {offsets = [0, 64], sizes = [16, 16], strides = [1, 1]} : vector<16x128xf32> to vector<16x16xf32>
    %374 = vector.extract_strided_slice %295 {offsets = [0, 64], sizes = [16, 16], strides = [1, 1]} : vector<16x128xf32> to vector<16x16xf32>
    %375 = arith.truncf %373 : vector<16x16xf32> to vector<16x16xbf16>
    %376 = arith.truncf %374 : vector<16x16xf32> to vector<16x16xbf16>
    %cst_149 = arith.constant dense<0.000000e+00> : vector<16x16xf32>
    %377 = tpu.matmul %375, %376, %cst_149 {dimension_numbers = #tpu.dot_dimension_numbers<[1], [1], [0], [0], [0, 0, 1, 0], [], []>} : vector<16x16xbf16>, vector<16x16xbf16>, vector<16x16xf32> -> vector<16x16xf32>
    %cst_150 = arith.constant dense<0xFF800000> : vector<16xf32>
    %378 = vector.multi_reduction <maximumf>, %377, %cst_150 [1] : vector<16x16xf32> to vector<16xf32>
    %379 = vector.shape_cast %378 : vector<16xf32> to vector<16x1xf32>
    %380 = vector.broadcast %379 : vector<16x1xf32> to vector<16x16xf32>
    %381 = arith.subf %377, %380 : vector<16x16xf32>
    %382 = math.exp %381 : vector<16x16xf32>
    %cst_151 = arith.constant dense<0.000000e+00> : vector<16xf32>
    %383 = vector.multi_reduction <add>, %382, %cst_151 [1] : vector<16x16xf32> to vector<16xf32>
    %384 = vector.shape_cast %383 : vector<16xf32> to vector<16x1xf32>
    %385 = vector.broadcast %384 : vector<16x1xf32> to vector<16x16xf32>
    %386 = arith.divf %382, %385 : vector<16x16xf32>
    %387 = arith.truncf %386 : vector<16x16xf32> to vector<16x16xbf16>
    %388 = vector.extract_strided_slice %296 {offsets = [0, 64], sizes = [16, 16], strides = [1, 1]} : vector<16x128xf32> to vector<16x16xf32>
    %389 = arith.truncf %388 : vector<16x16xf32> to vector<16x16xbf16>
    %cst_152 = arith.constant dense<0.000000e+00> : vector<16x16xf32>
    %390 = tpu.matmul %387, %389, %cst_152 {dimension_numbers = #tpu.dot_dimension_numbers<[1], [0], [0], [1], [0, 0, 1, 1], [], []>} : vector<16x16xbf16>, vector<16x16xbf16>, vector<16x16xf32> -> vector<16x16xf32>
    %c0_153 = arith.constant 0 : index
    %c64_154 = arith.constant 64 : index
    %391 = vector.load %arg32[%c0_153, %c64_154] : memref<16x128xf32, #tpu.memory_space<vmem>>, vector<16x16xf32>
    tpu.vector_store %arg32[%c0_153, %c64_154], %390 {strides = array<i32>} : memref<16x128xf32, #tpu.memory_space<vmem>>, vector<16x16xf32>,
    %392 = vector.extract_strided_slice %294 {offsets = [0, 80], sizes = [16, 16], strides = [1, 1]} : vector<16x128xf32> to vector<16x16xf32>
    %393 = vector.extract_strided_slice %295 {offsets = [0, 80], sizes = [16, 16], strides = [1, 1]} : vector<16x128xf32> to vector<16x16xf32>
    %394 = arith.truncf %392 : vector<16x16xf32> to vector<16x16xbf16>
    %395 = arith.truncf %393 : vector<16x16xf32> to vector<16x16xbf16>
    %cst_155 = arith.constant dense<0.000000e+00> : vector<16x16xf32>
    %396 = tpu.matmul %394, %395, %cst_155 {dimension_numbers = #tpu.dot_dimension_numbers<[1], [1], [0], [0], [0, 0, 1, 0], [], []>} : vector<16x16xbf16>, vector<16x16xbf16>, vector<16x16xf32> -> vector<16x16xf32>
    %cst_156 = arith.constant dense<0xFF800000> : vector<16xf32>
    %397 = vector.multi_reduction <maximumf>, %396, %cst_156 [1] : vector<16x16xf32> to vector<16xf32>
    %398 = vector.shape_cast %397 : vector<16xf32> to vector<16x1xf32>
    %399 = vector.broadcast %398 : vector<16x1xf32> to vector<16x16xf32>
    %400 = arith.subf %396, %399 : vector<16x16xf32>
    %401 = math.exp %400 : vector<16x16xf32>
    %cst_157 = arith.constant dense<0.000000e+00> : vector<16xf32>
    %402 = vector.multi_reduction <add>, %401, %cst_157 [1] : vector<16x16xf32> to vector<16xf32>
    %403 = vector.shape_cast %402 : vector<16xf32> to vector<16x1xf32>
    %404 = vector.broadcast %403 : vector<16x1xf32> to vector<16x16xf32>
    %405 = arith.divf %401, %404 : vector<16x16xf32>
    %406 = arith.truncf %405 : vector<16x16xf32> to vector<16x16xbf16>
    %407 = vector.extract_strided_slice %296 {offsets = [0, 80], sizes = [16, 16], strides = [1, 1]} : vector<16x128xf32> to vector<16x16xf32>
    %408 = arith.truncf %407 : vector<16x16xf32> to vector<16x16xbf16>
    %cst_158 = arith.constant dense<0.000000e+00> : vector<16x16xf32>
    %409 = tpu.matmul %406, %408, %cst_158 {dimension_numbers = #tpu.dot_dimension_numbers<[1], [0], [0], [1], [0, 0, 1, 1], [], []>} : vector<16x16xbf16>, vector<16x16xbf16>, vector<16x16xf32> -> vector<16x16xf32>
    %c0_159 = arith.constant 0 : index
    %c80_160 = arith.constant 80 : index
    %410 = vector.load %arg32[%c0_159, %c80_160] : memref<16x128xf32, #tpu.memory_space<vmem>>, vector<16x16xf32>
    tpu.vector_store %arg32[%c0_159, %c80_160], %409 {strides = array<i32>} : memref<16x128xf32, #tpu.memory_space<vmem>>, vector<16x16xf32>,
    %411 = vector.extract_strided_slice %294 {offsets = [0, 96], sizes = [16, 16], strides = [1, 1]} : vector<16x128xf32> to vector<16x16xf32>
    %412 = vector.extract_strided_slice %295 {offsets = [0, 96], sizes = [16, 16], strides = [1, 1]} : vector<16x128xf32> to vector<16x16xf32>
    %413 = arith.truncf %411 : vector<16x16xf32> to vector<16x16xbf16>
    %414 = arith.truncf %412 : vector<16x16xf32> to vector<16x16xbf16>
    %cst_161 = arith.constant dense<0.000000e+00> : vector<16x16xf32>
    %415 = tpu.matmul %413, %414, %cst_161 {dimension_numbers = #tpu.dot_dimension_numbers<[1], [1], [0], [0], [0, 0, 1, 0], [], []>} : vector<16x16xbf16>, vector<16x16xbf16>, vector<16x16xf32> -> vector<16x16xf32>
    %cst_162 = arith.constant dense<0xFF800000> : vector<16xf32>
    %416 = vector.multi_reduction <maximumf>, %415, %cst_162 [1] : vector<16x16xf32> to vector<16xf32>
    %417 = vector.shape_cast %416 : vector<16xf32> to vector<16x1xf32>
    %418 = vector.broadcast %417 : vector<16x1xf32> to vector<16x16xf32>
    %419 = arith.subf %415, %418 : vector<16x16xf32>
    %420 = math.exp %419 : vector<16x16xf32>
    %cst_163 = arith.constant dense<0.000000e+00> : vector<16xf32>
    %421 = vector.multi_reduction <add>, %420, %cst_163 [1] : vector<16x16xf32> to vector<16xf32>
    %422 = vector.shape_cast %421 : vector<16xf32> to vector<16x1xf32>
    %423 = vector.broadcast %422 : vector<16x1xf32> to vector<16x16xf32>
    %424 = arith.divf %420, %423 : vector<16x16xf32>
    %425 = arith.truncf %424 : vector<16x16xf32> to vector<16x16xbf16>
    %426 = vector.extract_strided_slice %296 {offsets = [0, 96], sizes = [16, 16], strides = [1, 1]} : vector<16x128xf32> to vector<16x16xf32>
    %427 = arith.truncf %426 : vector<16x16xf32> to vector<16x16xbf16>
    %cst_164 = arith.constant dense<0.000000e+00> : vector<16x16xf32>
    %428 = tpu.matmul %425, %427, %cst_164 {dimension_numbers = #tpu.dot_dimension_numbers<[1], [0], [0], [1], [0, 0, 1, 1], [], []>} : vector<16x16xbf16>, vector<16x16xbf16>, vector<16x16xf32> -> vector<16x16xf32>
    %c0_165 = arith.constant 0 : index
    %c96_166 = arith.constant 96 : index
    %429 = vector.load %arg32[%c0_165, %c96_166] : memref<16x128xf32, #tpu.memory_space<vmem>>, vector<16x16xf32>
    tpu.vector_store %arg32[%c0_165, %c96_166], %428 {strides = array<i32>} : memref<16x128xf32, #tpu.memory_space<vmem>>, vector<16x16xf32>,
    %430 = vector.extract_strided_slice %294 {offsets = [0, 112], sizes = [16, 16], strides = [1, 1]} : vector<16x128xf32> to vector<16x16xf32>
    %431 = vector.extract_strided_slice %295 {offsets = [0, 112], sizes = [16, 16], strides = [1, 1]} : vector<16x128xf32> to vector<16x16xf32>
    %432 = arith.truncf %430 : vector<16x16xf32> to vector<16x16xbf16>
    %433 = arith.truncf %431 : vector<16x16xf32> to vector<16x16xbf16>
    %cst_167 = arith.constant dense<0.000000e+00> : vector<16x16xf32>
    %434 = tpu.matmul %432, %433, %cst_167 {dimension_numbers = #tpu.dot_dimension_numbers<[1], [1], [0], [0], [0, 0, 1, 0], [], []>} : vector<16x16xbf16>, vector<16x16xbf16>, vector<16x16xf32> -> vector<16x16xf32>
    %cst_168 = arith.constant dense<0xFF800000> : vector<16xf32>
    %435 = vector.multi_reduction <maximumf>, %434, %cst_168 [1] : vector<16x16xf32> to vector<16xf32>
    %436 = vector.shape_cast %435 : vector<16xf32> to vector<16x1xf32>
    %437 = vector.broadcast %436 : vector<16x1xf32> to vector<16x16xf32>
    %438 = arith.subf %434, %437 : vector<16x16xf32>
    %439 = math.exp %438 : vector<16x16xf32>
    %cst_169 = arith.constant dense<0.000000e+00> : vector<16xf32>
    %440 = vector.multi_reduction <add>, %439, %cst_169 [1] : vector<16x16xf32> to vector<16xf32>
    %441 = vector.shape_cast %440 : vector<16xf32> to vector<16x1xf32>
    %442 = vector.broadcast %441 : vector<16x1xf32> to vector<16x16xf32>
    %443 = arith.divf %439, %442 : vector<16x16xf32>
    %444 = arith.truncf %443 : vector<16x16xf32> to vector<16x16xbf16>
    %445 = vector.extract_strided_slice %296 {offsets = [0, 112], sizes = [16, 16], strides = [1, 1]} : vector<16x128xf32> to vector<16x16xf32>
    %446 = arith.truncf %445 : vector<16x16xf32> to vector<16x16xbf16>
    %cst_170 = arith.constant dense<0.000000e+00> : vector<16x16xf32>
    %447 = tpu.matmul %444, %446, %cst_170 {dimension_numbers = #tpu.dot_dimension_numbers<[1], [0], [0], [1], [0, 0, 1, 1], [], []>} : vector<16x16xbf16>, vector<16x16xbf16>, vector<16x16xf32> -> vector<16x16xf32>
    %c0_171 = arith.constant 0 : index
    %c112_172 = arith.constant 112 : index
    %448 = vector.load %arg32[%c0_171, %c112_172] : memref<16x128xf32, #tpu.memory_space<vmem>>, vector<16x16xf32>
    tpu.vector_store %arg32[%c0_171, %c112_172], %447 {strides = array<i32>} : memref<16x128xf32, #tpu.memory_space<vmem>>, vector<16x16xf32>,
    %c0_173 = arith.constant 0 : index
    %c0_174 = arith.constant 0 : index
    %449 = vector.load %arg32[%c0_173, %c0_174] : memref<16x128xf32, #tpu.memory_space<vmem>>, vector<16x128xf32>
    %c1_175 = arith.constant 1 : index
    %c0_176 = arith.constant 0 : index
    %c0_177 = arith.constant 0 : index
    %450 = vector.load %arg9[%c1_175, %c0_176, %c0_177] : memref<2x128x128xbf16, #tpu.memory_space<vmem>>, vector<1x128x128xbf16>
    %451 = vector.shape_cast %450 : vector<1x128x128xbf16> to vector<128x128xbf16>
    %452 = arith.truncf %449 : vector<16x128xf32> to vector<16x128xbf16>
    %cst_178 = arith.constant dense<0.000000e+00> : vector<16x128xf32>
    %453 = tpu.matmul %452, %451, %cst_178 {dimension_numbers = #tpu.dot_dimension_numbers<[1], [0], [0], [1], [0, 0, 1, 1], [], []>} : vector<16x128xbf16>, vector<128x128xbf16>, vector<16x128xf32> -> vector<16x128xf32>
    %c1_179 = arith.constant 1 : index
    %c0_180 = arith.constant 0 : index
    %c0_181 = arith.constant 0 : index
    %454 = vector.load %arg10[%c1_179, %c0_180, %c0_181] : memref<2x1x128xf32, #tpu.memory_space<vmem>>, vector<1x1x128xf32>
    %455 = vector.shape_cast %454 : vector<1x1x128xf32> to vector<1x128xf32>
    %456 = vector.broadcast %455 : vector<1x128xf32> to vector<16x128xf32>
    %457 = arith.addf %453, %456 : vector<16x128xf32>
    %458 = arith.addf %283, %457 : vector<16x128xf32>
    %c1_182 = arith.constant 1 : index
    %c0_183 = arith.constant 0 : index
    %c0_184 = arith.constant 0 : index
    %459 = vector.load %arg15[%c1_182, %c0_183, %c0_184] : memref<2x1x128xf32, #tpu.memory_space<vmem>>, vector<1x1x128xf32>
    %460 = vector.shape_cast %459 : vector<1x1x128xf32> to vector<1x128xf32>
    %c1_185 = arith.constant 1 : index
    %c0_186 = arith.constant 0 : index
    %c0_187 = arith.constant 0 : index
    %461 = vector.load %arg16[%c1_185, %c0_186, %c0_187] : memref<2x1x128xf32, #tpu.memory_space<vmem>>, vector<1x1x128xf32>
    %462 = vector.shape_cast %461 : vector<1x1x128xf32> to vector<1x128xf32>
    %cst_188 = arith.constant dense<0.000000e+00> : vector<16xf32>
    %463 = vector.multi_reduction <add>, %458, %cst_188 [1] : vector<16x128xf32> to vector<16xf32>
    %464 = vector.shape_cast %463 : vector<16xf32> to vector<16x1xf32>
    %cst_189 = arith.constant 1.280000e+02 : f32
    %465 = vector.broadcast %cst_189 : f32 to vector<16x1xf32>
    %466 = arith.divf %464, %465 : vector<16x1xf32>
    %467 = vector.broadcast %466 : vector<16x1xf32> to vector<16x128xf32>
    %468 = arith.subf %458, %467 : vector<16x128xf32>
    %469 = arith.mulf %468, %468 : vector<16x128xf32>
    %cst_190 = arith.constant dense<0.000000e+00> : vector<16xf32>
    %470 = vector.multi_reduction <add>, %469, %cst_190 [1] : vector<16x128xf32> to vector<16xf32>
    %471 = vector.shape_cast %470 : vector<16xf32> to vector<16x1xf32>
    %cst_191 = arith.constant 1.280000e+02 : f32
    %472 = vector.broadcast %cst_191 : f32 to vector<16x1xf32>
    %473 = arith.divf %471, %472 : vector<16x1xf32>
    %cst_192 = arith.constant 9.99999974E-6 : f32
    %474 = vector.broadcast %cst_192 : f32 to vector<16x1xf32>
    %475 = arith.addf %473, %474 : vector<16x1xf32>
    %476 = math.rsqrt %475 : vector<16x1xf32>
    %477 = vector.broadcast %476 : vector<16x1xf32> to vector<16x128xf32>
    %478 = arith.mulf %468, %477 : vector<16x128xf32>
    %479 = vector.broadcast %460 : vector<1x128xf32> to vector<16x128xf32>
    %480 = arith.mulf %478, %479 : vector<16x128xf32>
    %481 = vector.broadcast %462 : vector<1x128xf32> to vector<16x128xf32>
    %482 = arith.addf %480, %481 : vector<16x128xf32>
    %c1_193 = arith.constant 1 : index
    %c0_194 = arith.constant 0 : index
    %c0_195 = arith.constant 0 : index
    %483 = vector.load %arg11[%c1_193, %c0_194, %c0_195] : memref<2x128x512xbf16, #tpu.memory_space<vmem>>, vector<1x128x512xbf16>
    %484 = vector.shape_cast %483 : vector<1x128x512xbf16> to vector<128x512xbf16>
    %485 = arith.truncf %482 : vector<16x128xf32> to vector<16x128xbf16>
    %cst_196 = arith.constant dense<0.000000e+00> : vector<16x512xf32>
    %486 = tpu.matmul %485, %484, %cst_196 {dimension_numbers = #tpu.dot_dimension_numbers<[1], [0], [0], [1], [0, 0, 1, 1], [], []>} : vector<16x128xbf16>, vector<128x512xbf16>, vector<16x512xf32> -> vector<16x512xf32>
    %c1_197 = arith.constant 1 : index
    %c0_198 = arith.constant 0 : index
    %c0_199 = arith.constant 0 : index
    %487 = vector.load %arg12[%c1_197, %c0_198, %c0_199] : memref<2x1x512xf32, #tpu.memory_space<vmem>>, vector<1x1x512xf32>
    %488 = vector.shape_cast %487 : vector<1x1x512xf32> to vector<1x512xf32>
    %489 = vector.broadcast %488 : vector<1x512xf32> to vector<16x512xf32>
    %490 = arith.addf %486, %489 : vector<16x512xf32>
    %cst_200 = arith.constant 0.000000e+00 : f32
    %491 = vector.broadcast %cst_200 : f32 to vector<16x512xf32>
    %492 = arith.maximumf %490, %491 : vector<16x512xf32>
    %c1_201 = arith.constant 1 : index
    %c0_202 = arith.constant 0 : index
    %c0_203 = arith.constant 0 : index
    %493 = vector.load %arg13[%c1_201, %c0_202, %c0_203] : memref<2x512x128xbf16, #tpu.memory_space<vmem>>, vector<1x512x128xbf16>
    %494 = vector.shape_cast %493 : vector<1x512x128xbf16> to vector<512x128xbf16>
    %495 = arith.truncf %492 : vector<16x512xf32> to vector<16x512xbf16>
    %cst_204 = arith.constant dense<0.000000e+00> : vector<16x128xf32>
    %496 = tpu.matmul %495, %494, %cst_204 {dimension_numbers = #tpu.dot_dimension_numbers<[1], [0], [0], [1], [0, 0, 1, 1], [], []>} : vector<16x512xbf16>, vector<512x128xbf16>, vector<16x128xf32> -> vector<16x128xf32>
    %c1_205 = arith.constant 1 : index
    %c0_206 = arith.constant 0 : index
    %c0_207 = arith.constant 0 : index
    %497 = vector.load %arg14[%c1_205, %c0_206, %c0_207] : memref<2x1x128xf32, #tpu.memory_space<vmem>>, vector<1x1x128xf32>
    %498 = vector.shape_cast %497 : vector<1x1x128xf32> to vector<1x128xf32>
    %499 = vector.broadcast %498 : vector<1x128xf32> to vector<16x128xf32>
    %500 = arith.addf %496, %499 : vector<16x128xf32>
    %501 = arith.addf %482, %500 : vector<16x128xf32>
    %c1_208 = arith.constant 1 : index
    %c0_209 = arith.constant 0 : index
    %c0_210 = arith.constant 0 : index
    %502 = vector.load %arg17[%c1_208, %c0_209, %c0_210] : memref<2x1x128xf32, #tpu.memory_space<vmem>>, vector<1x1x128xf32>
    %503 = vector.shape_cast %502 : vector<1x1x128xf32> to vector<1x128xf32>
    %c1_211 = arith.constant 1 : index
    %c0_212 = arith.constant 0 : index
    %c0_213 = arith.constant 0 : index
    %504 = vector.load %arg18[%c1_211, %c0_212, %c0_213] : memref<2x1x128xf32, #tpu.memory_space<vmem>>, vector<1x1x128xf32>
    %505 = vector.shape_cast %504 : vector<1x1x128xf32> to vector<1x128xf32>
    %cst_214 = arith.constant dense<0.000000e+00> : vector<16xf32>
    %506 = vector.multi_reduction <add>, %501, %cst_214 [1] : vector<16x128xf32> to vector<16xf32>
    %507 = vector.shape_cast %506 : vector<16xf32> to vector<16x1xf32>
    %cst_215 = arith.constant 1.280000e+02 : f32
    %508 = vector.broadcast %cst_215 : f32 to vector<16x1xf32>
    %509 = arith.divf %507, %508 : vector<16x1xf32>
    %510 = vector.broadcast %509 : vector<16x1xf32> to vector<16x128xf32>
    %511 = arith.subf %501, %510 : vector<16x128xf32>
    %512 = arith.mulf %511, %511 : vector<16x128xf32>
    %cst_216 = arith.constant dense<0.000000e+00> : vector<16xf32>
    %513 = vector.multi_reduction <add>, %512, %cst_216 [1] : vector<16x128xf32> to vector<16xf32>
    %514 = vector.shape_cast %513 : vector<16xf32> to vector<16x1xf32>
    %cst_217 = arith.constant 1.280000e+02 : f32
    %515 = vector.broadcast %cst_217 : f32 to vector<16x1xf32>
    %516 = arith.divf %514, %515 : vector<16x1xf32>
    %cst_218 = arith.constant 9.99999974E-6 : f32
    %517 = vector.broadcast %cst_218 : f32 to vector<16x1xf32>
    %518 = arith.addf %516, %517 : vector<16x1xf32>
    %519 = math.rsqrt %518 : vector<16x1xf32>
    %520 = vector.broadcast %519 : vector<16x1xf32> to vector<16x128xf32>
    %521 = arith.mulf %511, %520 : vector<16x128xf32>
    %522 = vector.broadcast %503 : vector<1x128xf32> to vector<16x128xf32>
    %523 = arith.mulf %521, %522 : vector<16x128xf32>
    %524 = vector.broadcast %505 : vector<1x128xf32> to vector<16x128xf32>
    %525 = arith.addf %523, %524 : vector<16x128xf32>
    %c0_219 = arith.constant 0 : index
    %c0_220 = arith.constant 0 : index
    %526 = vector.load %arg19[%c0_219, %c0_220] : memref<128x128xbf16, #tpu.memory_space<vmem>>, vector<128x128xbf16>
    %527 = arith.truncf %525 : vector<16x128xf32> to vector<16x128xbf16>
    %cst_221 = arith.constant dense<0.000000e+00> : vector<16x128xf32>
    %528 = tpu.matmul %527, %526, %cst_221 {dimension_numbers = #tpu.dot_dimension_numbers<[1], [0], [0], [1], [0, 0, 1, 1], [], []>} : vector<16x128xbf16>, vector<128x128xbf16>, vector<16x128xf32> -> vector<16x128xf32>
    %c0_222 = arith.constant 0 : index
    %c0_223 = arith.constant 0 : index
    %529 = vector.load %arg20[%c0_222, %c0_223] : memref<1x128xf32, #tpu.memory_space<vmem>>, vector<1x128xf32>
    %530 = vector.broadcast %529 : vector<1x128xf32> to vector<16x128xf32>
    %531 = arith.addf %528, %530 : vector<16x128xf32>
    %532 = math.tanh %531 : vector<16x128xf32>
    %c0_224 = arith.constant 0 : index
    %c0_225 = arith.constant 0 : index
    %533 = vector.load %arg21[%c0_224, %c0_225] : memref<128x128xbf16, #tpu.memory_space<vmem>>, vector<128x128xbf16>
    %534 = arith.truncf %525 : vector<16x128xf32> to vector<16x128xbf16>
    %cst_226 = arith.constant dense<0.000000e+00> : vector<16x128xf32>
    %535 = tpu.matmul %534, %533, %cst_226 {dimension_numbers = #tpu.dot_dimension_numbers<[1], [0], [0], [1], [0, 0, 1, 1], [], []>} : vector<16x128xbf16>, vector<128x128xbf16>, vector<16x128xf32> -> vector<16x128xf32>
    %c0_227 = arith.constant 0 : index
    %c0_228 = arith.constant 0 : index
    %536 = vector.load %arg22[%c0_227, %c0_228] : memref<1x128xf32, #tpu.memory_space<vmem>>, vector<1x128xf32>
    %537 = vector.broadcast %536 : vector<1x128xf32> to vector<16x128xf32>
    %538 = arith.addf %535, %537 : vector<16x128xf32>
    %539 = arith.negf %538 : vector<16x128xf32>
    %540 = math.exp %539 : vector<16x128xf32>
    %cst_229 = arith.constant 1.000000e+00 : f32
    %541 = vector.broadcast %cst_229 : f32 to vector<16x128xf32>
    %542 = arith.addf %541, %540 : vector<16x128xf32>
    %543 = arith.divf %541, %542 : vector<16x128xf32>
    %544 = arith.mulf %532, %543 : vector<16x128xf32>
    %c0_230 = arith.constant 0 : index
    %c0_231 = arith.constant 0 : index
    %545 = vector.load %arg23[%c0_230, %c0_231] : memref<1x128xf32, #tpu.memory_space<vmem>>, vector<1x128xf32>
    %cst_232 = arith.constant dense<0.000000e+00> : vector<1x16xf32>
    %546 = tpu.matmul %545, %544, %cst_232 {dimension_numbers = #tpu.dot_dimension_numbers<[1], [1], [0], [0], [0, 0, 1, 0], [], []>} : vector<1x128xf32>, vector<16x128xf32>, vector<1x16xf32> -> vector<1x16xf32>
    %c0_233 = arith.constant 0 : index
    %c0_234 = arith.constant 0 : index
    %547 = vector.load %arg24[%c0_233, %c0_234] : memref<1x1xf32, #tpu.memory_space<vmem>>, vector<1x1xf32>
    %548 = vector.broadcast %547 : vector<1x1xf32> to vector<1x16xf32>
    %549 = arith.addf %546, %548 : vector<1x16xf32>
    %c0_235 = arith.constant 0 : index
    %c0_236 = arith.constant 0 : index
    %550 = vector.load %arg31[%c0_235, %c0_236] : memref<1x16xf32, #tpu.memory_space<vmem>>, vector<1x16xf32>
    tpu.vector_store %arg31[%c0_235, %c0_236], %549 {strides = array<i32>} : memref<1x16xf32, #tpu.memory_space<vmem>>, vector<1x16xf32>,
    %cst_237 = arith.constant dense<0xFF800000> : vector<1xf32>
    %551 = vector.multi_reduction <maximumf>, %549, %cst_237 [1] : vector<1x16xf32> to vector<1xf32>
    %552 = vector.shape_cast %551 : vector<1xf32> to vector<1x1xf32>
    %553 = vector.broadcast %552 : vector<1x1xf32> to vector<1x16xf32>
    %554 = arith.subf %549, %553 : vector<1x16xf32>
    %555 = math.exp %554 : vector<1x16xf32>
    %cst_238 = arith.constant dense<0.000000e+00> : vector<1xf32>
    %556 = vector.multi_reduction <add>, %555, %cst_238 [1] : vector<1x16xf32> to vector<1xf32>
    %557 = vector.shape_cast %556 : vector<1xf32> to vector<1x1xf32>
    %558 = vector.broadcast %557 : vector<1x1xf32> to vector<1x16xf32>
    %559 = arith.divf %555, %558 : vector<1x16xf32>
    %cst_239 = arith.constant dense<0.000000e+00> : vector<1x128xf32>
    %560 = tpu.matmul %559, %525, %cst_239 {dimension_numbers = #tpu.dot_dimension_numbers<[1], [0], [0], [1], [0, 0, 1, 1], [], []>} : vector<1x16xf32>, vector<16x128xf32>, vector<1x128xf32> -> vector<1x128xf32>
    %c0_240 = arith.constant 0 : index
    %c0_241 = arith.constant 0 : index
    %561 = vector.load %arg25[%c0_240, %c0_241] : memref<128x128xbf16, #tpu.memory_space<vmem>>, vector<128x128xbf16>
    %562 = arith.truncf %560 : vector<1x128xf32> to vector<1x128xbf16>
    %cst_242 = arith.constant dense<0.000000e+00> : vector<1x128xf32>
    %563 = tpu.matmul %562, %561, %cst_242 {dimension_numbers = #tpu.dot_dimension_numbers<[1], [0], [0], [1], [0, 0, 1, 1], [], []>} : vector<1x128xbf16>, vector<128x128xbf16>, vector<1x128xf32> -> vector<1x128xf32>
    %c0_243 = arith.constant 0 : index
    %c0_244 = arith.constant 0 : index
    %564 = vector.load %arg26[%c0_243, %c0_244] : memref<1x128xf32, #tpu.memory_space<vmem>>, vector<1x128xf32>
    %565 = arith.addf %563, %564 : vector<1x128xf32>
    %cst_245 = arith.constant 0.000000e+00 : f32
    %566 = vector.broadcast %cst_245 : f32 to vector<1x128xf32>
    %567 = arith.maximumf %565, %566 : vector<1x128xf32>
    %c0_246 = arith.constant 0 : index
    %c0_247 = arith.constant 0 : index
    %568 = vector.load %arg27[%c0_246, %c0_247] : memref<128x3xf32, #tpu.memory_space<vmem>>, vector<128x3xf32>
    %cst_248 = arith.constant dense<0.000000e+00> : vector<1x3xf32>
    %569 = tpu.matmul %567, %568, %cst_248 {dimension_numbers = #tpu.dot_dimension_numbers<[1], [0], [0], [1], [0, 0, 1, 1], [], []>} : vector<1x128xf32>, vector<128x3xf32>, vector<1x3xf32> -> vector<1x3xf32>
    %c0_249 = arith.constant 0 : index
    %c0_250 = arith.constant 0 : index
    %570 = vector.load %arg28[%c0_249, %c0_250] : memref<1x3xf32, #tpu.memory_space<vmem>>, vector<1x3xf32>
    %571 = arith.addf %569, %570 : vector<1x3xf32>
    %cst_251 = arith.constant dense<0xFF800000> : vector<1xf32>
    %572 = vector.multi_reduction <maximumf>, %571, %cst_251 [1] : vector<1x3xf32> to vector<1xf32>
    %573 = vector.shape_cast %572 : vector<1xf32> to vector<1x1xf32>
    %574 = vector.broadcast %573 : vector<1x1xf32> to vector<1x3xf32>
    %575 = arith.subf %571, %574 : vector<1x3xf32>
    %576 = math.exp %575 : vector<1x3xf32>
    %cst_252 = arith.constant dense<0.000000e+00> : vector<1xf32>
    %577 = vector.multi_reduction <add>, %576, %cst_252 [1] : vector<1x3xf32> to vector<1xf32>
    %578 = vector.shape_cast %577 : vector<1xf32> to vector<1x1xf32>
    %579 = vector.broadcast %578 : vector<1x1xf32> to vector<1x3xf32>
    %580 = arith.divf %576, %579 : vector<1x3xf32>
    %c0_253 = arith.constant 0 : index
    %c0_254 = arith.constant 0 : index
    %581 = vector.load %arg29[%c0_253, %c0_254] : memref<1x3xf32, #tpu.memory_space<vmem>>, vector<1x3xf32>
    tpu.vector_store %arg29[%c0_253, %c0_254], %580 {strides = array<i32>} : memref<1x3xf32, #tpu.memory_space<vmem>>, vector<1x3xf32>,
    return
  }
}

</mosaic_0001>

<bundles_post_ra>
// kernel: forward.1
= control target key start
LH: loop header
LB: loop body
LE: loop exit
PB: predicated region body
PF: predicated region fallthrough
CT: control target
= control target key end

     0   :  { %s8591_s6 = smov 1   ;;  %s8592_s10 = smov 2   ;;  %s9706_s0 = inlined_call_operand.smem [shape: u32[32], index: -1, kind: input, shape index: {}] }
   0x1   :  { %s8661_s5 = sld [smem:[%s9706_s0]]   ;;  %s8593_s14 = smov 3  }
   0x2   :  { %s8666_s9 = sld [smem:[%s9706_s0 + %s8591_s6]]   ;;  %s8594_s18 = smov 4  }
   0x3   :  { %s8671_s13 = sld [smem:[%s9706_s0 + %s8592_s10]]   ;;  %s8595_s22 = smov 5  }
   0x4   :  { %s8676_s17 = sld [smem:[%s9706_s0 + %s8593_s14]]   ;;  %s8596_s26 = smov 6  }
   0x5   :  { %s8681_s21 = sld [smem:[%s9706_s0 + %s8594_s18]]   ;;  %s8597_s30 = smov 7  }
   0x6   :  { %s8686_s25 = sld [smem:[%s9706_s0 + %s8595_s22]]   ;;  %s8598_s4 = smov 8  }
   0x7   :  { %s8691_s29 = sld [smem:[%s9706_s0 + %s8596_s26]]   ;;  %s8599_s10 = smov 9  }
   0x8   :  { %s8696_s3 = sld [smem:[%s9706_s0 + %s8597_s30]]   ;;  %s8600_s15 = smov 10  }
   0x9   :  { %s8701_s8 = sld [smem:[%s9706_s0 + %s8598_s4]]   ;;  %s8601_s20 = smov 11  }
   0xa   :  { %s8706_s14 = sld [smem:[%s9706_s0 + %s8599_s10]]   ;;  %s8602_s26 = smov 12  }
   0xb   :  { %s8711_s19 = sld [smem:[%s9706_s0 + %s8600_s15]]   ;;  %s8603_s1 = smov 13  }
   0xc   :  { %s8716_s24 = sld [smem:[%s9706_s0 + %s8601_s20]]   ;;  %s8604_s7 = smov 14  }
   0xd   :  { %9715 = sst [smem:[#allocation33_spill]] %s8691_s29  ;;  %s8605_s15 = smov 15  }
   0xe   :  { %s8721_s30 = sld [smem:[%s9706_s0 + %s8602_s26]]   ;;  %s8606_s22 = smov 16  }
   0xf   :  { %9716 = sst [smem:[#allocation34_spill]] %s8701_s8  ;;  %s8607_s28 = smov 17  }
  0x10   :  { %s8726_s6 = sld [smem:[%s9706_s0 + %s8603_s1]]   ;;  %s8615_s1 = smov 25  }
  0x11   :  { %9717 = sst [smem:[#allocation35_spill]] %s8711_s19  ;;  %s8616_s10 = smov 26  }
  0x12   :  { %s8731_s12 = sld [smem:[%s9706_s0 + %s8604_s7]]   ;;  %s8608_s7 = smov 18  }
  0x13   :  { %s8736_s20 = sld [smem:[%s9706_s0 + %s8605_s15]]   ;;  %s8609_s15 = smov 19  }
  0x14   :  { %9718 = sst [smem:[#allocation36_spill]] %s8721_s30  ;;  %s8617_s16 = smov 27  }
  0x15   :  { %s8741_s27 = sld [smem:[%s9706_s0 + %s8606_s22]]   ;;  %s8610_s22 = smov 20  }
  0x16   :  { %s8746_s4 = sld [smem:[%s9706_s0 + %s8607_s28]]   ;;  %s8611_s28 = smov 21  }
  0x17   :  { %s8756_s30 = sld [smem:[%s9706_s0 + %s8609_s15]]   ;;  %s8613_s15 = smov 23  }
  0x18   :  { %9719 = sst [smem:[#allocation37_spill]] %s8731_s12  ;;  %s8618_s23 = smov 28  }
  0x19   :  { %9720 = sst [smem:[#allocation38_spill]] %s8736_s20 }
  0x1a   :  { %s8751_s12 = sld [smem:[%s9706_s0 + %s8608_s7]]   ;;  %s8612_s7 = smov 22  }
  0x1b   :  { %9721 = sst [smem:[#allocation39_spill]] %s8741_s27 }
  0x1c   :  { %9722 = sst [smem:[#allocation40_spill]] %s8746_s4 }
  0x1d   :  { %s8761_s27 = sld [smem:[%s9706_s0 + %s8610_s22]]   ;;  %s8614_s22 = smov 24  }
  0x1e   :  { %s8766_s4 = sld [smem:[%s9706_s0 + %s8611_s28]]  }
  0x1f   :  { %s8776_s20 = sld [smem:[%s9706_s0 + %s8613_s15]]  }
  0x20   :  { %9723 = sst [smem:[#allocation41_spill]] %s8751_s12 }
  0x21   :  { %s8771_s12 = sld [smem:[%s9706_s0 + %s8612_s7]]  }
  0x22   :  { %s8784_s19 = sld [smem:[%s9706_s0 + %s8615_s1]]   ;;  %s8619_s1 = smov 29  }
  0x23   :  { %9724 = sst [smem:[#allocation42_spill]] %s8761_s27 }
  0x24   :  { %s6495_s27 = sld [smem:[%s9706_s0 + %s8614_s22]]  }
  0x25   :  { %9726 = sst [smem:[#allocation44_spill]] %s8776_s20 }
  0x26   :  { %s8794_s20 = sld [smem:[%s9706_s0 + %s8617_s16]]   ;;  %s8621_s16 = smov 31  }
  0x27   :  { %9725 = sst [smem:[#allocation43_spill]] %s8771_s12 }
  0x28   :  { %s8789_s12 = sld [smem:[%s9706_s0 + %s8616_s10]]   ;;  %s8620_s10 = smov 30  }
  0x29   :  { %s8799_s8 = sld [smem:[%s9706_s0 + %s8618_s23]]  }
  0x2a   :  { %s8804_s29 = sld [smem:[%s9706_s0 + %s8619_s1]]   ;;  %v69_v0 = vstv %s6495_s27 }
  0x2b   :  { %s8814_s22 = sld [smem:[%s9706_s0 + %s8621_s16]]   ;;  %70 = vst [vmem:[#allocation3] sm:$0x1] %v69_v0 }
  0x2e   :  { %9727 = sst [smem:[#allocation45_spill]] %s8789_s12 }
  0x2f   :  { %s8809_s12 = sld [smem:[%s9706_s0 + %s8620_s10]]  }
  0x30   :  { %71 = vsyncpa [#allocation5], 0 }
  0x31   :  { %72 = vsyncpa [#allocation8], 0 }
  0x32   :  { %73 = vsyncpa [#allocation11], 0 }
  0x33   :  { %74 = vsyncpa [#allocation14], 0 }
  0x34   :  { %75 = vsyncpa [#allocation17], 0 }
  0x35   :  { %76 = vsyncpa [#allocation20], 0 }
  0x36   :  { %77 = vsyncpa [#allocation6], 0 }
  0x37   :  { %78 = vsyncpa [#allocation23], 0  ;;  %s8622_s23 = smov [#allocation7]   ;;  %s8289_s26 = scalar_lea.hbm %s8666_s9, 8192 }
  0x38   :  { %s96_s27 = sshll.u32 %s8622_s23, 4  ;;  %p8290_p0 = scmp.ne.s32.totalorder %s8666_s9, %s8289_s26  ;;  %s97_s27 = int_to_ptr.vmem [resolvable:$true] %s96_s27 }
  0x39   :  { %p8293_p1 = scmp.lt.u32.totalorder %s8289_s26, %s8666_s9 }
  0x3b   :  { %p8295_p2 = pnand %p8293_p1, %p8290_p0 }
  0x3d   :  { %8298 = shalt.err (!%p8295_p2)
}
  0x3e   :  { %s8299_s0 = scalar_lea.vmem %s97_s27, 8192  ;;  %p8304_p4 = scmp.lt.s32.totalorder %s97_s27, %s97_s27 }
  0x3f   :  { %p8300_p3 = scmp.ne.s32.totalorder %s97_s27, %s8299_s0  ;;  %p8305_p5 = scmp.lt.s32.totalorder %s8299_s0, %s8299_s0 }
  0x41   :  { %p8306_p6 = por %p8305_p5, %p8304_p4 }
  0x43   :  { %p8307_p7 = pnand %p8306_p6, %p8300_p3 }
  0x45   :  { %8310 = shalt.err (!%p8307_p7)
}
  0x46   :  { %s8623_s1 = smov 64   ;;  %s8624_s28 = smov 4  }
  0x47   :  { %102 = dma.hbm_to_vmem [thread:$0]  %s8666_s9, 8192, %s97_s27, [#allocation8], %s8623_s1, %s8623_s1, %s8624_s28  }
  0x48   :  { %s8625_s2 = smov [#allocation10]   ;;  %s8311_s7 = scalar_lea.hbm %s8696_s3, 6144 }
  0x49   :  { %s128_s10 = sshll.u32 %s8625_s2, 4  ;;  %p8312_p8 = scmp.ne.s32.totalorder %s8696_s3, %s8311_s7  ;;  %s129_s10 = int_to_ptr.vmem [resolvable:$true] %s128_s10 }
  0x4a   :  { %p8315_p9 = scmp.lt.u32.totalorder %s8311_s7, %s8696_s3 }
  0x4c   :  { %p8317_p10 = pnand %p8315_p9, %p8312_p8 }
  0x4e   :  { %8320 = shalt.err (!%p8317_p10)
}
  0x4f   :  { %s8321_s11 = scalar_lea.vmem %s129_s10, 6144  ;;  %p8326_p12 = scmp.lt.s32.totalorder %s129_s10, %s129_s10 }
  0x50   :  { %p8322_p11 = scmp.ne.s32.totalorder %s129_s10, %s8321_s11  ;;  %p8327_p13 = scmp.lt.s32.totalorder %s8321_s11, %s8321_s11 }
  0x52   :  { %p8328_p0 = por %p8327_p13, %p8326_p12 }
  0x54   :  { %p8329_p1 = pnand %p8328_p0, %p8322_p11 }
  0x56   :  { %8332 = shalt.err (!%p8329_p1)
}
  0x57   :  { %s8626_s16 = smov 192   ;;  %s8627_s9 = smov 12  }
  0x58   :  { %134 = dma.hbm_to_vmem [thread:$0]  %s8696_s3, 6144, %s129_s10, [#allocation11], %s8626_s16, %s8626_s16, %s8627_s9  }
  0x59   :  { %s8628_s15 = smov [#allocation13]   ;;  %s8333_s23 = scalar_lea.hbm %s8716_s24, 8192 }
  0x5a   :  { %s156_s18 = sshll.u32 %s8628_s15, 4  ;;  %p8334_p2 = scmp.ne.s32.totalorder %s8716_s24, %s8333_s23  ;;  %s157_s18 = int_to_ptr.vmem [resolvable:$true] %s156_s18 }
  0x5b   :  { %p8337_p3 = scmp.lt.u32.totalorder %s8333_s23, %s8716_s24 }
  0x5d   :  { %p8339_p4 = pnand %p8337_p3, %p8334_p2 }
  0x5f   :  { %8342 = shalt.err (!%p8339_p4)
}
  0x60   :  { %s8343_s27 = scalar_lea.vmem %s157_s18, 8192  ;;  %p8348_p6 = scmp.lt.s32.totalorder %s157_s18, %s157_s18 }
  0x61   :  { %p8344_p5 = scmp.ne.s32.totalorder %s157_s18, %s8343_s27  ;;  %p8349_p7 = scmp.lt.s32.totalorder %s8343_s27, %s8343_s27 }
  0x63   :  { %p8350_p8 = por %p8349_p7, %p8348_p6 }
  0x65   :  { %p8351_p9 = pnand %p8350_p8, %p8344_p5 }
  0x67   :  { %8354 = shalt.err (!%p8351_p9)
}
  0x68   :  { %s8629_s26 = smov 256   ;;  %s8630_s3 = smov 16  }
  0x69   :  { %162 = dma.hbm_to_vmem [thread:$0]  %s8716_s24, 8192, %s157_s18, [#allocation14], %s8629_s26, %s8629_s26, %s8630_s3  }
  0x6a   :  { %s8631_s0 = smov [#allocation16]   ;;  %s8632_s10 = smov [#allocation4]  }
  0x6b   :  { %s192_s2 = sshll.u32 %s8631_s0, 4  ;;  %s84_s7 = sshll.u32 %s8632_s10, 4  ;;  %s193_s2 = int_to_ptr.vmem [resolvable:$true] %s192_s2  ;;  %s85_s7 = int_to_ptr.vmem [resolvable:$true] %s84_s7 }
  0x6c   :  { %s8355_s11 = scalar_lea.hbm %s8756_s30, 1024 }
  0x6d   :  { %p8356_p10 = scmp.ne.s32.totalorder %s8756_s30, %s8355_s11  ;;  %p8359_p11 = scmp.lt.u32.totalorder %s8355_s11, %s8756_s30 }
  0x6f   :  { %p8361_p12 = pnand %p8359_p11, %p8356_p10 }
  0x71   :  { %8364 = shalt.err (!%p8361_p12)
}
  0x72   :  { %s8365_s16 = scalar_lea.vmem %s193_s2, 1024  ;;  %p8370_p0 = scmp.lt.s32.totalorder %s193_s2, %s193_s2 }
  0x73   :  { %p8366_p13 = scmp.ne.s32.totalorder %s193_s2, %s8365_s16  ;;  %p8371_p1 = scmp.lt.s32.totalorder %s8365_s16, %s8365_s16 }
  0x75   :  { %p8372_p2 = por %p8371_p1, %p8370_p0 }
  0x77   :  { %p8373_p3 = pnand %p8372_p2, %p8366_p13 }
  0x79   :  { %8376 = shalt.err (!%p8373_p3)
}
  0x7a   :  { %198 = dma.hbm_to_vmem [thread:$0]  %s8756_s30, 1024, %s193_s2, [#allocation17], %s8623_s1, %s8623_s1, %s8624_s28  }
  0x7b   :  { %s8377_s24 = scalar_lea.hbm %s8661_s5, 2048 }
  0x7c   :  { %p8378_p4 = scmp.ne.s32.totalorder %s8661_s5, %s8377_s24  ;;  %p8381_p5 = scmp.lt.u32.totalorder %s8377_s24, %s8661_s5 }
  0x7e   :  { %p8383_p6 = pnand %p8381_p5, %p8378_p4 }
  0x80   :  { %8386 = shalt.err (!%p8383_p6)
}
  0x81   :  { %s8387_s9 = scalar_lea.vmem %s85_s7, 2048  ;;  %p8392_p8 = scmp.lt.s32.totalorder %s85_s7, %s85_s7 }
  0x82   :  { %p8388_p7 = scmp.ne.s32.totalorder %s85_s7, %s8387_s9  ;;  %p8393_p9 = scmp.lt.s32.totalorder %s8387_s9, %s8387_s9 }
  0x84   :  { %p8394_p10 = por %p8393_p9, %p8392_p8 }
  0x86   :  { %p8395_p11 = pnand %p8394_p10, %p8388_p7 }
  0x88   :  { %8398 = shalt.err (!%p8395_p11)
}
  0x89   :  { %s8633_s15 = smov 1024   ;;  %s8634_s30 = smov [#allocation9]  }
  0x8a   :  { %90 = dma.hbm_to_vmem [thread:$0]  %s8661_s5, 2048, %s85_s7, [#allocation5], %s8633_s15, %s8633_s15, %s8623_s1  }
  0x8b   :  { %s114_s18 = sshll.u32 %s8634_s30, 4  ;;  %s8635_s23 = smov [#allocation12]   ;;  %s115_s18 = int_to_ptr.vmem [resolvable:$true] %s114_s18 }
  0x8c   :  { %s142_s27 = sshll.u32 %s8635_s23, 4  ;;  %s8399_s26 = scalar_lea.hbm %s8686_s25, 1024  ;;  %s8844_s27 = int_to_ptr.vmem [resolvable:$true] %s142_s27 }
  0x8d   :  { %p8400_p12 = scmp.ne.s32.totalorder %s8686_s25, %s8399_s26  ;;  %p8403_p13 = scmp.lt.u32.totalorder %s8399_s26, %s8686_s25 }
  0x8f   :  { %p8405_p0 = pnand %p8403_p13, %p8400_p12 }
  0x91   :  { %8408 = shalt.err (!%p8405_p0)
}
  0x92   :  { %s8409_s0 = scalar_lea.vmem %s115_s18, 1024  ;;  %p8414_p2 = scmp.lt.s32.totalorder %s115_s18, %s115_s18 }
  0x93   :  { %p8410_p1 = scmp.ne.s32.totalorder %s115_s18, %s8409_s0  ;;  %p8415_p3 = scmp.lt.s32.totalorder %s8409_s0, %s8409_s0 }
  0x95   :  { %p8416_p4 = por %p8415_p3, %p8414_p2 }
  0x97   :  { %p8417_p5 = pnand %p8416_p4, %p8410_p1 }
  0x99   :  { %8420 = shalt.err (!%p8417_p5)
}
  0x9a   :  { %120 = dma.hbm_to_vmem [thread:$0]  %s8686_s25, 1024, %s115_s18, [#allocation8], %s8623_s1, %s8623_s1, %s8624_s28  }
  0x9b   :  { %s8421_s5 = scalar_lea.hbm %s8706_s14, 2048 }
  0x9c   :  { %p8422_p6 = scmp.ne.s32.totalorder %s8706_s14, %s8421_s5  ;;  %p8425_p7 = scmp.lt.u32.totalorder %s8421_s5, %s8706_s14 }
  0x9e   :  { %p8427_p8 = pnand %p8425_p7, %p8422_p6 }
  0xa0   :  { %8430 = shalt.err (!%p8427_p8)
}
  0xa1   :  { %s8431_s2 = scalar_lea.vmem %s8844_s27, 2048  ;;  %p8436_p10 = scmp.lt.s32.totalorder %s8844_s27, %s8844_s27 }
  0xa2   :  { %p8432_p9 = scmp.ne.s32.totalorder %s8844_s27, %s8431_s2  ;;  %p8437_p11 = scmp.lt.s32.totalorder %s8431_s2, %s8431_s2 }
  0xa4   :  { %p8438_p12 = por %p8437_p11, %p8436_p10 }
  0xa6   :  { %p8439_p13 = pnand %p8438_p12, %p8432_p9 }
  0xa8   :  { %8442 = shalt.err (!%p8439_p13)
}
  0xa9   :  { %148 = dma.hbm_to_vmem [thread:$0]  %s8706_s14, 2048, %s8844_s27, [#allocation11], %s8623_s1, %s8623_s1, %s8624_s28  }
  0xaa   :  { %s8636_s25 = smov [#allocation15]   ;;  %s8637_s7 = smov [#allocation18]  }
  0xab   :  { %s170_s10 = sshll.u32 %s8636_s25, 4  ;;  %s206_s11 = sshll.u32 %s8637_s7, 4  ;;  %s171_s10 = int_to_ptr.vmem [resolvable:$true] %s170_s10  ;;  %s8865_s11 = int_to_ptr.vmem [resolvable:$true] %s206_s11 }
  0xac   :  { %s8443_s16 = scalar_lea.hbm %s8726_s6, 8192 }
  0xad   :  { %p8444_p0 = scmp.ne.s32.totalorder %s8726_s6, %s8443_s16  ;;  %p8447_p1 = scmp.lt.u32.totalorder %s8443_s16, %s8726_s6 }
  0xaf   :  { %p8449_p2 = pnand %p8447_p1, %p8444_p0 }
  0xb1   :  { %8452 = shalt.err (!%p8449_p2)
}
  0xb2   :  { %s8453_s24 = scalar_lea.vmem %s171_s10, 8192  ;;  %p8458_p4 = scmp.lt.s32.totalorder %s171_s10, %s171_s10 }
  0xb3   :  { %p8454_p3 = scmp.ne.s32.totalorder %s171_s10, %s8453_s24  ;;  %p8459_p5 = scmp.lt.s32.totalorder %s8453_s24, %s8453_s24 }
  0xb5   :  { %p8460_p6 = por %p8459_p5, %p8458_p4 }
  0xb7   :  { %p8461_p7 = pnand %p8460_p6, %p8454_p3 }
  0xb9   :  { %8464 = shalt.err (!%p8461_p7)
}
  0xba   :  { %176 = dma.hbm_to_vmem [thread:$0]  %s8726_s6, 8192, %s171_s10, [#allocation14], %s8623_s1, %s8623_s1, %s8624_s28  }
  0xbb   :  { %s8465_s14 = scalar_lea.hbm %s8766_s4, 1024 }
  0xbc   :  { %p8466_p8 = scmp.ne.s32.totalorder %s8766_s4, %s8465_s14  ;;  %p8469_p9 = scmp.lt.u32.totalorder %s8465_s14, %s8766_s4 }
  0xbe   :  { %p8471_p10 = pnand %p8469_p9, %p8466_p8 }
  0xc0   :  { %8474 = shalt.err (!%p8471_p10)
}
  0xc1   :  { %s8475_s9 = scalar_lea.vmem %s8865_s11, 1024  ;;  %p8480_p12 = scmp.lt.s32.totalorder %s8865_s11, %s8865_s11 }
  0xc2   :  { %p8476_p11 = scmp.ne.s32.totalorder %s8865_s11, %s8475_s9  ;;  %p8481_p13 = scmp.lt.s32.totalorder %s8475_s9, %s8475_s9 }
  0xc4   :  { %p8482_p0 = por %p8481_p13, %p8480_p12 }
  0xc6   :  { %p8483_p1 = pnand %p8482_p0, %p8476_p11 }
  0xc8   :  { %8486 = shalt.err (!%p8483_p1)
}
  0xc9   :  { %212 = dma.hbm_to_vmem [thread:$0]  %s8766_s4, 1024, %s8865_s11, [#allocation17], %s8623_s1, %s8623_s1, %s8624_s28  }
  0xca   :  { %s8638_s6 = smov [#allocation19]   ;;  %s8487_s30 = scalar_lea.hbm %s8784_s19, 1024 }
  0xcb   :  { %s224_s15 = sshll.u32 %s8638_s6, 4  ;;  %p8488_p2 = scmp.ne.s32.totalorder %s8784_s19, %s8487_s30  ;;  %s225_s15 = int_to_ptr.vmem [resolvable:$true] %s224_s15 }
  0xcc   :  { %p8491_p3 = scmp.lt.u32.totalorder %s8487_s30, %s8784_s19 }
  0xce   :  { %p8493_p4 = pnand %p8491_p3, %p8488_p2 }
  0xd0   :  { %8496 = shalt.err (!%p8493_p4)
}
  0xd1   :  { %s8497_s18 = scalar_lea.vmem %s225_s15, 1024  ;;  %p8502_p6 = scmp.lt.s32.totalorder %s225_s15, %s225_s15 }
  0xd2   :  { %p8498_p5 = scmp.ne.s32.totalorder %s225_s15, %s8497_s18  ;;  %p8503_p7 = scmp.lt.s32.totalorder %s8497_s18, %s8497_s18 }
  0xd4   :  { %p8504_p8 = por %p8503_p7, %p8502_p6 }
  0xd6   :  { %p8505_p9 = pnand %p8504_p8, %p8498_p5 }
  0xd8   :  { %8508 = shalt.err (!%p8505_p9)
}
  0xd9   :  { %230 = dma.hbm_to_vmem [thread:$0]  %s8784_s19, 1024, %s225_s15, [#allocation20], %s8623_s1, %s8623_s1, %s8624_s28  }
  0xda   :  { %8575 = dma.done.wait [#allocation5], 2048  }
  0xdb   :  { %8576 = vsyncadd [#allocation5], 4294965248 }
  0xdc   :  { %8577 = dma.done.wait [#allocation8], 9216  }
  0xdd   :  { %8578 = vsyncadd [#allocation8], 4294958080 }
  0xde   :  { %8579 = dma.done.wait [#allocation11], 8192  }
  0xdf   :  { %8580 = vsyncadd [#allocation11], 4294959104 }
  0xe0   :  { %8581 = dma.done.wait [#allocation14], 16384  }
  0xe1   :  { %8582 = vsyncadd [#allocation14], 4294950912 }
  0xe2   :  { %8583 = dma.done.wait [#allocation17], 2048  }
  0xe3   :  { %8584 = vsyncadd [#allocation17], 4294965248 }
  0xe4   :  { %8585 = dma.done.wait [#allocation20], 1024  }
  0xe5   :  { %8586 = vsyncadd [#allocation20], 4294966272  ;;  %v7749_v1 = vld [vmem:[#allocation7 + $0x40] sm:$0xff]   ;;  %v7753_v5 = vld [vmem:[#allocation7 + $0x48] sm:$0xff]   ;;  %vm8641_vm0 = vmmov 0   ;;  %vm1284_vm1 = vcmask 130048  }
  0xe6   :  { %v7750_v2 = vld [vmem:[#allocation7 + $0xc0] sm:$0xff]   ;;  %6875 = vmatprep.subr.bf16.mxu0 %v7749_v1  ;;  %v7754_v6 = vld [vmem:[#allocation7 + $0xc8] sm:$0xff]   ;;  %v7757_v9 = vld [vmem:[#allocation7 + $0x50] sm:$0xff]   ;;  %s8643_s19 = smov 96   ;;  %s8644_s4 = smov 80   ;;  %vm1983_vm2 = vcmask 261248  }
  0xe7   :  { %v7751_v3 = vld [vmem:[#allocation7] sm:$0xff]   ;;  %6897 = vmatprep.subr.bf16.mxu1 %v7750_v2  ;;  %v7755_v7 = vld [vmem:[#allocation7 + $0x8] sm:$0xff]   ;;  %v7758_v10 = vld [vmem:[#allocation7 + $0xd0] sm:$0xff]   ;;  %s8645_s28 = smov 48   ;;  %s8646_s23 = smov 32   ;;  %vm2115_vm3 = vcmask 392448  }
  0xe8   :  { %v7752_v4 = vld [vmem:[#allocation7 + $0x80] sm:$0xff]   ;;  %6876 = vmatpush3.bf16.msra.mxu0 %v7751_v3  ;;  %v7756_v8 = vld [vmem:[#allocation7 + $0x88] sm:$0xff]   ;;  %v7759_v11 = vld [vmem:[#allocation7 + $0x10] sm:$0xff]   ;;  %vm2247_vm4 = vcmask 523648   ;;  %vm2379_vm5 = vcmask 654848   ;;  %vm2511_vm6 = vcmask 786048  }
  0xe9   :  { %6898 = vmatpush3.bf16.msra.mxu1 %v7752_v4  ;;  %6877 = vmatprep.subr.bf16.mxu0 %v7753_v5  ;;  %v7760_v12 = vld [vmem:[#allocation7 + $0x90] sm:$0xff]   ;;  %v7761_v13 = vld [vmem:[#allocation7 + $0x58] sm:$0xff]   ;;  %v7765_v17 = vld [vmem:[#allocation7 + $0x60] sm:$0xff]   ;;  %s9730_s27 = sld [smem:[#allocation35_spill]]  ;;  %vm2643_vm7 = vcmask 917248   ;;  %vm2775_vm8 = vcmask 1048448  }
  0xea   :  { %6899 = vmatprep.subr.bf16.mxu1 %v7754_v6  ;;  %v7762_v14 = vld [vmem:[#allocation7 + $0xd8] sm:$0xff]   ;;  %v7766_v18 = vld [vmem:[#allocation7 + $0xe0] sm:$0xff]   ;;  %v7769_v21 = vld [vmem:[#allocation7 + $0x68] sm:$0xff]   ;;  %s9731_s26 = sld [smem:[#allocation38_spill]]  ;;  %s9732_s0 = sld [smem:[#allocation39_spill]]  ;;  %vm6130_vm9 = vcmask 122880  }
  0xeb   :  { %v7763_v15 = vld [vmem:[#allocation7 + $0x18] sm:$0xff]   ;;  %v7767_v19 = vld [vmem:[#allocation7 + $0x20] sm:$0xff]   ;;  %v7770_v22 = vld [vmem:[#allocation7 + $0xe8] sm:$0xff]   ;;  %s9733_s5 = sld [smem:[#allocation36_spill]]  ;;  %s9734_s2 = sld [smem:[#allocation37_spill]]  ;;  %vm6410_vm10 = vcmask 16384  }
  0xec   :  { %6878 = vmatpush3.bf16.msra.mxu0 %v7755_v7  ;;  %v7764_v16 = vld [vmem:[#allocation7 + $0x98] sm:$0xff]   ;;  %v7768_v20 = vld [vmem:[#allocation7 + $0xa0] sm:$0xff]   ;;  %v7771_v23 = vld [vmem:[#allocation7 + $0x28] sm:$0xff]   ;;  %s9735_s25 = sld [smem:[#allocation40_spill]]  ;;  %s9736_s10 = sld [smem:[#allocation41_spill]] }
  0xed   :  { %6900 = vmatpush3.bf16.msra.mxu1 %v7756_v8  ;;  %6879 = vmatprep.subr.bf16.mxu0 %v7757_v9  ;;  %v7772_v24 = vld [vmem:[#allocation7 + $0xa8] sm:$0xff]   ;;  %v7773_v25 = vld [vmem:[#allocation7 + $0x70] sm:$0xff]   ;;  %v7777_v29 = vld [vmem:[#allocation7 + $0x78] sm:$0xff]   ;;  %s9739_s7 = sld [smem:[#allocation44_spill]]  ;;  %s9740_s11 = sld [smem:[#allocation45_spill]] }
  0xee   :  { %6901 = vmatprep.subr.bf16.mxu1 %v7758_v10  ;;  %v7774_v26 = vld [vmem:[#allocation7 + $0xf0] sm:$0xff]   ;;  %v7778_v30 = vld [vmem:[#allocation7 + $0xf8] sm:$0xff]   ;;  %v269_v33 = vld [vmem:[#allocation4 + $0x8] sm:$0xff] }
  0xef   :  { %v7775_v27 = vld [vmem:[#allocation7 + $0x30] sm:$0xff]   ;;  %v7779_v31 = vld [vmem:[#allocation7 + $0x38] sm:$0xff]   ;;  %v277_v34 = vld [vmem:[#allocation4 + $0x48] sm:$0xff] }
  0xf0   :  { %6880 = vmatpush3.bf16.msra.mxu0 %v7759_v11  ;;  %v7776_v28 = vld [vmem:[#allocation7 + $0xb0] sm:$0xff]   ;;  %v7780_v32 = vld [vmem:[#allocation7 + $0xb8] sm:$0xff]   ;;  %v413_v36 = vpack.c.bf16 %v277_v34, %v269_v33  ;;  %v268_v38 = vld [vmem:[#allocation4] sm:$0xff] }
  0xf1   :  { %6902 = vmatpush3.bf16.msra.mxu1 %v7760_v12  ;;  %6881 = vmatprep.subr.bf16.mxu0 %v7761_v13  ;;  %v271_v35 = vld [vmem:[#allocation4 + $0x18] sm:$0xff]  ;;  %v276_v39 = vld [vmem:[#allocation4 + $0x40] sm:$0xff]  ;;  %v270_v42 = vld [vmem:[#allocation4 + $0x10] sm:$0xff] }
  0xf2   :  { %6903 = vmatprep.subr.bf16.mxu1 %v7762_v14  ;;  %v279_v37 = vld [vmem:[#allocation4 + $0x58] sm:$0xff]  ;;  %v412_v41 = vpack.c.bf16 %v276_v39, %v268_v38  ;;  %v278_v43 = vld [vmem:[#allocation4 + $0x50] sm:$0xff]  ;;  %843 = vmatprep.mubr.bf16.mxu0 %v413_v36  ;;  %v7781_v45 = vld [vmem:[#allocation7 + $0x140] sm:$0xff]  }
  0xf3   :  { %v415_v40 = vpack.c.bf16 %v279_v37, %v271_v35  ;;  %v414_v44 = vpack.c.bf16 %v278_v43, %v270_v42  ;;  %v7782_v46 = vld [vmem:[#allocation7 + $0x1c0] sm:$0xff]   ;;  %v7785_v49 = vld [vmem:[#allocation7 + $0x148] sm:$0xff]   ;;  %v7789_v53 = vld [vmem:[#allocation7 + $0x150] sm:$0xff]  }
  0xf4   :  { %6882 = vmatpush3.bf16.msra.mxu0 %v7763_v15  ;;  %v7783_v47 = vld [vmem:[#allocation7 + $0x100] sm:$0xff]   ;;  %v7786_v50 = vld [vmem:[#allocation7 + $0x1c8] sm:$0xff]   ;;  %v7790_v54 = vld [vmem:[#allocation7 + $0x1d0] sm:$0xff]  }
  0xf5   :  { %6904 = vmatpush3.bf16.msra.mxu1 %v7764_v16  ;;  %6883 = vmatprep.subr.bf16.mxu0 %v7765_v17  ;;  %v7784_v48 = vld [vmem:[#allocation7 + $0x180] sm:$0xff]   ;;  %v7787_v51 = vld [vmem:[#allocation7 + $0x108] sm:$0xff]   ;;  %v7791_v55 = vld [vmem:[#allocation7 + $0x110] sm:$0xff]  }
  0xf6   :  { %6905 = vmatprep.subr.bf16.mxu1 %v7766_v18  ;;  %884 = vmatprep.mubr.bf16.mxu1 %v415_v40  ;;  %v7788_v52 = vld [vmem:[#allocation7 + $0x188] sm:$0xff]   ;;  %v7792_v56 = vld [vmem:[#allocation7 + $0x190] sm:$0xff]   ;;  %v7793_v57 = vld [vmem:[#allocation7 + $0x158] sm:$0xff]  }
  0xf7   :  { %v7794_v58 = vld [vmem:[#allocation7 + $0x1d8] sm:$0xff]   ;;  %v7797_v61 = vld [vmem:[#allocation7 + $0x160] sm:$0xff]   ;;  %v7801_v1 = vld [vmem:[#allocation7 + $0x168] sm:$0xff]  }
  0xf8   :  { %6884 = vmatpush3.bf16.msra.mxu0 %v7767_v19  ;;  %v7795_v59 = vld [vmem:[#allocation7 + $0x118] sm:$0xff]   ;;  %v7798_v62 = vld [vmem:[#allocation7 + $0x1e0] sm:$0xff]   ;;  %v7802_v2 = vld [vmem:[#allocation7 + $0x1e8] sm:$0xff]  }
  0xf9   :  { %6906 = vmatpush3.bf16.msra.mxu1 %v7768_v20  ;;  %6885 = vmatprep.subr.bf16.mxu0 %v7769_v21  ;;  %v7796_v60 = vld [vmem:[#allocation7 + $0x198] sm:$0xff]   ;;  %v7799_v63 = vld [vmem:[#allocation7 + $0x120] sm:$0xff]   ;;  %v7803_v3 = vld [vmem:[#allocation7 + $0x128] sm:$0xff]  }
  0xfa   :  { %6907 = vmatprep.subr.bf16.mxu1 %v7770_v22  ;;  %v7800_v0 = vld [vmem:[#allocation7 + $0x1a0] sm:$0xff]   ;;  %v7804_v4 = vld [vmem:[#allocation7 + $0x1a8] sm:$0xff]   ;;  %v7805_v5 = vld [vmem:[#allocation7 + $0x170] sm:$0xff]  }
  0xfb   :  { %v7806_v6 = vld [vmem:[#allocation7 + $0x1f0] sm:$0xff]   ;;  %v7809_v9 = vld [vmem:[#allocation7 + $0x178] sm:$0xff]   ;;  %v273_v13 = vld [vmem:[#allocation4 + $0x28] sm:$0xff] }
  0xfc   :  { %6886 = vmatpush3.bf16.msra.mxu0 %v7771_v23  ;;  %v7807_v7 = vld [vmem:[#allocation7 + $0x130] sm:$0xff]   ;;  %v7810_v10 = vld [vmem:[#allocation7 + $0x1f8] sm:$0xff]   ;;  %v281_v14 = vld [vmem:[#allocation4 + $0x68] sm:$0xff] }
  0xfd   :  { %6908 = vmatpush3.bf16.msra.mxu1 %v7772_v24  ;;  %6887 = vmatprep.subr.bf16.mxu0 %v7773_v25  ;;  %v7808_v8 = vld [vmem:[#allocation7 + $0x1b0] sm:$0xff]   ;;  %v7811_v11 = vld [vmem:[#allocation7 + $0x138] sm:$0xff]   ;;  %v417_v17 = vpack.c.bf16 %v281_v14, %v273_v13  ;;  %v272_v19 = vld [vmem:[#allocation4 + $0x20] sm:$0xff] }
  0xfe   :  { %6909 = vmatprep.subr.bf16.mxu1 %v7774_v26  ;;  %v7812_v12 = vld [vmem:[#allocation7 + $0x1b8] sm:$0xff]   ;;  %v280_v20 = vld [vmem:[#allocation4 + $0x60] sm:$0xff]  ;;  %v274_v21 = vld [vmem:[#allocation4 + $0x30] sm:$0xff] }
  0xff   :  { %v275_v15 = vld [vmem:[#allocation4 + $0x38] sm:$0xff]  ;;  %v416_v22 = vpack.c.bf16 %v280_v20, %v272_v19  ;;  %v282_v23 = vld [vmem:[#allocation4 + $0x70] sm:$0xff] }
 0x100   :  { %6888 = vmatpush3.bf16.msra.mxu0 %v7775_v27  ;;  %v283_v16 = vld [vmem:[#allocation4 + $0x78] sm:$0xff]  ;;  %v418_v24 = vpack.c.bf16 %v282_v23, %v274_v21  ;;  %v8639_v27 = vmov 0.0   ;;  %v7824_v34 = vld [vmem:[%s8676_s17 + $0x38] ss:$12 sps:$4 sm:$0xff]   ;;  %v1012_v23 = vlaneseq }
 0x101   :  { %6910 = vmatpush3.bf16.msra.mxu1 %v7776_v28  ;;  %6889 = vmatprep.subr.bf16.mxu0 %v7777_v29  ;;  %v419_v18 = vpack.c.bf16 %v283_v16, %v275_v15  ;;  %v7813_v25 = vld [vmem:[%s8676_s17] ss:$12 sps:$4 sm:$0xff]   ;;  %v7815_v26 = vld [vmem:[%s8676_s17 + $0x4] ss:$12 sps:$4 sm:$0xff]   ;;  %v7816_v28 = vld [vmem:[%s8676_s17 + $0x8] ss:$12 sps:$4 sm:$0xff]  }
 0x102   :  { %6911 = vmatprep.subr.bf16.mxu1 %v7778_v30  ;;  %v7819_v29 = vld [vmem:[%s8676_s17 + $0x1c] ss:$12 sps:$4 sm:$0xff]   ;;  %v7817_v30 = vld [vmem:[%s8676_s17 + $0x18] ss:$12 sps:$4 sm:$0xff]   ;;  %v7829_v39 = vld [vmem:[%s8676_s17 + $0x60] ss:$12 sps:$4 sm:$0xff]  }
 0x103   :  { %v7821_v33 = vld [vmem:[%s8676_s17 + $0x30] ss:$12 sps:$4 sm:$0xff]   ;;  %v7827_v35 = vld [vmem:[%s8676_s17 + $0x4c] ss:$12 sps:$4 sm:$0xff]   ;;  %v7825_v36 = vld [vmem:[%s8676_s17 + $0x48] ss:$12 sps:$4 sm:$0xff]  }
 0x104   :  { %6890 = vmatpush3.bf16.msra.mxu0 %v7779_v31  ;;  %v7820_v31 = vld [vmem:[%s8676_s17 + $0x20] ss:$12 sps:$4 sm:$0xff]   ;;  %v7828_v37 = vld [vmem:[%s8676_s17 + $0x50] ss:$12 sps:$4 sm:$0xff]   ;;  %v7832_v40 = vld [vmem:[%s8676_s17 + $0x68] ss:$12 sps:$4 sm:$0xff]  }
 0x105   :  { %6912 = vmatpush3.bf16.msra.mxu1 %v7780_v32  ;;  %6919 = vmatprep.subr.bf16.mxu0 %v7781_v45  ;;  %v7823_v32 = vld [vmem:[%s8676_s17 + $0x34] ss:$12 sps:$4 sm:$0xff]   ;;  %v7831_v38 = vld [vmem:[%s8676_s17 + $0x64] ss:$12 sps:$4 sm:$0xff]  }
 0x106   :  { %6941 = vmatprep.subr.bf16.mxu1 %v7782_v46  ;;  %v7833_v42 = vld [vmem:[%s8676_s17 + $0x78] ss:$12 sps:$4 sm:$0xff]   ;;  %v7836_v43 = vld [vmem:[%s8676_s17 + $0x80] ss:$12 sps:$4 sm:$0xff]   ;;  %v7837_v45 = vld [vmem:[%s8676_s17 + $0x90] ss:$12 sps:$4 sm:$0xff]  }
 0x107   :  { %844 = vmatmul.mubr.bf16.vlgmr.msra.gmra.mrb[0].mxu0 %v412_v41  ;;  %v7835_v41 = vld [vmem:[%s8676_s17 + $0x7c] ss:$12 sps:$4 sm:$0xff]   ;;  %v7840_v46 = vld [vmem:[%s8676_s17 + $0x98] ss:$12 sps:$4 sm:$0xff]  }
 0x108   :  { %885 = vmatmul.mubr.bf16.vlgmr.msra.gmra.mrb[0].mxu1 %v414_v44  ;;  %6920 = vmatpush3.bf16.msra.mxu0 %v7783_v47  ;;  %v7839_v44 = vld [vmem:[%s8676_s17 + $0x94] ss:$12 sps:$4 sm:$0xff]   ;;  %v7843_v47 = vld [vmem:[%s8676_s17 + $0xac] ss:$12 sps:$4 sm:$0xff]  }
 0x109   :  { %6942 = vmatpush3.bf16.msra.mxu1 %v7784_v48  ;;  %6921 = vmatprep.subr.bf16.mxu0 %v7785_v49  ;;  %v7841_v48 = vld [vmem:[%s8676_s17 + $0xa8] ss:$12 sps:$4 sm:$0xff]   ;;  %v7844_v49 = vld [vmem:[%s8676_s17 + $0xb0] ss:$12 sps:$4 sm:$0xff]   ;;  %s9729_s17 = sld [smem:[#allocation34_spill]] }
 0x10a   :  { %6943 = vmatprep.subr.bf16.mxu1 %v7786_v50  ;;  %925 = vmatprep.mubr.bf16.mxu0 %v417_v17  ;;  %v8640_v50 = vmov 0  }
 0x10b   :  { %966 = vmatprep.mubr.bf16.mxu1 %v419_v18  ;;  %7748 = vset.pattern.permute.xlu0 %v8640_v50 }
 0x10c   :  { %6922 = vmatpush3.bf16.msra.mxu0 %v7787_v51 }
 0x10d   :  { %6944 = vmatpush3.bf16.msra.mxu1 %v7788_v52  ;;  %6923 = vmatprep.subr.bf16.mxu0 %v7789_v53  ;;  %v6503_v53 = vld [vmem:[%s8671_s13] ss:$0 sm:$0xff]  ;;  %s9728_s13 = sld [smem:[#allocation33_spill]] }
 0x10e   :  { %6945 = vmatprep.subr.bf16.mxu1 %v7790_v54 }
 0x110   :  { %6924 = vmatpush3.bf16.msra.mxu0 %v7791_v55 }
 0x111   :  { %6946 = vmatpush3.bf16.msra.mxu1 %v7792_v56  ;;  %6925 = vmatprep.subr.bf16.mxu0 %v7793_v57 }
 0x112   :  { %6947 = vmatprep.subr.bf16.mxu1 %v7794_v58 }
 0x114   :  { %6926 = vmatpush3.bf16.msra.mxu0 %v7795_v59 }
 0x115   :  { %6948 = vmatpush3.bf16.msra.mxu1 %v7796_v60  ;;  %6927 = vmatprep.subr.bf16.mxu0 %v7797_v61 }
 0x116   :  { %6949 = vmatprep.subr.bf16.mxu1 %v7798_v62 }
 0x118   :  { %6928 = vmatpush3.bf16.msra.mxu0 %v7799_v63 }
 0x119   :  { %6950 = vmatpush3.bf16.msra.mxu1 %v7800_v0  ;;  %6929 = vmatprep.subr.bf16.mxu0 %v7801_v1 }
 0x11a   :  { %6951 = vmatprep.subr.bf16.mxu1 %v7802_v2 }
 0x11c   :  { %6930 = vmatpush3.bf16.msra.mxu0 %v7803_v3 }
 0x11d   :  { %6952 = vmatpush3.bf16.msra.mxu1 %v7804_v4  ;;  %6931 = vmatprep.subr.bf16.mxu0 %v7805_v5 }
 0x11e   :  { %6953 = vmatprep.subr.bf16.mxu1 %v7806_v6 }
 0x120   :  { %6932 = vmatpush3.bf16.msra.mxu0 %v7807_v7 }
 0x121   :  { %6954 = vmatpush3.bf16.msra.mxu1 %v7808_v8  ;;  %6933 = vmatprep.subr.bf16.mxu0 %v7809_v9 }
 0x122   :  { %6955 = vmatprep.subr.bf16.mxu1 %v7810_v10 }
 0x124   :  { %6934 = vmatpush3.bf16.msra.mxu0 %v7811_v11 }
 0x125   :  { %6956 = vmatpush3.bf16.msra.mxu1 %v7812_v12  ;;  %1155 = vmatprep.subr.bf16.mxu0 %v7815_v26  ;;  %v1010_v26 = vld [vmem:[%s8681_s21] sm:$0x7]  ;;  %s8642_s21 = smov 112  }
 0x126   :  { %7223 = vmatprep.subr.bf16.mxu1 %v8639_v27 }
 0x127   :  { %926 = vmatmul.mubr.bf16.vlgmr.msra.gmra.mrb[4].mxu0 %v416_v22 }
 0x128   :  { %967 = vmatmul.mubr.bf16.vlgmr.msra.gmra.mrb[4].mxu1 %v418_v24  ;;  %1156 = vmatpush1.bf16.msra.mxu0 %v7813_v25  ;;  %v8936_v24 = vshrl.u32 %v1012_v23, 7  ;;  %v7857_v23 = vld [vmem:[#allocation10 + $0x18] ss:$12 sps:$4 sm:$0xff]  }
 0x129   :  { %7224 = vmatpush3.bf16.msra.mxu1 %v7816_v28  ;;  %1157 = vmatprep.subr.bf16.mxu0 %v7819_v29 }
 0x12a   :  { %7225 = vmatprep.subr.bf16.mxu1 %v8639_v27  ;;  %1187 = vmatprep.mubr.bf16.mxu0 %v8640_v50  ;;  %v8939_v25 = vsub.s32 0, %v8936_v24  ;;  %v8943_v28 = vsub.s32 2, %v8936_v24  ;;  %v8946_v29 = vsub.s32 1, %v8936_v24 }
 0x12b   :  { %7239 = vmatprep.mubr.msk.bf16.mxu1 %vm8641_vm0, %v8639_v27 }
 0x12c   :  { %1158 = vmatpush1.bf16.msra.mxu0 %v7817_v30  ;;  %v1015_v30 = vrot.slane %v1010_v26, %v8939_v25 }
 0x12d   :  { %7226 = vmatpush3.bf16.msra.mxu1 %v7820_v31  ;;  %1159 = vmatprep.subr.bf16.mxu0 %v7823_v32  ;;  %v1023_v31 = vrot.slane %v1010_v26, %v8943_v28 }
 0x12e   :  { %7227 = vmatprep.subr.bf16.mxu1 %v8639_v27 }
 0x130   :  { %1160 = vmatpush1.bf16.msra.mxu0 %v7821_v33 }
 0x131   :  { %7228 = vmatpush3.bf16.msra.mxu1 %v7824_v34  ;;  %1161 = vmatprep.subr.bf16.mxu0 %v7827_v35  ;;  %v1019_v34 = vrot.slane %v1010_v26, %v8946_v29  ;;  %v7863_v26 = vld [vmem:[#allocation10 + $0x34] ss:$12 sps:$4 sm:$0xff]  }
 0x132   :  { %7229 = vmatprep.subr.bf16.mxu1 %v8639_v27 }
 0x134   :  { %1162 = vmatpush1.bf16.msra.mxu0 %v7825_v36 }
 0x135   :  { %7230 = vmatpush3.bf16.msra.mxu1 %v7828_v37  ;;  %1163 = vmatprep.subr.bf16.mxu0 %v7831_v38 }
 0x136   :  { %7231 = vmatprep.subr.bf16.mxu1 %v8639_v27 }
 0x138   :  { %1164 = vmatpush1.bf16.msra.mxu0 %v7829_v39 }
 0x139   :  { %7232 = vmatpush3.bf16.msra.mxu1 %v7832_v40  ;;  %1165 = vmatprep.subr.bf16.mxu0 %v7835_v41 }
 0x13a   :  { %7233 = vmatprep.subr.bf16.mxu1 %v8639_v27 }
 0x13c   :  { %1166 = vmatpush1.bf16.msra.mxu0 %v7833_v42 }
 0x13d   :  { %7234 = vmatpush3.bf16.msra.mxu1 %v7836_v43  ;;  %1167 = vmatprep.subr.bf16.mxu0 %v7839_v44 }
 0x13e   :  { %7235 = vmatprep.subr.bf16.mxu1 %v8639_v27 }
 0x140   :  { %1168 = vmatpush1.bf16.msra.mxu0 %v7837_v45 }
 0x141   :  { %7236 = vmatpush3.bf16.msra.mxu1 %v7840_v46  ;;  %1169 = vmatprep.subr.bf16.mxu0 %v7843_v47 }
 0x142   :  { %7237 = vmatprep.subr.bf16.mxu1 %v8639_v27 }
 0x144   :  { %1170 = vmatpush1.bf16.msra.mxu0 %v7841_v48 }
 0x145   :  { %7238 = vmatpush3.bf16.msra.mxu1 %v7844_v49  ;;  %7255 = vmatprep.subr.bf16.mxu0 %v8639_v27 }
 0x146   :  { %7243 = vmatprep.subr.bf16.mxu1 %v8639_v27 }
 0x1da   :  { %v6891_v51 = vpop.f32.mrb[0].mxu0 }
 0x1db   :  { %v6913_v52 = vpop.f32.mrb[0].mxu1  ;;  %v6892_v54 = vpop.f32.mrb[1].mxu0 }
 0x1dc   :  { %v6893_v55 = vadd.f32 %v6892_v54, %v6891_v51  ;;  %v6914_v56 = vpop.f32.mrb[1].mxu1  ;;  %v6894_v57 = vpop.f32.mrb[2].mxu0 }
 0x1dd   :  { %v6915_v58 = vadd.f32 %v6914_v56, %v6913_v52  ;;  %v6916_v59 = vpop.f32.mrb[2].mxu1  ;;  %v6895_v60 = vpop.f32.mrb[3].mxu0 }
 0x1de   :  { %v846_v61 = vadd.f32 %v6893_v55, %v6503_v53  ;;  %v6896_v62 = vadd.f32 %v6895_v60, %v6894_v57  ;;  %v6917_v63 = vpop.f32.mrb[3].mxu1 }
 0x1df   :  { %v6918_v0 = vadd.f32 %v6917_v63, %v6916_v59 }
 0x1e0   :  { %v887_v1 = vadd.f32 %v6915_v58, %v846_v61  ;;  %v849_v2 = vadd.f32 %v6896_v62, %v6503_v53 }
 0x1e2   :  { %v890_v3 = vadd.f32 %v6918_v0, %v849_v2 }
 0x1fa   :  { %v6935_v4 = vpop.f32.mrb[4].mxu0 }
 0x1fb   :  { %v6957_v5 = vpop.f32.mrb[4].mxu1  ;;  %v6936_v6 = vpop.f32.mrb[5].mxu0 }
 0x1fc   :  { %v6937_v7 = vadd.f32 %v6936_v6, %v6935_v4  ;;  %v6958_v8 = vpop.f32.mrb[5].mxu1  ;;  %v6938_v9 = vpop.f32.mrb[6].mxu0  ;;  %v7846_v6 = vld [vmem:[#allocation9 + $0x8] sm:$0xff]  }
 0x1fd   :  { %v6959_v10 = vadd.f32 %v6958_v8, %v6957_v5  ;;  %v6960_v11 = vpop.f32.mrb[6].mxu1  ;;  %v6939_v12 = vpop.f32.mrb[7].mxu0  ;;  %v7845_v5 = vld [vmem:[#allocation9] sm:$0xff]   ;;  %v7848_v8 = vld [vmem:[#allocation9 + $0x18] sm:$0xff]  }
 0x1fe   :  { %v928_v13 = vadd.f32 %v6937_v7, %v887_v1  ;;  %v6940_v14 = vadd.f32 %v6939_v12, %v6938_v9  ;;  %v6961_v15 = vpop.f32.mrb[7].mxu1  ;;  %v7847_v7 = vld [vmem:[#allocation9 + $0x10] sm:$0xff]   ;;  %v7849_v9 = vld [vmem:[#allocation9 + $0x20] sm:$0xff]  }
 0x1ff   :  { %v6962_v16 = vadd.f32 %v6961_v15, %v6960_v11  ;;  %v7851_v11 = vld [vmem:[#allocation9 + $0x30] sm:$0xff]  }
 0x200   :  { %v969_v17 = vadd.f32 %v6959_v10, %v928_v13  ;;  %v931_v18 = vadd.f32 %v6940_v14, %v890_v3  ;;  %v7850_v10 = vld [vmem:[#allocation9 + $0x28] sm:$0xff]  }
 0x202   :  { %v972_v19 = vadd.f32 %v6962_v16, %v931_v18  ;;  %v975_v20 = vmax.f32 %v969_v17, 0.0 }
 0x204   :  { %v976_v21 = vmax.f32 %v972_v19, 0.0  ;;  %v7852_v19 = vld [vmem:[#allocation9 + $0x38] sm:$0xff]  }
 0x206   :  { %v1009_v22 = vpack.c.bf16 %v976_v21, %v975_v20  ;;  %v7853_v20 = vld [vmem:[#allocation10] ss:$12 sps:$4 sm:$0xff]   ;;  %v7855_v21 = vld [vmem:[#allocation10 + $0x4] ss:$12 sps:$4 sm:$0xff]  }
 0x208   :  { %1188 = vmatmul.mubr.bf16.vlgmr.msra.gmra.mrb[8].mxu0 %v1009_v22  ;;  %7240 = vmatmul.mubr.bf16.vlgmr.msra.gmra.mrb[8].mxu1 %v1009_v22  ;;  %v7859_v22 = vld [vmem:[#allocation10 + $0x1c] ss:$12 sps:$4 sm:$0xff]  }
 0x209   :  { %7245 = vmatprep.mubr.msk.bf16.mxu1 %vm8641_vm0, %v8639_v27  ;;  %7271 = vmatprep.mubr.msk.bf16.mxu0 %vm8641_vm0, %v8639_v27 }
 0x20a   :  { %7256 = vmatpush3.bf16.msra.mxu0 %v7845_v5 }
 0x20b   :  { %7257 = vmatprep.subr.bf16.mxu0 %v8639_v27 }
 0x20e   :  { %7258 = vmatpush3.bf16.msra.mxu0 %v7846_v6 }
 0x20f   :  { %7259 = vmatprep.subr.bf16.mxu0 %v8639_v27 }
 0x212   :  { %7260 = vmatpush3.bf16.msra.mxu0 %v7847_v7 }
 0x213   :  { %7261 = vmatprep.subr.bf16.mxu0 %v8639_v27 }
 0x216   :  { %7262 = vmatpush3.bf16.msra.mxu0 %v7848_v8 }
 0x217   :  { %7263 = vmatprep.subr.bf16.mxu0 %v8639_v27 }
 0x21a   :  { %7264 = vmatpush3.bf16.msra.mxu0 %v7849_v9 }
 0x21b   :  { %7265 = vmatprep.subr.bf16.mxu0 %v8639_v27 }
 0x21e   :  { %7266 = vmatpush3.bf16.msra.mxu0 %v7850_v10 }
 0x21f   :  { %7267 = vmatprep.subr.bf16.mxu0 %v8639_v27 }
 0x222   :  { %7268 = vmatpush3.bf16.msra.mxu0 %v7851_v11 }
 0x223   :  { %7269 = vmatprep.subr.bf16.mxu0 %v8639_v27 }
 0x226   :  { %7270 = vmatpush3.bf16.msra.mxu0 %v7852_v19 }
 0x227   :  { %7275 = vmatprep.subr.bf16.mxu0 %v8639_v27 }
 0x2db   :  { %v1189_v32 = vpop.f32.mrb[8].mxu0  ;;  %v1232_v33 = vpop.f32.mrb[8].mxu1 }
 0x2dc   :  { %v1190_v35 = vadd.f32 %v1189_v32, %v1015_v30  ;;  %v1191_v36 = vpop.f32.mrb[9].mxu0  ;;  %v7241_v37 = vpop.f32.mrb[9].mxu1  ;;  %v1233_v40 = vadd.f32 %v1232_v33, %v1023_v31  ;;  %v7865_v32 = vld [vmem:[#allocation10 + $0x48] ss:$12 sps:$4 sm:$0xff]   ;;  %v7871_v33 = vld [vmem:[#allocation10 + $0x64] ss:$12 sps:$4 sm:$0xff]  }
 0x2dd   :  { %v1193_v38 = vpop.f32.mrb[10].mxu0  ;;  %v1235_v39 = vpop.f32.mrb[10].mxu1  ;;  %v1192_v45 = vadd.f32 %v1191_v36, %v1019_v34  ;;  %v7873_v36 = vld [vmem:[#allocation10 + $0x78] ss:$12 sps:$4 sm:$0xff]   ;;  %v7879_v37 = vld [vmem:[#allocation10 + $0x94] ss:$12 sps:$4 sm:$0xff]  }
 0x2de   :  { %v1194_v41 = vadd.f32 %v1193_v38, %v1015_v30  ;;  %v1236_v42 = vadd.f32 %v1235_v39, %v1023_v31  ;;  %v1195_v43 = vpop.f32.mrb[11].mxu0  ;;  %v7242_v44 = vpop.f32.mrb[11].mxu1  ;;  %v1239_v47 = vmul.f32 0.088388346, %v1190_v35  ;;  %v7861_v30 = vld [vmem:[#allocation10 + $0x30] ss:$12 sps:$4 sm:$0xff]  }
 0x2df   :  { %v1196_v46 = vadd.f32 %v1195_v43, %v1019_v34  ;;  %v7867_v31 = vld [vmem:[#allocation10 + $0x4c] ss:$12 sps:$4 sm:$0xff]   ;;  %v7875_v35 = vld [vmem:[#allocation10 + $0x7c] ss:$12 sps:$4 sm:$0xff]  }
 0x2e0   :  { %v1240_v48 = vmul.f32 0.088388346, %v1194_v41  ;;  %v1310_v49 = vpack.c.bf16 %v1236_v42, %v1233_v40  ;;  %v7869_v34 = vld [vmem:[#allocation10 + $0x60] ss:$12 sps:$4 sm:$0xff]   ;;  %v7877_v38 = vld [vmem:[#allocation10 + $0x90] ss:$12 sps:$4 sm:$0xff]  }
 0x2e1   :  { %v1242_v51 = vpack.c.bf16 %v1196_v46, %v1192_v45  ;;  %v7856_v42 = vld [vmem:[#allocation10 + $0x8] ss:$12 sps:$4 sm:$0xff]   ;;  %v7860_v45 = vld [vmem:[#allocation10 + $0x20] ss:$12 sps:$4 sm:$0xff]   ;;  %v7864_v46 = vld [vmem:[#allocation10 + $0x38] ss:$12 sps:$4 sm:$0xff]  }
 0x2e2   :  { %v1241_v52 = vpack.c.bf16 %v1240_v48, %v1239_v47  ;;  %v7868_v47 = vld [vmem:[#allocation10 + $0x50] ss:$12 sps:$4 sm:$0xff]   ;;  %v7872_v48 = vld [vmem:[#allocation10 + $0x68] ss:$12 sps:$4 sm:$0xff]  }
 0x2e3   :  { %7244 = vmatpush3.bf16.xpose.msra.mxu1 %v1242_v51  ;;  %v7880_v51 = vld [vmem:[#allocation10 + $0x98] ss:$12 sps:$4 sm:$0xff]  }
 0x2e4   :  { %7249 = vmatprep.subr.bf16.mxu1 %v8639_v27 }
 0x2ea   :  { %7246 = vmatmul.mubr.bf16.vlgmr.msra.gmra.mrb[12].mxu1 %v1241_v52  ;;  %v7883_v52 = vld [vmem:[#allocation10 + $0xac] ss:$12 sps:$4 sm:$0xff]  }
 0x2eb   :  { %7250 = vmatpush3.bf16.msra.mxu1 %v1310_v49  ;;  %7251 = vmatprep.mubr.msk.bf16.mxu1 %vm8641_vm0, %v8639_v27  ;;  %v7876_v49 = vld [vmem:[#allocation10 + $0x80] ss:$12 sps:$4 sm:$0xff]  }
 0x2ec   :  { %1646 = vmatprep.subr.bf16.mxu1 %v7855_v21 }
 0x3bd   :  { %v1277_v53 = vpop.f32.mrb[12].mxu1 }
 0x3be   :  { %v7247_v54 = vpop.f32.mrb[13].mxu1  ;;  %v1285_v55 = vsel %vm1284_vm1, %v1277_v53, -inf }
 0x3bf   :  { %1286 = vmax.xlane.f32.xlu0 %v1285_v55  ;;  %v1280_v56 = vpop.f32.mrb[14].mxu1  ;;  %v7884_v54 = vld [vmem:[#allocation10 + $0xb0] ss:$12 sps:$4 sm:$0xff]   ;;  %v6593_v55 = vld [vmem:[%s9728_s13] ss:$0 sm:$0xff] }
 0x3c0   :  { %v7248_v57 = vpop.f32.mrb[15].mxu1  ;;  %v1288_v58 = vsel %vm1284_vm1, %v1280_v56, -inf }
 0x3c3   :  { %1289 = vmax.xlane.f32.xlu0 %v1288_v58 }
 0x44c   :  { %v1287_v59 = vpop.xlane.xlu0 %1286 }
 0x44d   :  { %v1291_v60 = vsub.f32 %v1277_v53, %v1287_v59  ;;  %v7881_v53 = vld [vmem:[#allocation10 + $0xa8] ss:$12 sps:$4 sm:$0xff]  }
 0x44f   :  { %v1293_v61 = vmul.f32 1.442695, %v1291_v60 }
 0x450   :  { %v1290_v62 = vpop.xlane.xlu0 %1289 }
 0x451   :  { %8117 = vpow2.f32 %v1293_v61  ;;  %v1292_v63 = vsub.f32 %v1280_v56, %v1290_v62 }
 0x453   :  { %v1295_v0 = vmul.f32 1.442695, %v1292_v63  ;;  %v1501_v63 = vld [vmem:[%s9729_s17] sm:$0x7] }
 0x455   :  { %8119 = vpow2.f32 %v1295_v0  ;;  %v1506_v0 = vrot.slane %v1501_v63, %v8939_v25 }
 0x45b   :  { %v8118_v1 = vpop.eup %8117 }
 0x45c   :  { %v1297_v2 = vsel %vm1284_vm1, %v8118_v1, 0.0 }
 0x45d   :  { %1298 = vadd.xlane.f32.xlu1 %v1297_v2 }
 0x45f   :  { %v8120_v3 = vpop.eup %8119 }
 0x460   :  { %v1300_v4 = vsel %vm1284_vm1, %v8120_v3, 0.0 }
 0x461   :  { %1301 = vadd.xlane.f32.xlu1 %v1300_v4  ;;  %v1510_v4 = vrot.slane %v1501_v63, %v8946_v29 }
 0x4ea   :  { %v1299_v12 = vpop.xlane.xlu1 %1298 }
 0x4eb   :  { %8121 = vrcp.f32 %v1299_v12 }
 0x4ee   :  { %v1302_v13 = vpop.xlane.xlu1 %1301 }
 0x4ef   :  { %8123 = vrcp.f32 %v1302_v13 }
 0x4f5   :  { %v8122_v14 = vpop.eup %8121 }
 0x4f6   :  { %v1304_v15 = vmul.f32 %v8122_v14, %v8118_v1  ;;  %v1514_v1 = vrot.slane %v1501_v63, %v8943_v28 }
 0x4f8   :  { %1307 = vst.msk [vmem:[#allocation22] sm:$0xff] %vm1284_vm1, %v1304_v15 }
 0x4f9   :  { %v8124_v16 = vpop.eup %8123 }
 0x4fa   :  { %v1306_v17 = vmul.f32 %v8124_v16, %v8120_v3 }
 0x4fc   :  { %1308 = vst.msk [vmem:[#allocation22 + $0x8] sm:$0xff] %vm1284_vm1, %v1306_v17  ;;  %v1309_v18 = vpack.c.bf16 %v1306_v17, %v1304_v15 }
 0x4fe   :  { %7252 = vmatmul.mubr.msk.bf16.vlgmr.msra.gmra.mrb[16].mxu1 %vm1284_vm1, %v1309_v18 }
 0x4ff   :  { %1678 = vmatprep.mubr.bf16.mxu1 %v8640_v50  ;;  %1647 = vmatpush1.bf16.msra.mxu1 %v7853_v20 }
 0x500   :  { %1648 = vmatprep.subr.bf16.mxu1 %v7859_v22 }
 0x503   :  { %1649 = vmatpush1.bf16.msra.mxu1 %v7857_v23 }
 0x504   :  { %1650 = vmatprep.subr.bf16.mxu1 %v7863_v26 }
 0x507   :  { %1651 = vmatpush1.bf16.msra.mxu1 %v7861_v30 }
 0x508   :  { %1652 = vmatprep.subr.bf16.mxu1 %v7867_v31 }
 0x50b   :  { %1653 = vmatpush1.bf16.msra.mxu1 %v7865_v32 }
 0x50c   :  { %1654 = vmatprep.subr.bf16.mxu1 %v7871_v33 }
 0x50f   :  { %1655 = vmatpush1.bf16.msra.mxu1 %v7869_v34 }
 0x510   :  { %1656 = vmatprep.subr.bf16.mxu1 %v7875_v35 }
 0x513   :  { %1657 = vmatpush1.bf16.msra.mxu1 %v7873_v36 }
 0x514   :  { %1658 = vmatprep.subr.bf16.mxu1 %v7879_v37 }
 0x517   :  { %1659 = vmatpush1.bf16.msra.mxu1 %v7877_v38 }
 0x518   :  { %1660 = vmatprep.subr.bf16.mxu1 %v7883_v52 }
 0x51b   :  { %1661 = vmatpush1.bf16.msra.mxu1 %v7881_v53 }
 0x51c   :  { %7295 = vmatprep.subr.bf16.mxu1 %v8639_v27 }
 0x5d1   :  { %v1348_v39 = vpop.f32.mrb[16].mxu1 }
 0x5d2   :  { %v7253_v40 = vpop.f32.mrb[17].mxu1 }
 0x5d3   :  { %v1351_v41 = vpop.f32.mrb[18].mxu1 }
 0x5d4   :  { %v1371_v43 = vpack.c.bf16 %v1351_v41, %v1348_v39  ;;  %v7254_v44 = vpop.f32.mrb[19].mxu1 }
 0x5d6   :  { %7272 = vmatmul.mubr.bf16.vlgmr.msra.gmra.mrb[12].mxu0 %v1371_v43 }
 0x5d7   :  { %7276 = vmatpush3.bf16.msra.mxu0 %v7856_v42  ;;  %7291 = vmatprep.mubr.msk.bf16.mxu0 %vm8641_vm0, %v8639_v27 }
 0x5d8   :  { %7277 = vmatprep.subr.bf16.mxu0 %v8639_v27 }
 0x5db   :  { %7278 = vmatpush3.bf16.msra.mxu0 %v7860_v45 }
 0x5dc   :  { %7279 = vmatprep.subr.bf16.mxu0 %v8639_v27 }
 0x5df   :  { %7280 = vmatpush3.bf16.msra.mxu0 %v7864_v46 }
 0x5e0   :  { %7281 = vmatprep.subr.bf16.mxu0 %v8639_v27 }
 0x5e3   :  { %7282 = vmatpush3.bf16.msra.mxu0 %v7868_v47 }
 0x5e4   :  { %7283 = vmatprep.subr.bf16.mxu0 %v8639_v27 }
 0x5e7   :  { %7284 = vmatpush3.bf16.msra.mxu0 %v7872_v48 }
 0x5e8   :  { %7285 = vmatprep.subr.bf16.mxu0 %v8639_v27 }
 0x5eb   :  { %7286 = vmatpush3.bf16.msra.mxu0 %v7876_v49 }
 0x5ec   :  { %7287 = vmatprep.subr.bf16.mxu0 %v8639_v27 }
 0x5ef   :  { %7288 = vmatpush3.bf16.msra.mxu0 %v7880_v51 }
 0x5f0   :  { %7289 = vmatprep.subr.bf16.mxu0 %v8639_v27 }
 0x5f3   :  { %7290 = vmatpush3.bf16.msra.mxu0 %v7884_v54 }
 0x5f4   :  { %7319 = vmatprep.subr.bf16.mxu0 %v8639_v27 }
 0x6a9   :  { %v1461_v56 = vpop.f32.mrb[12].mxu0 }
 0x6aa   :  { %v7273_v57 = vpop.f32.mrb[13].mxu0  ;;  %v8982_v59 = vadd.f32 %v6593_v55, %v1461_v56 }
 0x6ab   :  { %v1464_v58 = vpop.f32.mrb[14].mxu0 }
 0x6ac   :  { %v8984_v60 = vadd.f32 %v6593_v55, %v1464_v58  ;;  %v7274_v61 = vpop.f32.mrb[15].mxu0 }
 0x6ae   :  { %v1500_v62 = vpack.c.bf16 %v8984_v60, %v8982_v59 }
 0x6b0   :  { %1679 = vmatmul.mubr.bf16.vlgmr.msra.gmra.mrb[20].mxu1 %v1500_v62  ;;  %7292 = vmatmul.mubr.bf16.vlgmr.msra.gmra.mrb[16].mxu0 %v1500_v62 }
 0x6b1   :  { %7297 = vmatprep.mubr.msk.bf16.mxu1 %vm8641_vm0, %v8639_v27  ;;  %7321 = vmatprep.mubr.msk.bf16.mxu0 %vm8641_vm0, %v8639_v27 }
 0x783   :  { %v1680_v2 = vpop.f32.mrb[20].mxu1  ;;  %v1723_v3 = vpop.f32.mrb[16].mxu0 }
 0x784   :  { %v1681_v5 = vadd.f32 %v1680_v2, %v1506_v0  ;;  %v1682_v6 = vpop.f32.mrb[21].mxu1  ;;  %v7293_v7 = vpop.f32.mrb[17].mxu0  ;;  %v1724_v10 = vadd.f32 %v1723_v3, %v1514_v1 }
 0x785   :  { %v1684_v8 = vpop.f32.mrb[22].mxu1  ;;  %v1726_v9 = vpop.f32.mrb[18].mxu0  ;;  %v1683_v15 = vadd.f32 %v1682_v6, %v1510_v4 }
 0x786   :  { %v1685_v11 = vadd.f32 %v1684_v8, %v1506_v0  ;;  %v1727_v12 = vadd.f32 %v1726_v9, %v1514_v1  ;;  %v1686_v13 = vpop.f32.mrb[23].mxu1  ;;  %v7294_v14 = vpop.f32.mrb[19].mxu0  ;;  %v1730_v17 = vmul.f32 0.25, %v1681_v5 }
 0x787   :  { %v1687_v16 = vadd.f32 %v1686_v13, %v1510_v4 }
 0x788   :  { %v1731_v18 = vmul.f32 0.25, %v1685_v11  ;;  %v8996_v19 = vpack.c.bf16 %v1727_v12, %v1724_v10 }
 0x789   :  { %v1733_v20 = vpack.c.bf16 %v1687_v16, %v1683_v15 }
 0x78a   :  { %v1732_v21 = vpack.c.bf16 %v1731_v18, %v1730_v17 }
 0x78b   :  { %v1738_v22 = vsel %vm1284_vm1, %v1733_v20, 0 }
 0x78c   :  { %7296 = vmatpush3.bf16.xpose.msra.mxu1 %v1738_v22 }
 0x78d   :  { %7301 = vmatprep.subr.bf16.mxu1 %v8639_v27 }
 0x793   :  { %7298 = vmatmul.mubr.msk.bf16.vlgmr.msra.gmra.mrb[24].mxu1 %vm1284_vm1, %v1732_v21 }
 0x794   :  { %7302 = vmatpush3.bf16.msra.mxu1 %v8996_v19  ;;  %7303 = vmatprep.mubr.msk.bf16.mxu1 %vm8641_vm0, %v8639_v27 }
 0x795   :  { %7307 = vmatprep.subr.bf16.mxu1 %v8639_v27 }
 0x866   :  { %v1774_v23 = vpop.f32.mrb[24].mxu1 }
 0x867   :  { %v7299_v26 = vpop.f32.mrb[25].mxu1  ;;  %v1781_v30 = vsel %vm1284_vm1, %v1774_v23, -inf }
 0x868   :  { %1782 = vmax.xlane.f32.xlu0 %v1781_v30  ;;  %v1777_v31 = vpop.f32.mrb[26].mxu1 }
 0x869   :  { %v7300_v32 = vpop.f32.mrb[27].mxu1  ;;  %v1784_v33 = vsel %vm1284_vm1, %v1777_v31, -inf }
 0x86a   :  { %1785 = vmax.xlane.f32.xlu1 %v1784_v33 }
 0x8f5   :  { %v1783_v34 = vpop.xlane.xlu0 %1782 }
 0x8f6   :  { %v1787_v35 = vsub.f32 %v1774_v23, %v1783_v34 }
 0x8f7   :  { %v1786_v36 = vpop.xlane.xlu1 %1785 }
 0x8f8   :  { %v1789_v37 = vmul.f32 1.442695, %v1787_v35  ;;  %v1788_v38 = vsub.f32 %v1777_v31, %v1786_v36 }
 0x8fa   :  { %8125 = vpow2.f32 %v1789_v37  ;;  %v1791_v39 = vmul.f32 1.442695, %v1788_v38 }
 0x8fc   :  { %8127 = vpow2.f32 %v1791_v39 }
 0x904   :  { %v8126_v40 = vpop.eup %8125 }
 0x905   :  { %v1793_v41 = vsel %vm1284_vm1, %v8126_v40, 0.0 }
 0x906   :  { %v8128_v42 = vpop.eup %8127  ;;  %1794 = vadd.xlane.f32.xlu0 %v1793_v41 }
 0x907   :  { %v1796_v43 = vsel %vm1284_vm1, %v8128_v42, 0.0 }
 0x908   :  { %1797 = vadd.xlane.f32.xlu1 %v1796_v43 }
 0x919   :  { %1852 = vrot.lane.b32.xlu1 %v1732_v21, %s8642_s21 }
 0x91c   :  { %1855 = vrot.lane.b32.xlu0 %v1733_v20, %s8642_s21 }
 0x91d   :  { %1988 = vrot.lane.b32.xlu1 %v1733_v20, %s8643_s19 }
 0x920   :  { %2120 = vrot.lane.b32.xlu0 %v1733_v20, %s8644_s4 }
 0x921   :  { %1986 = vrot.lane.b32.xlu1 %v1732_v21, %s8643_s19 }
 0x924   :  { %2252 = vrot.lane.b32.xlu0 %v1733_v20, %s8623_s1 }
 0x925   :  { %2118 = vrot.lane.b32.xlu1 %v1732_v21, %s8644_s4 }
 0x928   :  { %2384 = vrot.lane.b32.xlu0 %v1733_v20, %s8645_s28 }
 0x929   :  { %2250 = vrot.lane.b32.xlu1 %v1732_v21, %s8623_s1 }
 0x92c   :  { %2516 = vrot.lane.b32.xlu0 %v1733_v20, %s8646_s23 }
 0x92d   :  { %2382 = vrot.lane.b32.xlu1 %v1732_v21, %s8645_s28 }
 0x930   :  { %2648 = vrot.lane.b32.xlu0 %v1733_v20, %s8630_s3 }
 0x931   :  { %2514 = vrot.lane.b32.xlu1 %v1732_v21, %s8646_s23 }
 0x935   :  { %2646 = vrot.lane.b32.xlu1 %v1732_v21, %s8630_s3 }
 0x993   :  { %v1795_v44 = vpop.xlane.xlu0 %1794 }
 0x994   :  { %8129 = vrcp.f32 %v1795_v44 }
 0x995   :  { %v1798_v45 = vpop.xlane.xlu1 %1797 }
 0x996   :  { %8131 = vrcp.f32 %v1798_v45 }
 0x997   :  { %v1856_v47 = vpop.permute.xlu0 %1855 }
 0x998   :  { %v1861_v57 = vsel %vm1284_vm1, %v1856_v47, 0 }
 0x999   :  { %v1853_v46 = vpop.permute.xlu1 %1852 }
 0x99b   :  { %v2121_v55 = vpop.permute.xlu0 %2120 }
 0x99c   :  { %v2126_v61 = vsel %vm1284_vm1, %v2121_v55, 0 }
 0x99d   :  { %v1989_v48 = vpop.permute.xlu1 %1988 }
 0x99e   :  { %v8130_v49 = vpop.eup %8129  ;;  %v1994_v51 = vsel %vm1284_vm1, %v1989_v48, 0 }
 0x99f   :  { %7320 = vmatpush3.bf16.xpose.msra.mxu0 %v1994_v51  ;;  %v1800_v53 = vmul.f32 %v8130_v49, %v8126_v40  ;;  %v2253_v62 = vpop.permute.xlu0 %2252 }
 0x9a0   :  { %v8132_v52 = vpop.eup %8131  ;;  %7331 = vmatprep.subr.bf16.mxu0 %v8639_v27  ;;  %v2258_v0 = vsel %vm1284_vm1, %v2253_v62, 0 }
 0x9a1   :  { %v1802_v54 = vmul.f32 %v8132_v52, %v8128_v42  ;;  %v1987_v58 = vpop.permute.xlu1 %1986 }
 0x9a3   :  { %v1803_v56 = vpack.c.bf16 %v1802_v54, %v1800_v53  ;;  %v2385_v1 = vpop.permute.xlu0 %2384 }
 0x9a4   :  { %v2390_v3 = vsel %vm1284_vm1, %v2385_v1, 0 }
 0x9a5   :  { %7304 = vmatmul.mubr.msk.bf16.vlgmr.msra.gmra.mrb[28].mxu1 %vm1284_vm1, %v1803_v56  ;;  %v2119_v63 = vpop.permute.xlu1 %2118 }
 0x9a6   :  { %7308 = vmatpush3.bf16.xpose.msra.mxu1 %v1861_v57  ;;  %7322 = vmatmul.mubr.msk.bf16.vlgmr.msra.gmra.mrb[20].mxu0 %vm1284_vm1, %v1987_v58 }
 0x9a7   :  { %7332 = vmatpush3.bf16.xpose.msra.mxu0 %v2126_v61  ;;  %7309 = vmatprep.mubr.msk.bf16.mxu1 %vm8641_vm0, %v8639_v27  ;;  %v2517_v4 = vpop.permute.xlu0 %2516 }
 0x9a8   :  { %7333 = vmatprep.mubr.msk.bf16.mxu0 %vm8641_vm0, %v8639_v27  ;;  %7343 = vmatprep.subr.bf16.mxu0 %v8639_v27  ;;  %v2522_v6 = vsel %vm1284_vm1, %v2517_v4, 0 }
 0x9a9   :  { %7313 = vmatprep.subr.bf16.mxu1 %v8639_v27  ;;  %v2251_v2 = vpop.permute.xlu1 %2250 }
 0x9ab   :  { %v2649_v7 = vpop.permute.xlu0 %2648 }
 0x9ac   :  { %v2654_v9 = vsel %vm1284_vm1, %v2649_v7, 0 }
 0x9ad   :  { %7310 = vmatmul.mubr.msk.bf16.vlgmr.msra.gmra.mrb[32].mxu1 %vm1284_vm1, %v1853_v46  ;;  %v2383_v5 = vpop.permute.xlu1 %2382 }
 0x9ae   :  { %7334 = vmatmul.mubr.msk.bf16.vlgmr.msra.gmra.mrb[24].mxu0 %vm1284_vm1, %v2119_v63  ;;  %7315 = vmatprep.mubr.msk.bf16.mxu1 %vm8641_vm0, %v8639_v27 }
 0x9af   :  { %7344 = vmatpush3.bf16.xpose.msra.mxu0 %v2258_v0  ;;  %7345 = vmatprep.mubr.msk.bf16.mxu0 %vm8641_vm0, %v8639_v27 }
 0x9b0   :  { %7355 = vmatprep.subr.bf16.mxu0 %v8639_v27 }
 0x9b1   :  { %v2515_v8 = vpop.permute.xlu1 %2514 }
 0x9b5   :  { %v2647_v10 = vpop.permute.xlu1 %2646 }
 0x9b6   :  { %7346 = vmatmul.mubr.msk.bf16.vlgmr.msra.gmra.mrb[28].mxu0 %vm1284_vm1, %v2251_v2 }
 0x9b7   :  { %7356 = vmatpush3.bf16.xpose.msra.mxu0 %v2390_v3  ;;  %7357 = vmatprep.mubr.msk.bf16.mxu0 %vm8641_vm0, %v8639_v27 }
 0x9b8   :  { %7367 = vmatprep.subr.bf16.mxu0 %v8639_v27 }
 0x9be   :  { %7358 = vmatmul.mubr.msk.bf16.vlgmr.msra.gmra.mrb[32].mxu0 %vm1284_vm1, %v2383_v5 }
 0x9bf   :  { %7368 = vmatpush3.bf16.xpose.msra.mxu0 %v2522_v6  ;;  %7369 = vmatprep.mubr.msk.bf16.mxu0 %vm8641_vm0, %v8639_v27 }
 0x9c0   :  { %7379 = vmatprep.subr.bf16.mxu0 %v8639_v27 }
 0x9c6   :  { %7370 = vmatmul.mubr.msk.bf16.vlgmr.msra.gmra.mrb[36].mxu0 %vm1284_vm1, %v2515_v8 }
 0x9c7   :  { %7380 = vmatpush3.bf16.xpose.msra.mxu0 %v2654_v9  ;;  %7381 = vmatprep.mubr.msk.bf16.mxu0 %vm8641_vm0, %v8639_v27 }
 0x9c8   :  { %7391 = vmatprep.subr.bf16.mxu0 %v8639_v27 }
 0x9ce   :  { %7382 = vmatmul.mubr.msk.bf16.vlgmr.msra.gmra.mrb[40].mxu0 %vm1284_vm1, %v2647_v10 }
 0x9cf   :  { %7407 = vmatprep.mubr.msk.bf16.mxu0 %vm8641_vm0, %v8639_v27 }
 0xa78   :  { %v1842_v11 = vpop.f32.mrb[28].mxu1 }
 0xa79   :  { %1849 = vst.msk [vmem:[#allocation2] sm:$0xff] %vm1284_vm1, %v1842_v11  ;;  %v7305_v12 = vpop.f32.mrb[29].mxu1  ;;  %v9062_v13 = vpop.f32.mrb[20].mxu0 }
 0xa7a   :  { %v1845_v14 = vpop.f32.mrb[30].mxu1  ;;  %v7323_v15 = vpop.f32.mrb[21].mxu0  ;;  %v2037_v35 = vsel %vm1284_vm1, %v9062_v13, -inf }
 0xa7b   :  { %1850 = vst.msk [vmem:[#allocation2 + $0x8] sm:$0xff] %vm1284_vm1, %v1845_v14  ;;  %v7306_v16 = vpop.f32.mrb[31].mxu1  ;;  %v9065_v17 = vpop.f32.mrb[22].mxu0 }
 0xa7c   :  { %v7324_v18 = vpop.f32.mrb[23].mxu0  ;;  %v2040_v38 = vsel %vm1284_vm1, %v9065_v17, -inf }
 0xa80   :  { %v9067_v20 = vpop.f32.mrb[32].mxu1 }
 0xa81   :  { %v7311_v21 = vpop.f32.mrb[33].mxu1  ;;  %v9069_v22 = vpop.f32.mrb[24].mxu0  ;;  %v1904_v23 = vsel %vm1284_vm1, %v9067_v20, -inf }
 0xa82   :  { %v7335_v26 = vpop.f32.mrb[25].mxu0  ;;  %1905 = vmax.xlane.f32.xlu0 %v1904_v23  ;;  %v9073_v30 = vpop.f32.mrb[34].mxu1  ;;  %v2169_v43 = vsel %vm1284_vm1, %v9069_v22, -inf }
 0xa83   :  { %v7312_v31 = vpop.f32.mrb[35].mxu1  ;;  %v2165_v32 = vpop.f32.mrb[26].mxu0  ;;  %v1907_v33 = vsel %vm1284_vm1, %v9073_v30, -inf }
 0xa84   :  { %v7336_v34 = vpop.f32.mrb[27].mxu0  ;;  %1908 = vmax.xlane.f32.xlu1 %v1907_v33  ;;  %v2172_v36 = vsel %vm1284_vm1, %v2165_v32, -inf }
 0xa86   :  { %2038 = vmax.xlane.f32.xlu0 %v2037_v35 }
 0xa88   :  { %2173 = vmax.xlane.f32.xlu1 %v2172_v36 }
 0xa89   :  { %v9080_v37 = vpop.f32.mrb[28].mxu0 }
 0xa8a   :  { %v7347_v39 = vpop.f32.mrb[29].mxu0  ;;  %2041 = vmax.xlane.f32.xlu0 %v2040_v38  ;;  %v2301_v45 = vsel %vm1284_vm1, %v9080_v37, -inf }
 0xa8b   :  { %v2297_v40 = vpop.f32.mrb[30].mxu0 }
 0xa8c   :  { %v7348_v41 = vpop.f32.mrb[31].mxu0  ;;  %v2304_v42 = vsel %vm1284_vm1, %v2297_v40, -inf }
 0xa8d   :  { %2305 = vmax.xlane.f32.xlu1 %v2304_v42 }
 0xa8e   :  { %2170 = vmax.xlane.f32.xlu0 %v2169_v43 }
 0xa91   :  { %v9087_v44 = vpop.f32.mrb[32].mxu0 }
 0xa92   :  { %v7359_v46 = vpop.f32.mrb[33].mxu0  ;;  %2302 = vmax.xlane.f32.xlu0 %v2301_v45  ;;  %v2433_v51 = vsel %vm1284_vm1, %v9087_v44, -inf }
 0xa93   :  { %v2429_v47 = vpop.f32.mrb[34].mxu0 }
 0xa94   :  { %v7360_v48 = vpop.f32.mrb[35].mxu0  ;;  %v2436_v49 = vsel %vm1284_vm1, %v2429_v47, -inf }
 0xa95   :  { %2437 = vmax.xlane.f32.xlu1 %v2436_v49 }
 0xa96   :  { %2434 = vmax.xlane.f32.xlu0 %v2433_v51 }
 0xa99   :  { %v9094_v52 = vpop.f32.mrb[36].mxu0 }
 0xa9a   :  { %v7371_v53 = vpop.f32.mrb[37].mxu0  ;;  %v2565_v54 = vsel %vm1284_vm1, %v9094_v52, -inf }
 0xa9b   :  { %v9098_v55 = vpop.f32.mrb[38].mxu0  ;;  %2566 = vmax.xlane.f32.xlu0 %v2565_v54 }
 0xa9c   :  { %v7372_v56 = vpop.f32.mrb[39].mxu0  ;;  %v2568_v57 = vsel %vm1284_vm1, %v9098_v55, -inf }
 0xa9d   :  { %2569 = vmax.xlane.f32.xlu1 %v2568_v57 }
 0xaa1   :  { %v9102_v58 = vpop.f32.mrb[40].mxu0 }
 0xaa2   :  { %v7383_v61 = vpop.f32.mrb[41].mxu0  ;;  %v2697_v62 = vsel %vm1284_vm1, %v9102_v58, -inf }
 0xaa3   :  { %v9106_v63 = vpop.f32.mrb[42].mxu0  ;;  %2698 = vmax.xlane.f32.xlu0 %v2697_v62 }
 0xaa4   :  { %v7384_v0 = vpop.f32.mrb[43].mxu0  ;;  %v2700_v1 = vsel %vm1284_vm1, %v9106_v63, -inf }
 0xaa5   :  { %2701 = vmax.xlane.f32.xlu1 %v2700_v1 }
 0xb0f   :  { %v1906_v2 = vpop.xlane.xlu0 %1905 }
 0xb10   :  { %v1910_v21 = vsub.f32 %v9067_v20, %v1906_v2 }
 0xb11   :  { %v1909_v3 = vpop.xlane.xlu1 %1908 }
 0xb13   :  { %v2039_v4 = vpop.xlane.xlu0 %2038 }
 0xb14   :  { %v2043_v5 = vsub.f32 %v9062_v13, %v2039_v4 }
 0xb15   :  { %v2174_v6 = vpop.xlane.xlu1 %2173 }
 0xb16   :  { %v2045_v7 = vmul.f32 1.442695, %v2043_v5  ;;  %v2176_v8 = vsub.f32 %v2165_v32, %v2174_v6 }
 0xb17   :  { %v2042_v9 = vpop.xlane.xlu0 %2041 }
 0xb18   :  { %8133 = vpow2.f32 %v2045_v7  ;;  %v2044_v10 = vsub.f32 %v9065_v17, %v2042_v9  ;;  %v2179_v11 = vmul.f32 1.442695, %v2176_v8  ;;  %v1912_v17 = vmul.f32 1.442695, %v1910_v21 }
 0xb1a   :  { %v2047_v12 = vmul.f32 1.442695, %v2044_v10  ;;  %v2306_v14 = vpop.xlane.xlu1 %2305 }
 0xb1b   :  { %v2308_v15 = vsub.f32 %v2297_v40, %v2306_v14  ;;  %v2171_v16 = vpop.xlane.xlu0 %2170 }
 0xb1c   :  { %8135 = vpow2.f32 %v2047_v12  ;;  %v2175_v18 = vsub.f32 %v9069_v22, %v2171_v16 }
 0xb1d   :  { %8137 = vpow2.f32 %v2179_v11  ;;  %v2311_v23 = vmul.f32 1.442695, %v2308_v15 }
 0xb1e   :  { %v2177_v13 = vmul.f32 1.442695, %v2175_v18 }
 0xb1f   :  { %v2303_v26 = vpop.xlane.xlu0 %2302 }
 0xb20   :  { %8139 = vpow2.f32 %v2177_v13  ;;  %v2307_v31 = vsub.f32 %v9080_v37, %v2303_v26  ;;  %v1911_v37 = vsub.f32 %v9073_v30, %v1909_v3 }
 0xb21   :  { %8141 = vpow2.f32 %v2311_v23 }
 0xb22   :  { %v9115_v32 = vpop.eup %8133  ;;  %v2309_v33 = vmul.f32 1.442695, %v2307_v31  ;;  %v2438_v34 = vpop.xlane.xlu1 %2437  ;;  %v1914_v45 = vmul.f32 1.442695, %v1911_v37 }
 0xb23   :  { %v2440_v35 = vsub.f32 %v2429_v47, %v2438_v34  ;;  %v2435_v36 = vpop.xlane.xlu0 %2434  ;;  %v2049_v22 = vsel %vm1284_vm1, %v9115_v32, 0.0 }
 0xb24   :  { %8143 = vpow2.f32 %v2309_v33  ;;  %v2439_v20 = vsub.f32 %v9087_v44, %v2435_v36  ;;  %2050 = vadd.xlane.f32.xlu0 %v2049_v22 }
 0xb25   :  { %8145 = vpow2.f32 %v1912_v17  ;;  %v2443_v39 = vmul.f32 1.442695, %v2440_v35 }
 0xb26   :  { %v9120_v38 = vpop.eup %8135  ;;  %v2441_v40 = vmul.f32 1.442695, %v2439_v20 }
 0xb27   :  { %v2052_v41 = vsel %vm1284_vm1, %v9120_v38, 0.0  ;;  %v9125_v42 = vpop.eup %8137 }
 0xb28   :  { %8147 = vpow2.f32 %v2441_v40  ;;  %2053 = vadd.xlane.f32.xlu1 %v2052_v41  ;;  %v2184_v46 = vsel %vm1284_vm1, %v9125_v42, 0.0  ;;  %v2567_v1 = vpop.xlane.xlu0 %2566 }
 0xb29   :  { %8149 = vpow2.f32 %v2443_v39  ;;  %v2571_v2 = vsub.f32 %v9094_v52, %v2567_v1 }
 0xb2a   :  { %v9127_v43 = vpop.eup %8139  ;;  %8151 = vpow2.f32 %v1914_v45  ;;  %v2570_v4 = vpop.xlane.xlu1 %2569 }
 0xb2b   :  { %v2181_v44 = vsel %vm1284_vm1, %v9127_v43, 0.0  ;;  %v9133_v30 = vpop.eup %8141  ;;  %v2573_v3 = vmul.f32 1.442695, %v2571_v2  ;;  %v2572_v5 = vsub.f32 %v9098_v55, %v2570_v4 }
 0xb2c   :  { %2182 = vadd.xlane.f32.xlu0 %v2181_v44  ;;  %2185 = vadd.xlane.f32.xlu1 %v2184_v46  ;;  %v2316_v49 = vsel %vm1284_vm1, %v9133_v30, 0.0 }
 0xb2d   :  { %8153 = vpow2.f32 %v2573_v3  ;;  %v2575_v7 = vmul.f32 1.442695, %v2572_v5 }
 0xb2e   :  { %v9135_v47 = vpop.eup %8143 }
 0xb2f   :  { %v2313_v48 = vsel %vm1284_vm1, %v9135_v47, 0.0  ;;  %v9141_v51 = vpop.eup %8145  ;;  %8155 = vpow2.f32 %v2575_v7 }
 0xb30   :  { %2314 = vadd.xlane.f32.xlu0 %v2313_v48  ;;  %2317 = vadd.xlane.f32.xlu1 %v2316_v49  ;;  %v1916_v54 = vsel %vm1284_vm1, %v9141_v51, 0.0  ;;  %v2699_v6 = vpop.xlane.xlu0 %2698 }
 0xb31   :  { %v2703_v8 = vsub.f32 %v9102_v58, %v2699_v6 }
 0xb32   :  { %v9143_v53 = vpop.eup %8147  ;;  %v2702_v9 = vpop.xlane.xlu1 %2701 }
 0xb33   :  { %v2445_v56 = vsel %vm1284_vm1, %v9143_v53, 0.0  ;;  %v9149_v57 = vpop.eup %8149  ;;  %v2705_v10 = vmul.f32 1.442695, %v2703_v8  ;;  %v2704_v11 = vsub.f32 %v9106_v63, %v2702_v9 }
 0xb34   :  { %1917 = vadd.xlane.f32.xlu0 %v1916_v54  ;;  %2446 = vadd.xlane.f32.xlu1 %v2445_v56  ;;  %v2448_v61 = vsel %vm1284_vm1, %v9149_v57, 0.0  ;;  %v8152_v62 = vpop.eup %8151 }
 0xb35   :  { %v1919_v0 = vsel %vm1284_vm1, %v8152_v62, 0.0  ;;  %8157 = vpow2.f32 %v2705_v10  ;;  %v2707_v14 = vmul.f32 1.442695, %v2704_v11 }
 0xb37   :  { %v9162_v12 = vpop.eup %8153  ;;  %8159 = vpow2.f32 %v2707_v14 }
 0xb38   :  { %2449 = vadd.xlane.f32.xlu1 %v2448_v61  ;;  %v2577_v52 = vsel %vm1284_vm1, %v9162_v12, 0.0 }
 0xb39   :  { %v9166_v15 = vpop.eup %8155 }
 0xb3a   :  { %v2580_v55 = vsel %vm1284_vm1, %v9166_v15, 0.0 }
 0xb3c   :  { %1920 = vadd.xlane.f32.xlu1 %v1919_v0 }
 0xb3f   :  { %v9170_v58 = vpop.eup %8157 }
 0xb40   :  { %v2709_v63 = vsel %vm1284_vm1, %v9170_v58, 0.0 }
 0xb41   :  { %v9174_v16 = vpop.eup %8159 }
 0xb42   :  { %v2712_v18 = vsel %vm1284_vm1, %v9174_v16, 0.0 }
 0xb4a   :  { %1928 = vrot.lane.b32.xlu0 %v8996_v19, %s8642_s21 }
 0xb4d   :  { %2060 = vrot.lane.b32.xlu1 %v8996_v19, %s8643_s19 }
 0xb69   :  { %2578 = vadd.xlane.f32.xlu0 %v2577_v52 }
 0xb71   :  { %2581 = vadd.xlane.f32.xlu1 %v2580_v55 }
 0xb75   :  { %2710 = vadd.xlane.f32.xlu1 %v2709_v63 }
 0xb79   :  { %2713 = vadd.xlane.f32.xlu1 %v2712_v18 }
 0xb7f   :  { %2192 = vrot.lane.b32.xlu0 %v8996_v19, %s8644_s4 }
 0xb83   :  { %2456 = vrot.lane.b32.xlu0 %v8996_v19, %s8645_s28 }
 0xb87   :  { %2588 = vrot.lane.b32.xlu0 %v8996_v19, %s8646_s23 }
 0xb8a   :  { %2324 = vrot.lane.b32.xlu1 %v8996_v19, %s8623_s1 }
 0xb8b   :  { %2720 = vrot.lane.b32.xlu0 %v8996_v19, %s8630_s3 }
 0xbb1   :  { %v2051_v21 = vpop.xlane.xlu0 %2050 }
 0xbb5   :  { %v2054_v23 = vpop.xlane.xlu1 %2053 }
 0xbb9   :  { %v2183_v13 = vpop.xlane.xlu0 %2182  ;;  %v2186_v26 = vpop.xlane.xlu1 %2185 }
 0xbbd   :  { %v2315_v31 = vpop.xlane.xlu0 %2314  ;;  %v2318_v17 = vpop.xlane.xlu1 %2317 }
 0xbc1   :  { %v1918_v33 = vpop.xlane.xlu0 %1917  ;;  %v2447_v34 = vpop.xlane.xlu1 %2446 }
 0xbc2   :  { %8161 = vrcp.f32 %v1918_v33 }
 0xbc5   :  { %v1929_v35 = vpop.permute.xlu0 %1928  ;;  %v2450_v36 = vpop.xlane.xlu1 %2449 }
 0xbc6   :  { %7314 = vmatpush3.bf16.msra.mxu1 %v1929_v35 }
 0xbc7   :  { %7325 = vmatprep.subr.bf16.mxu1 %v8639_v27 }
 0xbc9   :  { %v1921_v22 = vpop.xlane.xlu1 %1920 }
 0xbca   :  { %8163 = vrcp.f32 %v1921_v22 }
 0xbcb   :  { %8165 = vrcp.f32 %v2054_v23 }
 0xbcc   :  { %8167 = vrcp.f32 %v2051_v21  ;;  %v8162_v20 = vpop.eup %8161 }
 0xbcd   :  { %v1923_v37 = vmul.f32 %v8162_v20, %v9141_v51  ;;  %v2061_v45 = vpop.permute.xlu1 %2060  ;;  %8169 = vrcp.f32 %v2183_v13 }
 0xbce   :  { %8171 = vrcp.f32 %v2186_v26 }
 0xbcf   :  { %8173 = vrcp.f32 %v2315_v31 }
 0xbd0   :  { %8175 = vrcp.f32 %v2318_v17 }
 0xbd1   :  { %8177 = vrcp.f32 %v2450_v36 }
 0xbd2   :  { %8179 = vrcp.f32 %v2447_v34 }
 0xbd4   :  { %v8164_v19 = vpop.eup %8163 }
 0xbd5   :  { %v1925_v39 = vmul.f32 %v8164_v19, %v8152_v62  ;;  %v8166_v41 = vpop.eup %8165  ;;  %v7885_v19 = vld [vmem:[#allocation12] sm:$0xff]  }
 0xbd6   :  { %v8168_v44 = vpop.eup %8167  ;;  %v2058_v46 = vmul.f32 %v8166_v41, %v9120_v38  ;;  %7392 = vmatpush3.bf16.msra.mxu0 %v7885_v19  ;;  %v7899_v19 = vld [vmem:[#allocation13 + $0x20] ss:$16 sps:$4 sm:$0xff]  }
 0xbd7   :  { %v1926_v40 = vpack.c.bf16 %v1925_v39, %v1923_v37  ;;  %v2056_v48 = vmul.f32 %v8168_v44, %v9115_v32  ;;  %v8170_v51 = vpop.eup %8169  ;;  %7393 = vmatprep.subr.bf16.mxu0 %v8639_v27  ;;  %v7886_v37 = vld [vmem:[#allocation12 + $0x8] sm:$0xff]   ;;  %v7887_v39 = vld [vmem:[#allocation12 + $0x10] sm:$0xff]  }
 0xbd8   :  { %v8172_v54 = vpop.eup %8171  ;;  %v2188_v61 = vmul.f32 %v8170_v51, %v9127_v43 }
 0xbd9   :  { %7316 = vmatmul.mubr.msk.bf16.vlgmr.msra.gmra.mrb[36].mxu1 %vm1284_vm1, %v1926_v40  ;;  %v2059_v49 = vpack.c.bf16 %v2058_v46, %v2056_v48  ;;  %v2190_v62 = vmul.f32 %v8172_v54, %v9125_v42  ;;  %v8174_v2 = vpop.eup %8173  ;;  %v7888_v46 = vld [vmem:[#allocation12 + $0x18] sm:$0xff]   ;;  %v7889_v48 = vld [vmem:[#allocation12 + $0x20] sm:$0xff]  }
 0xbda   :  { %7326 = vmatpush3.bf16.msra.mxu1 %v2061_v45  ;;  %7327 = vmatprep.mubr.msk.bf16.mxu1 %vm8641_vm0, %v8639_v27  ;;  %v8176_v3 = vpop.eup %8175  ;;  %v2320_v42 = vmul.f32 %v8174_v2, %v9135_v47 }
 0xbdb   :  { %7337 = vmatprep.subr.bf16.mxu1 %v8639_v27  ;;  %v2191_v32 = vpack.c.bf16 %v2190_v62, %v2188_v61  ;;  %v2322_v4 = vmul.f32 %v8176_v3, %v9133_v30  ;;  %v8178_v7 = vpop.eup %8177  ;;  %7394 = vmatpush3.bf16.msra.mxu0 %v7886_v37  ;;  %v7890_v61 = vld [vmem:[#allocation12 + $0x28] sm:$0xff]   ;;  %v7891_v62 = vld [vmem:[#allocation12 + $0x30] sm:$0xff]  }
 0xbdc   :  { %v8180_v9 = vpop.eup %8179  ;;  %v2454_v47 = vmul.f32 %v8178_v7, %v9149_v57  ;;  %7395 = vmatprep.subr.bf16.mxu0 %v8639_v27  ;;  %v7902_v37 = vld [vmem:[#allocation13 + $0x28] ss:$16 sps:$4 sm:$0xff]  }
 0xbdd   :  { %v2323_v6 = vpack.c.bf16 %v2322_v4, %v2320_v42  ;;  %v2452_v30 = vmul.f32 %v8180_v9, %v9143_v53 }
 0xbdf   :  { %v2455_v10 = vpack.c.bf16 %v2454_v47, %v2452_v30  ;;  %7396 = vmatpush3.bf16.msra.mxu0 %v7887_v39 }
 0xbe0   :  { %7397 = vmatprep.subr.bf16.mxu0 %v8639_v27 }
 0xbe1   :  { %7328 = vmatmul.mubr.msk.bf16.vlgmr.msra.gmra.mrb[40].mxu1 %vm1284_vm1, %v2059_v49 }
 0xbe2   :  { %7339 = vmatprep.mubr.msk.bf16.mxu1 %vm8641_vm0, %v8639_v27 }
 0xbe3   :  { %7398 = vmatpush3.bf16.msra.mxu0 %v7888_v46 }
 0xbe4   :  { %7399 = vmatprep.subr.bf16.mxu0 %v8639_v27 }
 0xbe7   :  { %7400 = vmatpush3.bf16.msra.mxu0 %v7889_v48  ;;  %v7907_v48 = vld [vmem:[#allocation13 + $0x44] ss:$16 sps:$4 sm:$0xff]  }
 0xbe8   :  { %7401 = vmatprep.subr.bf16.mxu0 %v8639_v27 }
 0xbeb   :  { %7402 = vmatpush3.bf16.msra.mxu0 %v7890_v61  ;;  %v7916_v61 = vld [vmem:[#allocation13 + $0x6c] ss:$16 sps:$4 sm:$0xff]  }
 0xbec   :  { %7403 = vmatprep.subr.bf16.mxu0 %v8639_v27 }
 0xbef   :  { %7404 = vmatpush3.bf16.msra.mxu0 %v7891_v62  ;;  %v7911_v62 = vld [vmem:[#allocation13 + $0x60] ss:$16 sps:$4 sm:$0xff]  }
 0xbf0   :  { %7405 = vmatprep.subr.bf16.mxu0 %v8639_v27 }
 0xbf6   :  { %v2579_v56 = vpop.xlane.xlu0 %2578 }
 0xbfa   :  { %v2193_v38 = vpop.permute.xlu0 %2192 }
 0xbfb   :  { %7338 = vmatpush3.bf16.msra.mxu1 %v2193_v38 }
 0xbfc   :  { %7349 = vmatprep.subr.bf16.mxu1 %v8639_v27 }
 0xbfe   :  { %7340 = vmatmul.mubr.msk.bf16.vlgmr.msra.gmra.mrb[44].mxu1 %vm1284_vm1, %v2191_v32  ;;  %v2582_v0 = vpop.xlane.xlu1 %2581  ;;  %v2457_v8 = vpop.permute.xlu0 %2456 }
 0xbff   :  { %7351 = vmatprep.mubr.msk.bf16.mxu1 %vm8641_vm0, %v8639_v27  ;;  %8181 = vrcp.f32 %v2582_v0 }
 0xc00   :  { %8183 = vrcp.f32 %v2579_v56 }
 0xc02   :  { %v2711_v1 = vpop.xlane.xlu1 %2710  ;;  %v2589_v14 = vpop.permute.xlu0 %2588 }
 0xc06   :  { %v2714_v43 = vpop.xlane.xlu1 %2713  ;;  %v2721_v18 = vpop.permute.xlu0 %2720 }
 0xc07   :  { %8185 = vrcp.f32 %v2714_v43 }
 0xc08   :  { %8187 = vrcp.f32 %v2711_v1  ;;  %v7892_v1 = vld [vmem:[#allocation12 + $0x38] sm:$0xff]  }
 0xc09   :  { %v8182_v11 = vpop.eup %8181  ;;  %7406 = vmatpush3.bf16.msra.mxu0 %v7892_v1  ;;  %v7917_v1 = vld [vmem:[#allocation13 + $0x80] ss:$16 sps:$4 sm:$0xff]  }
 0xc0a   :  { %v2325_v5 = vpop.permute.xlu1 %2324  ;;  %v8184_v52 = vpop.eup %8183  ;;  %v2586_v55 = vmul.f32 %v8182_v11, %v9166_v15 }
 0xc0b   :  { %7350 = vmatpush3.bf16.msra.mxu1 %v2325_v5  ;;  %v2584_v57 = vmul.f32 %v8184_v52, %v9162_v12 }
 0xc0c   :  { %7361 = vmatprep.subr.bf16.mxu1 %v8639_v27 }
 0xc0d   :  { %v2587_v63 = vpack.c.bf16 %v2586_v55, %v2584_v57 }
 0xc0e   :  { %7352 = vmatmul.mubr.msk.bf16.vlgmr.msra.gmra.mrb[48].mxu1 %vm1284_vm1, %v2323_v6 }
 0xc0f   :  { %7362 = vmatpush3.bf16.msra.mxu1 %v2457_v8  ;;  %7363 = vmatprep.mubr.msk.bf16.mxu1 %vm8641_vm0, %v8639_v27 }
 0xc10   :  { %7373 = vmatprep.subr.bf16.mxu1 %v8639_v27 }
 0xc11   :  { %v8186_v53 = vpop.eup %8185 }
 0xc12   :  { %v8188_v21 = vpop.eup %8187  ;;  %v2718_v23 = vmul.f32 %v8186_v53, %v9174_v16 }
 0xc13   :  { %v2716_v13 = vmul.f32 %v8188_v21, %v9170_v58 }
 0xc15   :  { %v2719_v26 = vpack.c.bf16 %v2718_v23, %v2716_v13  ;;  %v6642_v23 = vld [vmem:[%s9730_s27] ss:$0 sm:$0xff] }
 0xc16   :  { %7364 = vmatmul.mubr.msk.bf16.vlgmr.msra.gmra.mrb[52].mxu1 %vm1284_vm1, %v2455_v10 }
 0xc17   :  { %7374 = vmatpush3.bf16.msra.mxu1 %v2589_v14  ;;  %7375 = vmatprep.mubr.msk.bf16.mxu1 %vm8641_vm0, %v8639_v27 }
 0xc18   :  { %7385 = vmatprep.subr.bf16.mxu1 %v8639_v27 }
 0xc1e   :  { %7376 = vmatmul.mubr.msk.bf16.vlgmr.msra.gmra.mrb[56].mxu1 %vm1284_vm1, %v2587_v63 }
 0xc1f   :  { %7386 = vmatpush3.bf16.msra.mxu1 %v2721_v18  ;;  %7387 = vmatprep.mubr.msk.bf16.mxu1 %vm8641_vm0, %v8639_v27 }
 0xc26   :  { %7388 = vmatmul.mubr.msk.bf16.vlgmr.msra.gmra.mrb[60].mxu1 %vm1284_vm1, %v2719_v26 }
 0xc27   :  { %3183 = vmatprep.mubr.bf16.mxu1 %v8640_v50 }
 0xcac   :  { %v1968_v12 = vpop.f32.mrb[36].mxu1 }
 0xcad   :  { %1977 = vrot.lane.b32.xlu1 %v1968_v12, %s8630_s3  ;;  %v7317_v15 = vpop.f32.mrb[37].mxu1 }
 0xcae   :  { %v1971_v31 = vpop.f32.mrb[38].mxu1 }
 0xcaf   :  { %1979 = vrot.lane.b32.xlu0 %v1971_v31, %s8630_s3  ;;  %v7318_v17 = vpop.f32.mrb[39].mxu1 }
 0xcb4   :  { %v2100_v33 = vpop.f32.mrb[40].mxu1 }
 0xcb5   :  { %2109 = vrot.lane.b32.xlu1 %v2100_v33, %s8646_s23  ;;  %v7329_v34 = vpop.f32.mrb[41].mxu1 }
 0xcb6   :  { %v2103_v16 = vpop.f32.mrb[42].mxu1 }
 0xcb7   :  { %2111 = vrot.lane.b32.xlu0 %v2103_v16, %s8646_s23  ;;  %v7330_v58 = vpop.f32.mrb[43].mxu1  ;;  %v7893_v16 = vld [vmem:[#allocation13] ss:$16 sps:$4 sm:$0xff]  }
 0xcb8   :  { %v7895_v58 = vld [vmem:[#allocation13 + $0x4] ss:$16 sps:$4 sm:$0xff]  }
 0xcb9   :  { %3151 = vmatprep.subr.bf16.mxu1 %v7895_v58  ;;  %v7944_v58 = vld [vmem:[#allocation15 + $0x80] sm:$0xff]  }
 0xcba   :  { %3152 = vmatpush1.bf16.msra.mxu1 %v7893_v16  ;;  %v7943_v16 = vld [vmem:[#allocation15] sm:$0xff]  }
 0xcd1   :  { %v2232_v35 = vpop.f32.mrb[44].mxu1 }
 0xcd2   :  { %2241 = vrot.lane.b32.xlu1 %v2232_v35, %s8645_s28  ;;  %v7341_v36 = vpop.f32.mrb[45].mxu1  ;;  %v7896_v35 = vld [vmem:[#allocation13 + $0x8] ss:$16 sps:$4 sm:$0xff]  }
 0xcd3   :  { %v2235_v22 = vpop.f32.mrb[46].mxu1  ;;  %v7898_v36 = vld [vmem:[#allocation13 + $0xc] ss:$16 sps:$4 sm:$0xff]  }
 0xcd4   :  { %2243 = vrot.lane.b32.xlu0 %v2235_v22, %s8645_s28  ;;  %v7342_v20 = vpop.f32.mrb[47].mxu1  ;;  %v7901_v22 = vld [vmem:[#allocation13 + $0x24] ss:$16 sps:$4 sm:$0xff]   ;;  %3194 = vmatprep.subr.bf16.mxu0 %v7898_v36  ;;  %v7945_v36 = vld [vmem:[#allocation15 + $0x48] sm:$0xff]  }
 0xcd5   :  { %v7904_v20 = vld [vmem:[#allocation13 + $0x2c] ss:$16 sps:$4 sm:$0xff]   ;;  %3153 = vmatprep.subr.bf16.mxu1 %v7901_v22 }
 0xcd6   :  { %3154 = vmatpush1.bf16.msra.mxu1 %v7899_v19  ;;  %v7946_v22 = vld [vmem:[#allocation15 + $0xc8] sm:$0xff]  }
 0xcd7   :  { %3155 = vmatprep.subr.bf16.mxu1 %v7907_v48  ;;  %v7948_v19 = vld [vmem:[#allocation15 + $0x88] sm:$0xff]   ;;  %v7958_v48 = vld [vmem:[#allocation15 + $0xe0] sm:$0xff]  }
 0xce1   :  { %v2364_v40 = vpop.f32.mrb[48].mxu1 }
 0xce2   :  { %2373 = vrot.lane.b32.xlu1 %v2364_v40, %s8623_s1  ;;  %v7353_v41 = vpop.f32.mrb[49].mxu1 }
 0xce3   :  { %v2367_v45 = vpop.f32.mrb[50].mxu1 }
 0xce4   :  { %2375 = vrot.lane.b32.xlu0 %v2367_v45, %s8623_s1  ;;  %v7354_v44 = vpop.f32.mrb[51].mxu1 }
 0xce9   :  { %v2496_v49 = vpop.f32.mrb[52].mxu1 }
 0xcea   :  { %2505 = vrot.lane.b32.xlu1 %v2496_v49, %s8644_s4  ;;  %v7365_v51 = vpop.f32.mrb[53].mxu1  ;;  %v7910_v49 = vld [vmem:[#allocation13 + $0x4c] ss:$16 sps:$4 sm:$0xff]  }
 0xceb   :  { %v2499_v54 = vpop.f32.mrb[54].mxu1  ;;  %v7905_v51 = vld [vmem:[#allocation13 + $0x40] ss:$16 sps:$4 sm:$0xff]  }
 0xcec   :  { %2507 = vrot.lane.b32.xlu0 %v2499_v54, %s8644_s4  ;;  %v7366_v56 = vpop.f32.mrb[55].mxu1  ;;  %v7908_v54 = vld [vmem:[#allocation13 + $0x48] ss:$16 sps:$4 sm:$0xff]   ;;  %3156 = vmatpush1.bf16.msra.mxu1 %v7905_v51  ;;  %v7960_v51 = vld [vmem:[#allocation15 + $0xa0] sm:$0xff]  }
 0xced   :  { %v7913_v56 = vld [vmem:[#allocation13 + $0x64] ss:$16 sps:$4 sm:$0xff]  }
 0xcee   :  { %3157 = vmatprep.subr.bf16.mxu1 %v7913_v56  ;;  %v7962_v56 = vld [vmem:[#allocation15 + $0xe8] sm:$0xff]  }
 0xcf0   :  { %3158 = vmatpush1.bf16.msra.mxu1 %v7911_v62  ;;  %v7964_v62 = vld [vmem:[#allocation15 + $0xa8] sm:$0xff]  }
 0xcf1   :  { %v2628_v38 = vpop.f32.mrb[56].mxu1 }
 0xcf2   :  { %2637 = vrot.lane.b32.xlu1 %v2628_v38, %s8643_s19  ;;  %v7377_v32 = vpop.f32.mrb[57].mxu1  ;;  %v7914_v38 = vld [vmem:[#allocation13 + $0x68] ss:$16 sps:$4 sm:$0xff]  }
 0xcf3   :  { %v2631_v0 = vpop.f32.mrb[58].mxu1  ;;  %v7919_v32 = vld [vmem:[#allocation13 + $0x84] ss:$16 sps:$4 sm:$0xff]  }
 0xcf4   :  { %2639 = vrot.lane.b32.xlu0 %v2631_v0, %s8643_s19  ;;  %v7378_v2 = vpop.f32.mrb[59].mxu1  ;;  %v7922_v0 = vld [vmem:[#allocation13 + $0x8c] ss:$16 sps:$4 sm:$0xff]   ;;  %3159 = vmatprep.subr.bf16.mxu1 %v7919_v32  ;;  %v7966_v32 = vld [vmem:[#allocation15 + $0xf0] sm:$0xff]  }
 0xcf5   :  { %v7920_v2 = vld [vmem:[#allocation13 + $0x88] ss:$16 sps:$4 sm:$0xff]   ;;  %3160 = vmatpush1.bf16.msra.mxu1 %v7917_v1  ;;  %v7968_v1 = vld [vmem:[#allocation15 + $0xb0] sm:$0xff]  }
 0xcf9   :  { %v2760_v3 = vpop.f32.mrb[60].mxu1 }
 0xcfa   :  { %2769 = vrot.lane.b32.xlu1 %v2760_v3, %s8642_s21  ;;  %v7389_v43 = vpop.f32.mrb[61].mxu1  ;;  %v7925_v3 = vld [vmem:[#allocation13 + $0xa4] ss:$16 sps:$4 sm:$0xff]  }
 0xcfb   :  { %v2763_v42 = vpop.f32.mrb[62].mxu1  ;;  %v7928_v43 = vld [vmem:[#allocation13 + $0xac] ss:$16 sps:$4 sm:$0xff]   ;;  %3161 = vmatprep.subr.bf16.mxu1 %v7925_v3 }
 0xcfc   :  { %2771 = vrot.lane.b32.xlu0 %v2763_v42, %s8642_s21  ;;  %v7390_v4 = vpop.f32.mrb[63].mxu1  ;;  %v7923_v42 = vld [vmem:[#allocation13 + $0xa0] ss:$16 sps:$4 sm:$0xff]   ;;  %v7970_v3 = vld [vmem:[#allocation15 + $0xf8] sm:$0xff]  }
 0xcfd   :  { %v7926_v4 = vld [vmem:[#allocation13 + $0xa8] ss:$16 sps:$4 sm:$0xff]   ;;  %3162 = vmatpush1.bf16.msra.mxu1 %v7923_v42 }
 0xcfe   :  { %v7972_v42 = vld [vmem:[#allocation15 + $0xb8] sm:$0xff]  }
 0xd1f   :  { %v1978_v5 = vpop.permute.xlu1 %1977 }
 0xd20   :  { %1984 = vst.msk [vmem:[#allocation2] sm:$0xff] %vm1983_vm2, %v1978_v5  ;;  %v7931_v5 = vld [vmem:[#allocation13 + $0xc4] ss:$16 sps:$4 sm:$0xff]  }
 0xd21   :  { %v1980_v6 = vpop.permute.xlu0 %1979  ;;  %3163 = vmatprep.subr.bf16.mxu1 %v7931_v5  ;;  %v2985_v5 = vsub.s32 3, %v8936_v24 }
 0xd22   :  { %1985 = vst.msk [vmem:[#allocation2 + $0x8] sm:$0xff] %vm1983_vm2, %v1980_v6  ;;  %v7934_v6 = vld [vmem:[#allocation13 + $0xcc] ss:$16 sps:$4 sm:$0xff]  }
 0xd27   :  { %v2110_v7 = vpop.permute.xlu1 %2109 }
 0xd28   :  { %2116 = vst.msk [vmem:[#allocation2] sm:$0xff] %vm2115_vm3, %v2110_v7  ;;  %v7929_v7 = vld [vmem:[#allocation13 + $0xc0] ss:$16 sps:$4 sm:$0xff]  }
 0xd29   :  { %v2112_v8 = vpop.permute.xlu0 %2111  ;;  %3164 = vmatpush1.bf16.msra.mxu1 %v7929_v7 }
 0xd2a   :  { %2117 = vst.msk [vmem:[#allocation2 + $0x8] sm:$0xff] %vm2115_vm3, %v2112_v8  ;;  %v7932_v8 = vld [vmem:[#allocation13 + $0xc8] ss:$16 sps:$4 sm:$0xff]  }
 0xd44   :  { %v2242_v9 = vpop.permute.xlu1 %2241 }
 0xd45   :  { %2248 = vst.msk [vmem:[#allocation2] sm:$0xff] %vm2247_vm4, %v2242_v9  ;;  %v7937_v9 = vld [vmem:[#allocation13 + $0xe4] ss:$16 sps:$4 sm:$0xff]  }
 0xd46   :  { %v2244_v47 = vpop.permute.xlu0 %2243  ;;  %3165 = vmatprep.subr.bf16.mxu1 %v7937_v9 }
 0xd47   :  { %2249 = vst.msk [vmem:[#allocation2 + $0x8] sm:$0xff] %vm2247_vm4, %v2244_v47  ;;  %v7940_v47 = vld [vmem:[#allocation13 + $0xec] ss:$16 sps:$4 sm:$0xff]  }
 0xd54   :  { %v2374_v30 = vpop.permute.xlu1 %2373 }
 0xd55   :  { %2380 = vst.msk [vmem:[#allocation2] sm:$0xff] %vm2379_vm5, %v2374_v30  ;;  %v7935_v30 = vld [vmem:[#allocation13 + $0xe0] ss:$16 sps:$4 sm:$0xff]  }
 0xd56   :  { %v2376_v10 = vpop.permute.xlu0 %2375  ;;  %3166 = vmatpush1.bf16.msra.mxu1 %v7935_v30 }
 0xd57   :  { %2381 = vst.msk [vmem:[#allocation2 + $0x8] sm:$0xff] %vm2379_vm5, %v2376_v10  ;;  %v7938_v10 = vld [vmem:[#allocation13 + $0xe8] ss:$16 sps:$4 sm:$0xff]  }
 0xd5c   :  { %v2506_v11 = vpop.permute.xlu1 %2505 }
 0xd5d   :  { %2512 = vst.msk [vmem:[#allocation2] sm:$0xff] %vm2511_vm6, %v2506_v11  ;;  %v7941_v11 = vld [vmem:[#allocation15 + $0x40] sm:$0xff]  }
 0xd5e   :  { %v2508_v14 = vpop.permute.xlu0 %2507  ;;  %7035 = vmatprep.subr.bf16.mxu1 %v7941_v11 }
 0xd5f   :  { %2513 = vst.msk [vmem:[#allocation2 + $0x8] sm:$0xff] %vm2511_vm6, %v2508_v14  ;;  %v7942_v14 = vld [vmem:[#allocation15 + $0xc0] sm:$0xff]  }
 0xd64   :  { %v2638_v52 = vpop.permute.xlu1 %2637 }
 0xd65   :  { %2644 = vst.msk [vmem:[#allocation2] sm:$0xff] %vm2643_vm7, %v2638_v52 }
 0xd66   :  { %v2640_v55 = vpop.permute.xlu0 %2639 }
 0xd67   :  { %2645 = vst.msk [vmem:[#allocation2 + $0x8] sm:$0xff] %vm2643_vm7, %v2640_v55 }
 0xd6c   :  { %v2770_v57 = vpop.permute.xlu1 %2769 }
 0xd6d   :  { %2776 = vst.msk [vmem:[#allocation2] sm:$0xff] %vm2775_vm8, %v2770_v57 }
 0xd6e   :  { %v2772_v63 = vpop.permute.xlu0 %2771 }
 0xd6f   :  { %2777 = vst.msk [vmem:[#allocation2 + $0x8] sm:$0xff] %vm2775_vm8, %v2772_v63 }
 0xd74   :  { %v2778_v53 = vld [vmem:[#allocation2] sm:$0xff] }
 0xd76   :  { %v2779_v18 = vld [vmem:[#allocation2 + $0x8] sm:$0xff] }
 0xd77   :  { %v2796_v21 = vpack.c.bf16 %v2779_v18, %v2778_v53 }
 0xd79   :  { %7408 = vmatmul.mubr.bf16.vlgmr.msra.gmra.mrb[44].mxu0 %v2796_v21 }
 0xd7a   :  { %3226 = vmatprep.mubr.bf16.mxu0 %v8640_v50  ;;  %3195 = vmatpush1.bf16.msra.mxu0 %v7896_v35 }
 0xd7b   :  { %3196 = vmatprep.subr.bf16.mxu0 %v7904_v20  ;;  %v7947_v20 = vld [vmem:[#allocation15 + $0x8] sm:$0xff]  }
 0xd7e   :  { %3197 = vmatpush1.bf16.msra.mxu0 %v7902_v37  ;;  %v7949_v37 = vld [vmem:[#allocation15 + $0x50] sm:$0xff]  }
 0xd7f   :  { %3198 = vmatprep.subr.bf16.mxu0 %v7910_v49  ;;  %v7959_v49 = vld [vmem:[#allocation15 + $0x20] sm:$0xff]  }
 0xd82   :  { %3199 = vmatpush1.bf16.msra.mxu0 %v7908_v54  ;;  %v7961_v54 = vld [vmem:[#allocation15 + $0x68] sm:$0xff]  }
 0xd83   :  { %3200 = vmatprep.subr.bf16.mxu0 %v7916_v61  ;;  %v7963_v61 = vld [vmem:[#allocation15 + $0x28] sm:$0xff]  }
 0xd86   :  { %3201 = vmatpush1.bf16.msra.mxu0 %v7914_v38  ;;  %v7965_v38 = vld [vmem:[#allocation15 + $0x70] sm:$0xff]  }
 0xd87   :  { %3202 = vmatprep.subr.bf16.mxu0 %v7922_v0  ;;  %v7967_v0 = vld [vmem:[#allocation15 + $0x30] sm:$0xff]  }
 0xd8a   :  { %3203 = vmatpush1.bf16.msra.mxu0 %v7920_v2  ;;  %v7969_v2 = vld [vmem:[#allocation15 + $0x78] sm:$0xff]  }
 0xd8b   :  { %3204 = vmatprep.subr.bf16.mxu0 %v7928_v43  ;;  %v7971_v43 = vld [vmem:[#allocation15 + $0x38] sm:$0xff]  }
 0xd8e   :  { %3205 = vmatpush1.bf16.msra.mxu0 %v7926_v4  ;;  %v2969_v4 = vld [vmem:[%s9733_s5] sm:$0xf] }
 0xd8f   :  { %3206 = vmatprep.subr.bf16.mxu0 %v7934_v6  ;;  %v2974_v6 = vrot.slane %v2969_v4, %v8939_v25  ;;  %v2982_v7 = vrot.slane %v2969_v4, %v8943_v28  ;;  %v2986_v9 = vrot.slane %v2969_v4, %v2985_v5 }
 0xd92   :  { %3207 = vmatpush1.bf16.msra.mxu0 %v7932_v8  ;;  %v2978_v8 = vrot.slane %v2969_v4, %v8946_v29  ;;  %v7979_v4 = vld [vmem:[#allocation10 + $0xdc] ss:$12 sps:$4 sm:$0xff]  }
 0xd93   :  { %3208 = vmatprep.subr.bf16.mxu0 %v7940_v47 }
 0xd96   :  { %3209 = vmatpush1.bf16.msra.mxu0 %v7938_v10 }
 0xd97   :  { %7057 = vmatprep.subr.bf16.mxu0 %v7942_v14 }
 0xe4c   :  { %v2886_v13 = vpop.f32.mrb[44].mxu0 }
 0xe4d   :  { %v2887_v26 = vadd.f32 %v6642_v23, %v2886_v13  ;;  %v7409_v12 = vpop.f32.mrb[45].mxu0  ;;  %v6651_v13 = vld [vmem:[%s9731_s26] ss:$0 sm:$0xff] }
 0xe4e   :  { %v2889_v15 = vpop.f32.mrb[46].mxu0 }
 0xe4f   :  { %v2890_v31 = vadd.f32 %v6642_v23, %v2889_v15  ;;  %v7410_v17 = vpop.f32.mrb[47].mxu0  ;;  %v2893_v33 = vadd.f32 %v2887_v26, %v8982_v59 }
 0xe51   :  { %2897 = vadd.xlane.f32.xlu1 %v2893_v33  ;;  %v2894_v34 = vadd.f32 %v2890_v31, %v8984_v60  ;;  %v6652_v31 = vld [vmem:[%s9732_s0] ss:$0 sm:$0xff] }
 0xe53   :  { %2899 = vadd.xlane.f32.xlu0 %v2894_v34 }
 0xede   :  { %v2898_v59 = vpop.xlane.xlu1 %2897 }
 0xedf   :  { %v2902_v39 = vmul.f32 0.0078125, %v2898_v59  ;;  %v7950_v59 = vld [vmem:[#allocation15 + $0xd0] sm:$0xff]  }
 0xee0   :  { %v2900_v60 = vpop.xlane.xlu0 %2899 }
 0xee1   :  { %v9266_v40 = vsub.f32 %v2893_v33, %v2902_v39  ;;  %v2903_v41 = vmul.f32 0.0078125, %v2900_v60  ;;  %v7951_v39 = vld [vmem:[#allocation15 + $0x10] sm:$0xff]  }
 0xee2   :  { %v7952_v60 = vld [vmem:[#allocation15 + $0x90] sm:$0xff]  }
 0xee3   :  { %v9268_v45 = vsub.f32 %v2894_v34, %v2903_v41  ;;  %v2906_v44 = vmul.f32 %v9266_v40, %v9266_v40  ;;  %v7954_v41 = vld [vmem:[#allocation15 + $0xd8] sm:$0xff]  }
 0xee5   :  { %2908 = vadd.xlane.f32.xlu0 %v2906_v44  ;;  %v2907_v46 = vmul.f32 %v9268_v45, %v9268_v45  ;;  %v7956_v44 = vld [vmem:[#allocation15 + $0x98] sm:$0xff]  }
 0xee9   :  { %2910 = vadd.xlane.f32.xlu0 %v2907_v46  ;;  %v7957_v46 = vld [vmem:[#allocation15 + $0x60] sm:$0xff]  }
 0xf72   :  { %v2909_v52 = vpop.xlane.xlu0 %2908 }
 0xf73   :  { %v2912_v55 = vmul.f32 0.0078125, %v2909_v52 }
 0xf75   :  { %v2914_v57 = vadd.f32 1e-05, %v2912_v55 }
 0xf76   :  { %v2911_v63 = vpop.xlane.xlu0 %2910 }
 0xf77   :  { %8189 = vrsqrt.f32 %v2914_v57  ;;  %v2913_v53 = vmul.f32 0.0078125, %v2911_v63 }
 0xf79   :  { %v2915_v18 = vadd.f32 1e-05, %v2913_v53 }
 0xf7b   :  { %8191 = vrsqrt.f32 %v2915_v18 }
 0xf81   :  { %v8190_v21 = vpop.eup %8189 }
 0xf82   :  { %v2918_v23 = vmul.f32 %v8190_v21, %v9266_v40  ;;  %v7953_v40 = vld [vmem:[#allocation15 + $0x58] sm:$0xff]  }
 0xf84   :  { %v2926_v15 = vmul.f32 %v6651_v13, %v2918_v23 }
 0xf85   :  { %v8192_v26 = vpop.eup %8191 }
 0xf86   :  { %v2919_v12 = vmul.f32 %v8192_v26, %v9268_v45  ;;  %v9278_v33 = vadd.f32 %v6652_v31, %v2926_v15  ;;  %v7955_v45 = vld [vmem:[#allocation15 + $0x18] sm:$0xff]  }
 0xf88   :  { %v2927_v17 = vmul.f32 %v6651_v13, %v2919_v12 }
 0xf8a   :  { %v9280_v34 = vadd.f32 %v6652_v31, %v2927_v17 }
 0xf8c   :  { %v2968_v35 = vpack.c.bf16 %v9280_v34, %v9278_v33 }
 0xf8e   :  { %3184 = vmatmul.mubr.bf16.vlgmr.msra.gmra.mrb[64].mxu1 %v2968_v35  ;;  %3227 = vmatmul.mubr.bf16.vlgmr.msra.gmra.mrb[48].mxu0 %v2968_v35 }
 0xf8f   :  { %7036 = vmatpush3.bf16.msra.mxu1 %v7943_v16  ;;  %7058 = vmatpush3.bf16.msra.mxu0 %v7944_v58 }
 0xf90   :  { %7037 = vmatprep.subr.bf16.mxu1 %v7945_v36  ;;  %7059 = vmatprep.subr.bf16.mxu0 %v7946_v22 }
 0xf93   :  { %7038 = vmatpush3.bf16.msra.mxu1 %v7947_v20  ;;  %7060 = vmatpush3.bf16.msra.mxu0 %v7948_v19 }
 0xf94   :  { %7039 = vmatprep.subr.bf16.mxu1 %v7949_v37  ;;  %7061 = vmatprep.subr.bf16.mxu0 %v7950_v59 }
 0xf97   :  { %7040 = vmatpush3.bf16.msra.mxu1 %v7951_v39  ;;  %7062 = vmatpush3.bf16.msra.mxu0 %v7952_v60 }
 0xf98   :  { %7041 = vmatprep.subr.bf16.mxu1 %v7953_v40  ;;  %7063 = vmatprep.subr.bf16.mxu0 %v7954_v41  ;;  %v6685_v40 = vld [vmem:[%s9734_s2] ss:$0 sm:$0xff] }
 0xf9b   :  { %7042 = vmatpush3.bf16.msra.mxu1 %v7955_v45  ;;  %7064 = vmatpush3.bf16.msra.mxu0 %v7956_v44 }
 0xf9c   :  { %7043 = vmatprep.subr.bf16.mxu1 %v7957_v46  ;;  %7065 = vmatprep.subr.bf16.mxu0 %v7958_v48 }
 0xf9f   :  { %7044 = vmatpush3.bf16.msra.mxu1 %v7959_v49  ;;  %7066 = vmatpush3.bf16.msra.mxu0 %v7960_v51 }
 0xfa0   :  { %7045 = vmatprep.subr.bf16.mxu1 %v7961_v54  ;;  %7067 = vmatprep.subr.bf16.mxu0 %v7962_v56 }
 0xfa3   :  { %7046 = vmatpush3.bf16.msra.mxu1 %v7963_v61  ;;  %7068 = vmatpush3.bf16.msra.mxu0 %v7964_v62 }
 0xfa4   :  { %7047 = vmatprep.subr.bf16.mxu1 %v7965_v38  ;;  %7069 = vmatprep.subr.bf16.mxu0 %v7966_v32 }
 0xfa7   :  { %7048 = vmatpush3.bf16.msra.mxu1 %v7967_v0  ;;  %7070 = vmatpush3.bf16.msra.mxu0 %v7968_v1 }
 0xfa8   :  { %7049 = vmatprep.subr.bf16.mxu1 %v7969_v2  ;;  %7071 = vmatprep.subr.bf16.mxu0 %v7970_v3  ;;  %v7973_v3 = vld [vmem:[#allocation10 + $0xc0] ss:$12 sps:$4 sm:$0xff]  }
 0xfab   :  { %7050 = vmatpush3.bf16.msra.mxu1 %v7971_v43  ;;  %7072 = vmatpush3.bf16.msra.mxu0 %v7972_v42  ;;  %v7975_v43 = vld [vmem:[#allocation10 + $0xc4] ss:$12 sps:$4 sm:$0xff]   ;;  %v7976_v42 = vld [vmem:[#allocation10 + $0xc8] ss:$12 sps:$4 sm:$0xff]  }
 0xfac   :  { %7411 = vmatprep.subr.bf16.mxu0 %v8639_v27  ;;  %3816 = vmatprep.subr.bf16.mxu1 %v7975_v43 }
0x1061   :  { %v3185_v47 = vpop.f32.mrb[64].mxu1  ;;  %v3228_v30 = vpop.f32.mrb[48].mxu0 }
0x1062   :  { %v3186_v10 = vadd.f32 %v3185_v47, %v2974_v6  ;;  %v3229_v11 = vadd.f32 %v3228_v30, %v2982_v7  ;;  %v3187_v14 = vpop.f32.mrb[65].mxu1  ;;  %v3230_v52 = vpop.f32.mrb[49].mxu0 }
0x1063   :  { %v3188_v55 = vadd.f32 %v3187_v14, %v2978_v8  ;;  %v3231_v57 = vadd.f32 %v3230_v52, %v2986_v9  ;;  %v3189_v63 = vpop.f32.mrb[66].mxu1  ;;  %v3232_v53 = vpop.f32.mrb[50].mxu0  ;;  %v7983_v14 = vld [vmem:[#allocation10 + $0xf4] ss:$12 sps:$4 sm:$0xff]   ;;  %v7981_v52 = vld [vmem:[#allocation10 + $0xf0] ss:$12 sps:$4 sm:$0xff]  }
0x1064   :  { %v3190_v18 = vadd.f32 %v3189_v63, %v2974_v6  ;;  %v3233_v21 = vadd.f32 %v3232_v53, %v2982_v7  ;;  %v3191_v23 = vpop.f32.mrb[67].mxu1  ;;  %v3234_v13 = vpop.f32.mrb[51].mxu0  ;;  %v3237_v15 = vmax.f32 %v3186_v10, 0.0  ;;  %v3239_v31 = vmax.f32 %v3229_v11, 0.0  ;;  %v7980_v6 = vld [vmem:[#allocation10 + $0xe0] ss:$12 sps:$4 sm:$0xff]  }
0x1065   :  { %v3192_v26 = vadd.f32 %v3191_v23, %v2978_v8  ;;  %v3235_v12 = vadd.f32 %v3234_v13, %v2986_v9  ;;  %v3238_v58 = vmax.f32 %v3188_v55, 0.0  ;;  %v3240_v35 = vmax.f32 %v3231_v57, 0.0  ;;  %v7977_v7 = vld [vmem:[#allocation10 + $0xd8] ss:$12 sps:$4 sm:$0xff]   ;;  %v7985_v63 = vld [vmem:[#allocation10 + $0x108] ss:$12 sps:$4 sm:$0xff]  }
0x1066   :  { %v3241_v17 = vmax.f32 %v3190_v18, 0.0  ;;  %v3243_v16 = vmax.f32 %v3233_v21, 0.0  ;;  %v7984_v55 = vld [vmem:[#allocation10 + $0xf8] ss:$12 sps:$4 sm:$0xff]   ;;  %v7988_v53 = vld [vmem:[#allocation10 + $0x110] ss:$12 sps:$4 sm:$0xff]  }
0x1067   :  { %v3242_v36 = vmax.f32 %v3192_v26, 0.0  ;;  %v3244_v22 = vmax.f32 %v3235_v12, 0.0  ;;  %v7987_v57 = vld [vmem:[#allocation10 + $0x10c] ss:$12 sps:$4 sm:$0xff]   ;;  %v7991_v18 = vld [vmem:[#allocation10 + $0x124] ss:$12 sps:$4 sm:$0xff]  }
0x1068   :  { %v3309_v20 = vpack.c.bf16 %v3241_v17, %v3237_v15  ;;  %v3311_v19 = vpack.c.bf16 %v3243_v16, %v3239_v31  ;;  %v7989_v21 = vld [vmem:[#allocation10 + $0x120] ss:$12 sps:$4 sm:$0xff]   ;;  %v7992_v23 = vld [vmem:[#allocation10 + $0x128] ss:$12 sps:$4 sm:$0xff]   ;;  %v7993_v26 = vld [vmem:[#allocation10 + $0x138] ss:$12 sps:$4 sm:$0xff]  }
0x1069   :  { %v3310_v37 = vpack.c.bf16 %v3242_v36, %v3238_v58  ;;  %v3312_v59 = vpack.c.bf16 %v3244_v22, %v3240_v35  ;;  %v7995_v13 = vld [vmem:[#allocation10 + $0x13c] ss:$12 sps:$4 sm:$0xff]   ;;  %v7996_v12 = vld [vmem:[#allocation10 + $0x140] ss:$12 sps:$4 sm:$0xff]   ;;  %v8000_v17 = vld [vmem:[#allocation10 + $0x158] ss:$12 sps:$4 sm:$0xff]  }
0x106a   :  { %v7999_v15 = vld [vmem:[#allocation10 + $0x154] ss:$12 sps:$4 sm:$0xff]   ;;  %v7997_v31 = vld [vmem:[#allocation10 + $0x150] ss:$12 sps:$4 sm:$0xff]   ;;  %v8003_v16 = vld [vmem:[#allocation10 + $0x16c] ss:$12 sps:$4 sm:$0xff]  }
0x106b   :  { %3544 = vmatprep.mubr.bf16.mxu1 %v3310_v37  ;;  %3585 = vmatprep.mubr.bf16.mxu0 %v3312_v59  ;;  %v8001_v58 = vld [vmem:[#allocation10 + $0x168] ss:$12 sps:$4 sm:$0xff]   ;;  %v8004_v35 = vld [vmem:[#allocation10 + $0x170] ss:$12 sps:$4 sm:$0xff]  }
0x106c   :  { %3545 = vmatmul.mubr.bf16.vlgmr.msra.gmra.mrb[68].mxu1 %v3309_v20  ;;  %3586 = vmatmul.mubr.bf16.vlgmr.msra.gmra.mrb[52].mxu0 %v3311_v19 }
0x106d   :  { %3848 = vmatprep.mubr.bf16.mxu1 %v8640_v50  ;;  %7427 = vmatprep.mubr.msk.bf16.mxu0 %vm8641_vm0, %v8639_v27 }
0x106e   :  { %7412 = vmatpush3.bf16.msra.mxu0 %v7976_v42  ;;  %3817 = vmatpush1.bf16.msra.mxu1 %v7973_v3 }
0x106f   :  { %7413 = vmatprep.subr.bf16.mxu0 %v8639_v27  ;;  %3818 = vmatprep.subr.bf16.mxu1 %v7979_v4 }
0x1072   :  { %7414 = vmatpush3.bf16.msra.mxu0 %v7980_v6  ;;  %3819 = vmatpush1.bf16.msra.mxu1 %v7977_v7 }
0x1073   :  { %7415 = vmatprep.subr.bf16.mxu0 %v8639_v27  ;;  %3820 = vmatprep.subr.bf16.mxu1 %v7983_v14 }
0x1076   :  { %3821 = vmatpush1.bf16.msra.mxu1 %v7981_v52  ;;  %7416 = vmatpush3.bf16.msra.mxu0 %v7984_v55 }
0x1077   :  { %7417 = vmatprep.subr.bf16.mxu0 %v8639_v27  ;;  %3822 = vmatprep.subr.bf16.mxu1 %v7987_v57 }
0x107a   :  { %3823 = vmatpush1.bf16.msra.mxu1 %v7985_v63  ;;  %7418 = vmatpush3.bf16.msra.mxu0 %v7988_v53 }
0x107b   :  { %7419 = vmatprep.subr.bf16.mxu0 %v8639_v27  ;;  %3824 = vmatprep.subr.bf16.mxu1 %v7991_v18 }
0x107e   :  { %3825 = vmatpush1.bf16.msra.mxu1 %v7989_v21  ;;  %7420 = vmatpush3.bf16.msra.mxu0 %v7992_v23 }
0x107f   :  { %7421 = vmatprep.subr.bf16.mxu0 %v8639_v27  ;;  %3826 = vmatprep.subr.bf16.mxu1 %v7995_v13 }
0x1082   :  { %3827 = vmatpush1.bf16.msra.mxu1 %v7993_v26  ;;  %7422 = vmatpush3.bf16.msra.mxu0 %v7996_v12 }
0x1083   :  { %7423 = vmatprep.subr.bf16.mxu0 %v8639_v27  ;;  %3828 = vmatprep.subr.bf16.mxu1 %v7999_v15 }
0x1086   :  { %3829 = vmatpush1.bf16.msra.mxu1 %v7997_v31  ;;  %7424 = vmatpush3.bf16.msra.mxu0 %v8000_v17 }
0x1087   :  { %3830 = vmatprep.subr.bf16.mxu1 %v8003_v16  ;;  %7425 = vmatprep.subr.bf16.mxu0 %v8639_v27 }
0x108a   :  { %3831 = vmatpush1.bf16.msra.mxu1 %v8001_v58  ;;  %7426 = vmatpush3.bf16.msra.mxu0 %v8004_v35 }
0x108b   :  { %7431 = vmatprep.subr.bf16.mxu1 %v8639_v27  ;;  %7455 = vmatprep.subr.bf16.mxu0 %v8639_v27 }
0x113f   :  { %v7051_v39 = vpop.f32.mrb[68].mxu1  ;;  %v7073_v60 = vpop.f32.mrb[52].mxu0 }
0x1140   :  { %v7052_v41 = vpop.f32.mrb[69].mxu1  ;;  %v7074_v45 = vpop.f32.mrb[53].mxu0 }
0x1141   :  { %v7053_v44 = vadd.f32 %v7052_v41, %v7051_v39  ;;  %v7075_v46 = vadd.f32 %v7074_v45, %v7073_v60  ;;  %v7054_v48 = vpop.f32.mrb[70].mxu1  ;;  %v7076_v49 = vpop.f32.mrb[54].mxu0  ;;  %v6718_v60 = vld [vmem:[%s9735_s25] ss:$0 sm:$0xff] }
0x1142   :  { %v7055_v51 = vpop.f32.mrb[71].mxu1  ;;  %v7077_v54 = vpop.f32.mrb[55].mxu0 }
0x1143   :  { %v3547_v56 = vadd.f32 %v7053_v44, %v6685_v40  ;;  %v7056_v61 = vadd.f32 %v7055_v51, %v7054_v48  ;;  %v7078_v62 = vadd.f32 %v7077_v54, %v7076_v49 }
0x1145   :  { %v3588_v38 = vadd.f32 %v7075_v46, %v3547_v56  ;;  %v3550_v32 = vadd.f32 %v7056_v61, %v6685_v40  ;;  %v6719_v46 = vld [vmem:[%s9736_s10] ss:$0 sm:$0xff]  ;;  %v6720_v56 = vld [vmem:[%s9729_s17 + $0x3] sm:$0x7] }
0x1146   :  { %v3676_v61 = vrot.slane %v6720_v56, %v8939_v25 }
0x1147   :  { %v3591_v0 = vadd.f32 %v7078_v62, %v3550_v32  ;;  %v3594_v1 = vadd.f32 %v3588_v38, %v9278_v33  ;;  %v3684_v62 = vrot.slane %v6720_v56, %v8943_v28 }
0x1149   :  { %3598 = vadd.xlane.f32.xlu1 %v3594_v1  ;;  %v3595_v2 = vadd.f32 %v3591_v0, %v9280_v34  ;;  %v3680_v0 = vrot.slane %v6720_v56, %v8946_v29 }
0x114b   :  { %3600 = vadd.xlane.f32.xlu0 %v3595_v2 }
0x11d6   :  { %v3599_v33 = vpop.xlane.xlu1 %3598 }
0x11d7   :  { %v3602_v8 = vmul.f32 0.0078125, %v3599_v33 }
0x11d8   :  { %v3601_v34 = vpop.xlane.xlu0 %3600 }
0x11d9   :  { %v3604_v9 = vsub.f32 %v3594_v1, %v3602_v8  ;;  %v3603_v47 = vmul.f32 0.0078125, %v3601_v34 }
0x11db   :  { %v3605_v30 = vsub.f32 %v3595_v2, %v3603_v47  ;;  %v3606_v10 = vmul.f32 %v3604_v9, %v3604_v9 }
0x11dd   :  { %3608 = vadd.xlane.f32.xlu1 %v3606_v10  ;;  %v3607_v11 = vmul.f32 %v3605_v30, %v3605_v30 }
0x11df   :  { %3610 = vadd.xlane.f32.xlu0 %v3607_v11 }
0x126a   :  { %v3609_v36 = vpop.xlane.xlu1 %3608 }
0x126b   :  { %v3612_v22 = vmul.f32 0.0078125, %v3609_v36 }
0x126c   :  { %v3611_v20 = vpop.xlane.xlu0 %3610 }
0x126d   :  { %v3614_v19 = vadd.f32 1e-05, %v3612_v22  ;;  %v3613_v37 = vmul.f32 0.0078125, %v3611_v20 }
0x126f   :  { %8193 = vrsqrt.f32 %v3614_v19  ;;  %v3615_v59 = vadd.f32 1e-05, %v3613_v37 }
0x1271   :  { %8195 = vrsqrt.f32 %v3615_v59 }
0x1279   :  { %v8194_v39 = vpop.eup %8193 }
0x127a   :  { %v3618_v40 = vmul.f32 %v8194_v39, %v3604_v9 }
0x127b   :  { %v8196_v41 = vpop.eup %8195 }
0x127c   :  { %v3619_v45 = vmul.f32 %v8196_v41, %v3605_v30  ;;  %v3626_v44 = vmul.f32 %v6718_v60, %v3618_v40 }
0x127e   :  { %v3627_v48 = vmul.f32 %v6718_v60, %v3619_v45  ;;  %v9309_v49 = vadd.f32 %v6719_v46, %v3626_v44 }
0x1280   :  { %v9311_v51 = vadd.f32 %v6719_v46, %v3627_v48 }
0x1282   :  { %v3669_v54 = vpack.c.bf16 %v9311_v51, %v9309_v49 }
0x1284   :  { %3849 = vmatmul.mubr.bf16.vlgmr.msra.gmra.mrb[72].mxu1 %v3669_v54  ;;  %7428 = vmatmul.mubr.bf16.vlgmr.msra.gmra.mrb[56].mxu0 %v3669_v54 }
0x1285   :  { %7433 = vmatprep.mubr.msk.bf16.mxu1 %vm8641_vm0, %v8639_v27  ;;  %7457 = vmatprep.mubr.msk.bf16.mxu0 %vm8641_vm0, %v8639_v27 }
0x1357   :  { %v3850_v38 = vpop.f32.mrb[72].mxu1  ;;  %v3893_v32 = vpop.f32.mrb[56].mxu0 }
0x1358   :  { %v3851_v1 = vadd.f32 %v3850_v38, %v3676_v61  ;;  %v3852_v2 = vpop.f32.mrb[73].mxu1  ;;  %v7429_v3 = vpop.f32.mrb[57].mxu0  ;;  %v3894_v4 = vadd.f32 %v3893_v32, %v3684_v62 }
0x1359   :  { %v3854_v43 = vpop.f32.mrb[74].mxu1  ;;  %v3896_v42 = vpop.f32.mrb[58].mxu0  ;;  %v3853_v34 = vadd.f32 %v3852_v2, %v3680_v0 }
0x135a   :  { %v3855_v6 = vadd.f32 %v3854_v43, %v3676_v61  ;;  %v3897_v7 = vadd.f32 %v3896_v42, %v3684_v62  ;;  %v3856_v33 = vpop.f32.mrb[75].mxu1  ;;  %v7430_v8 = vpop.f32.mrb[59].mxu0  ;;  %v3900_v47 = vmul.f32 0.25, %v3851_v1 }
0x135b   :  { %v3857_v9 = vadd.f32 %v3856_v33, %v3680_v0 }
0x135c   :  { %v3901_v30 = vmul.f32 0.25, %v3855_v6  ;;  %v9323_v10 = vpack.c.bf16 %v3897_v7, %v3894_v4 }
0x135d   :  { %v3903_v11 = vpack.c.bf16 %v3857_v9, %v3853_v34 }
0x135e   :  { %v3902_v14 = vpack.c.bf16 %v3901_v30, %v3900_v47 }
0x135f   :  { %v3908_v52 = vsel %vm1284_vm1, %v3903_v11, 0 }
0x1360   :  { %7432 = vmatpush3.bf16.xpose.msra.mxu1 %v3908_v52 }
0x1361   :  { %7437 = vmatprep.subr.bf16.mxu1 %v8639_v27 }
0x1367   :  { %7434 = vmatmul.mubr.msk.bf16.vlgmr.msra.gmra.mrb[76].mxu1 %vm1284_vm1, %v3902_v14 }
0x1368   :  { %7438 = vmatpush3.bf16.msra.mxu1 %v9323_v10  ;;  %7439 = vmatprep.mubr.msk.bf16.mxu1 %vm8641_vm0, %v8639_v27 }
0x1369   :  { %7443 = vmatprep.subr.bf16.mxu1 %v8639_v27 }
0x143a   :  { %v3944_v55 = vpop.f32.mrb[76].mxu1 }
0x143b   :  { %v7435_v57 = vpop.f32.mrb[77].mxu1  ;;  %v3951_v63 = vsel %vm1284_vm1, %v3944_v55, -inf }
0x143c   :  { %3952 = vmax.xlane.f32.xlu1 %v3951_v63  ;;  %v3947_v53 = vpop.f32.mrb[78].mxu1 }
0x143d   :  { %v7436_v18 = vpop.f32.mrb[79].mxu1  ;;  %v3954_v21 = vsel %vm1284_vm1, %v3947_v53, -inf }
0x143e   :  { %3955 = vmax.xlane.f32.xlu0 %v3954_v21 }
0x14c9   :  { %v3953_v23 = vpop.xlane.xlu1 %3952 }
0x14ca   :  { %v3957_v13 = vsub.f32 %v3944_v55, %v3953_v23 }
0x14cb   :  { %v3956_v26 = vpop.xlane.xlu0 %3955 }
0x14cc   :  { %v3959_v12 = vmul.f32 1.442695, %v3957_v13  ;;  %v3958_v15 = vsub.f32 %v3947_v53, %v3956_v26 }
0x14ce   :  { %8197 = vpow2.f32 %v3959_v12  ;;  %v3961_v31 = vmul.f32 1.442695, %v3958_v15 }
0x14d0   :  { %8199 = vpow2.f32 %v3961_v31 }
0x14d8   :  { %v8198_v17 = vpop.eup %8197 }
0x14d9   :  { %v3963_v16 = vsel %vm1284_vm1, %v8198_v17, 0.0 }
0x14da   :  { %v8200_v58 = vpop.eup %8199  ;;  %3964 = vadd.xlane.f32.xlu1 %v3963_v16 }
0x14db   :  { %v3966_v35 = vsel %vm1284_vm1, %v8200_v58, 0.0 }
0x14dc   :  { %3967 = vadd.xlane.f32.xlu0 %v3966_v35 }
0x14eb   :  { %4025 = vrot.lane.b32.xlu1 %v3903_v11, %s8642_s21 }
0x14ef   :  { %4157 = vrot.lane.b32.xlu1 %v3903_v11, %s8643_s19 }
0x14f2   :  { %4022 = vrot.lane.b32.xlu0 %v3902_v14, %s8642_s21 }
0x14f3   :  { %4155 = vrot.lane.b32.xlu1 %v3902_v14, %s8643_s19 }
0x14f6   :  { %4286 = vrot.lane.b32.xlu0 %v3902_v14, %s8644_s4 }
0x14f7   :  { %4288 = vrot.lane.b32.xlu1 %v3903_v11, %s8644_s4 }
0x14fa   :  { %4417 = vrot.lane.b32.xlu0 %v3902_v14, %s8623_s1 }
0x14fb   :  { %4419 = vrot.lane.b32.xlu1 %v3903_v11, %s8623_s1 }
0x14fe   :  { %4548 = vrot.lane.b32.xlu0 %v3902_v14, %s8645_s28 }
0x14ff   :  { %4550 = vrot.lane.b32.xlu1 %v3903_v11, %s8645_s28 }
0x1502   :  { %4679 = vrot.lane.b32.xlu0 %v3902_v14, %s8646_s23 }
0x1503   :  { %4681 = vrot.lane.b32.xlu1 %v3903_v11, %s8646_s23 }
0x1506   :  { %4810 = vrot.lane.b32.xlu0 %v3902_v14, %s8630_s3 }
0x1507   :  { %4812 = vrot.lane.b32.xlu1 %v3903_v11, %s8630_s3 }
0x1567   :  { %v3965_v36 = vpop.xlane.xlu1 %3964 }
0x1568   :  { %8201 = vrcp.f32 %v3965_v36 }
0x1569   :  { %v3968_v22 = vpop.xlane.xlu0 %3967 }
0x156a   :  { %8203 = vrcp.f32 %v3968_v22 }
0x156b   :  { %v4026_v20 = vpop.permute.xlu1 %4025 }
0x156c   :  { %v4031_v48 = vsel %vm1284_vm1, %v4026_v20, 0 }
0x156d   :  { %v4023_v54 = vpop.permute.xlu0 %4022 }
0x156f   :  { %v4158_v19 = vpop.permute.xlu1 %4157 }
0x1570   :  { %v4163_v37 = vsel %vm1284_vm1, %v4158_v19, 0 }
0x1571   :  { %7456 = vmatpush3.bf16.xpose.msra.mxu0 %v4163_v37  ;;  %v4287_v61 = vpop.permute.xlu0 %4286 }
0x1572   :  { %v8202_v59 = vpop.eup %8201  ;;  %7467 = vmatprep.subr.bf16.mxu0 %v8639_v27 }
0x1573   :  { %v4156_v39 = vpop.permute.xlu1 %4155  ;;  %v3970_v40 = vmul.f32 %v8202_v59, %v8198_v17 }
0x1574   :  { %v8204_v60 = vpop.eup %8203 }
0x1575   :  { %v3972_v41 = vmul.f32 %v8204_v60, %v8200_v58  ;;  %v4418_v32 = vpop.permute.xlu0 %4417 }
0x1577   :  { %v4289_v45 = vpop.permute.xlu1 %4288  ;;  %v3973_v44 = vpack.c.bf16 %v3972_v41, %v3970_v40 }
0x1578   :  { %v4294_v46 = vsel %vm1284_vm1, %v4289_v45, 0  ;;  %7458 = vmatmul.mubr.msk.bf16.vlgmr.msra.gmra.mrb[60].mxu0 %vm1284_vm1, %v4156_v39 }
0x1579   :  { %7440 = vmatmul.mubr.msk.bf16.vlgmr.msra.gmra.mrb[80].mxu1 %vm1284_vm1, %v3973_v44  ;;  %7468 = vmatpush3.bf16.xpose.msra.mxu0 %v4294_v46  ;;  %v4549_v2 = vpop.permute.xlu0 %4548 }
0x157a   :  { %7444 = vmatpush3.bf16.xpose.msra.mxu1 %v4031_v48  ;;  %7469 = vmatprep.mubr.msk.bf16.mxu0 %vm8641_vm0, %v8639_v27 }
0x157b   :  { %7445 = vmatprep.mubr.msk.bf16.mxu1 %vm8641_vm0, %v8639_v27  ;;  %7479 = vmatprep.subr.bf16.mxu0 %v8639_v27  ;;  %v4420_v56 = vpop.permute.xlu1 %4419 }
0x157c   :  { %7449 = vmatprep.subr.bf16.mxu1 %v8639_v27  ;;  %v4425_v62 = vsel %vm1284_vm1, %v4420_v56, 0 }
0x157d   :  { %v4680_v42 = vpop.permute.xlu0 %4679 }
0x157f   :  { %v4551_v38 = vpop.permute.xlu1 %4550 }
0x1580   :  { %7470 = vmatmul.mubr.msk.bf16.vlgmr.msra.gmra.mrb[64].mxu0 %vm1284_vm1, %v4287_v61  ;;  %v4556_v0 = vsel %vm1284_vm1, %v4551_v38, 0 }
0x1581   :  { %7446 = vmatmul.mubr.msk.bf16.vlgmr.msra.gmra.mrb[84].mxu1 %vm1284_vm1, %v4023_v54  ;;  %7480 = vmatpush3.bf16.xpose.msra.mxu0 %v4425_v62  ;;  %v4811_v6 = vpop.permute.xlu0 %4810 }
0x1582   :  { %7481 = vmatprep.mubr.msk.bf16.mxu0 %vm8641_vm0, %v8639_v27  ;;  %7491 = vmatprep.subr.bf16.mxu0 %v8639_v27 }
0x1583   :  { %7451 = vmatprep.mubr.msk.bf16.mxu1 %vm8641_vm0, %v8639_v27  ;;  %v4682_v1 = vpop.permute.xlu1 %4681 }
0x1584   :  { %v4687_v3 = vsel %vm1284_vm1, %v4682_v1, 0 }
0x1587   :  { %v4813_v43 = vpop.permute.xlu1 %4812 }
0x1588   :  { %7482 = vmatmul.mubr.msk.bf16.vlgmr.msra.gmra.mrb[68].mxu0 %vm1284_vm1, %v4418_v32  ;;  %v4818_v4 = vsel %vm1284_vm1, %v4813_v43, 0 }
0x1589   :  { %7492 = vmatpush3.bf16.xpose.msra.mxu0 %v4556_v0  ;;  %7493 = vmatprep.mubr.msk.bf16.mxu0 %vm8641_vm0, %v8639_v27 }
0x158a   :  { %7503 = vmatprep.subr.bf16.mxu0 %v8639_v27 }
0x1590   :  { %7494 = vmatmul.mubr.msk.bf16.vlgmr.msra.gmra.mrb[72].mxu0 %vm1284_vm1, %v4549_v2 }
0x1591   :  { %7504 = vmatpush3.bf16.xpose.msra.mxu0 %v4687_v3  ;;  %7505 = vmatprep.mubr.msk.bf16.mxu0 %vm8641_vm0, %v8639_v27 }
0x1592   :  { %7515 = vmatprep.subr.bf16.mxu0 %v8639_v27 }
0x1598   :  { %7506 = vmatmul.mubr.msk.bf16.vlgmr.msra.gmra.mrb[76].mxu0 %vm1284_vm1, %v4680_v42 }
0x1599   :  { %7516 = vmatpush3.bf16.xpose.msra.mxu0 %v4818_v4  ;;  %7517 = vmatprep.mubr.msk.bf16.mxu0 %vm8641_vm0, %v8639_v27 }
0x159a   :  { %7527 = vmatprep.subr.bf16.mxu0 %v8639_v27 }
0x15a0   :  { %7518 = vmatmul.mubr.msk.bf16.vlgmr.msra.gmra.mrb[80].mxu0 %vm1284_vm1, %v4811_v6 }
0x15a1   :  { %7543 = vmatprep.mubr.msk.bf16.mxu0 %vm8641_vm0, %v8639_v27 }
0x164b   :  { %v9388_v7 = vpop.f32.mrb[60].mxu0 }
0x164c   :  { %v4012_v33 = vpop.f32.mrb[80].mxu1  ;;  %v7459_v8 = vpop.f32.mrb[61].mxu0  ;;  %v4206_v15 = vsel %vm1284_vm1, %v9388_v7, -inf }
0x164d   :  { %4019 = vst.msk [vmem:[#allocation2] sm:$0xff] %vm1284_vm1, %v4012_v33  ;;  %v7441_v34 = vpop.f32.mrb[81].mxu1  ;;  %v9391_v9 = vpop.f32.mrb[62].mxu0 }
0x164e   :  { %v4015_v47 = vpop.f32.mrb[82].mxu1  ;;  %v7460_v30 = vpop.f32.mrb[63].mxu0  ;;  %v4209_v35 = vsel %vm1284_vm1, %v9391_v9, -inf }
0x164f   :  { %4020 = vst.msk [vmem:[#allocation2 + $0x8] sm:$0xff] %vm1284_vm1, %v4015_v47  ;;  %v7442_v11 = vpop.f32.mrb[83].mxu1 }
0x1653   :  { %v4330_v14 = vpop.f32.mrb[64].mxu0 }
0x1654   :  { %v9394_v52 = vpop.f32.mrb[84].mxu1  ;;  %v7471_v55 = vpop.f32.mrb[65].mxu0  ;;  %v4337_v26 = vsel %vm1284_vm1, %v4330_v14, -inf }
0x1655   :  { %v7447_v57 = vpop.f32.mrb[85].mxu1  ;;  %v9396_v63 = vpop.f32.mrb[66].mxu0  ;;  %v4074_v53 = vsel %vm1284_vm1, %v9394_v52, -inf }
0x1656   :  { %v7472_v18 = vpop.f32.mrb[67].mxu0  ;;  %4075 = vmax.xlane.f32.xlu1 %v4074_v53  ;;  %v9400_v21 = vpop.f32.mrb[86].mxu1  ;;  %v4340_v22 = vsel %vm1284_vm1, %v9396_v63, -inf }
0x1657   :  { %v7448_v23 = vpop.f32.mrb[87].mxu1  ;;  %v4077_v13 = vsel %vm1284_vm1, %v9400_v21, -inf }
0x1658   :  { %4078 = vmax.xlane.f32.xlu0 %v4077_v13 }
0x165a   :  { %4338 = vmax.xlane.f32.xlu1 %v4337_v26 }
0x165b   :  { %v4461_v12 = vpop.f32.mrb[68].mxu0 }
0x165c   :  { %v7483_v31 = vpop.f32.mrb[69].mxu0  ;;  %4207 = vmax.xlane.f32.xlu0 %v4206_v15  ;;  %v4468_v17 = vsel %vm1284_vm1, %v4461_v12, -inf }
0x165d   :  { %v9408_v16 = vpop.f32.mrb[70].mxu0 }
0x165e   :  { %v7484_v58 = vpop.f32.mrb[71].mxu0  ;;  %4469 = vmax.xlane.f32.xlu1 %v4468_v17  ;;  %v4471_v39 = vsel %vm1284_vm1, %v9408_v16, -inf }
0x1660   :  { %4210 = vmax.xlane.f32.xlu0 %v4209_v35 }
0x1663   :  { %v4592_v36 = vpop.f32.mrb[72].mxu0 }
0x1664   :  { %v7495_v20 = vpop.f32.mrb[73].mxu0  ;;  %4341 = vmax.xlane.f32.xlu0 %v4340_v22  ;;  %v4599_v19 = vsel %vm1284_vm1, %v4592_v36, -inf }
0x1665   :  { %v9415_v37 = vpop.f32.mrb[74].mxu0  ;;  %4600 = vmax.xlane.f32.xlu1 %v4599_v19 }
0x1666   :  { %v7496_v59 = vpop.f32.mrb[75].mxu0  ;;  %v4602_v40 = vsel %vm1284_vm1, %v9415_v37, -inf }
0x1668   :  { %4472 = vmax.xlane.f32.xlu0 %v4471_v39 }
0x166b   :  { %v9419_v60 = vpop.f32.mrb[76].mxu0 }
0x166c   :  { %v7507_v41 = vpop.f32.mrb[77].mxu0  ;;  %4603 = vmax.xlane.f32.xlu0 %v4602_v40  ;;  %v4730_v45 = vsel %vm1284_vm1, %v9419_v60, -inf }
0x166d   :  { %v9425_v44 = vpop.f32.mrb[78].mxu0  ;;  %4731 = vmax.xlane.f32.xlu1 %v4730_v45 }
0x166e   :  { %v7508_v46 = vpop.f32.mrb[79].mxu0  ;;  %v4733_v48 = vsel %vm1284_vm1, %v9425_v44, -inf }
0x1670   :  { %4734 = vmax.xlane.f32.xlu0 %v4733_v48 }
0x1673   :  { %v9429_v54 = vpop.f32.mrb[80].mxu0 }
0x1674   :  { %v7519_v56 = vpop.f32.mrb[81].mxu0  ;;  %v4861_v61 = vsel %vm1284_vm1, %v9429_v54, -inf }
0x1675   :  { %v9433_v62 = vpop.f32.mrb[82].mxu0  ;;  %4862 = vmax.xlane.f32.xlu1 %v4861_v61 }
0x1676   :  { %v7520_v38 = vpop.f32.mrb[83].mxu0  ;;  %v4864_v32 = vsel %vm1284_vm1, %v9433_v62, -inf }
0x1677   :  { %4865 = vmax.xlane.f32.xlu0 %v4864_v32 }
0x16e3   :  { %v4076_v0 = vpop.xlane.xlu1 %4075 }
0x16e4   :  { %v4080_v30 = vsub.f32 %v9394_v52, %v4076_v0 }
0x16e5   :  { %v4079_v1 = vpop.xlane.xlu0 %4078 }
0x16e6   :  { %v4082_v18 = vmul.f32 1.442695, %v4080_v30  ;;  %v4081_v35 = vsub.f32 %v9400_v21, %v4079_v1 }
0x16e7   :  { %v4339_v2 = vpop.xlane.xlu1 %4338 }
0x16e8   :  { %v4343_v3 = vsub.f32 %v4330_v14, %v4339_v2 }
0x16e9   :  { %v4208_v43 = vpop.xlane.xlu0 %4207 }
0x16ea   :  { %v4212_v42 = vsub.f32 %v9388_v7, %v4208_v43  ;;  %v4345_v6 = vmul.f32 1.442695, %v4343_v3 }
0x16eb   :  { %v4470_v4 = vpop.xlane.xlu1 %4469 }
0x16ec   :  { %v4214_v33 = vmul.f32 1.442695, %v4212_v42  ;;  %v4474_v8 = vsub.f32 %v4461_v12, %v4470_v4 }
0x16ed   :  { %v4211_v34 = vpop.xlane.xlu0 %4210 }
0x16ee   :  { %8205 = vpow2.f32 %v4214_v33  ;;  %v4213_v47 = vsub.f32 %v9391_v9, %v4211_v34  ;;  %v4476_v11 = vmul.f32 1.442695, %v4474_v8 }
0x16ef   :  { %8207 = vpow2.f32 %v4345_v6 }
0x16f0   :  { %v4216_v55 = vmul.f32 1.442695, %v4213_v47 }
0x16f1   :  { %v4342_v57 = vpop.xlane.xlu0 %4341 }
0x16f2   :  { %8209 = vpow2.f32 %v4216_v55  ;;  %v4344_v14 = vsub.f32 %v9396_v63, %v4342_v57  ;;  %v4601_v53 = vpop.xlane.xlu1 %4600 }
0x16f3   :  { %8211 = vpow2.f32 %v4476_v11  ;;  %v4605_v23 = vsub.f32 %v4592_v36, %v4601_v53 }
0x16f4   :  { %v4347_v7 = vmul.f32 1.442695, %v4344_v14 }
0x16f5   :  { %v4473_v13 = vpop.xlane.xlu0 %4472  ;;  %v4607_v9 = vmul.f32 1.442695, %v4605_v23 }
0x16f6   :  { %8213 = vpow2.f32 %v4347_v7  ;;  %v4475_v26 = vsub.f32 %v9408_v16, %v4473_v13 }
0x16f7   :  { %8215 = vpow2.f32 %v4082_v18 }
0x16f8   :  { %v9442_v12 = vpop.eup %8205  ;;  %v4478_v52 = vmul.f32 1.442695, %v4475_v26 }
0x16f9   :  { %v4604_v15 = vpop.xlane.xlu0 %4603  ;;  %v4218_v31 = vsel %vm1284_vm1, %v9442_v12, 0.0  ;;  %v9446_v17 = vpop.eup %8207 }
0x16fa   :  { %8217 = vpow2.f32 %v4478_v52  ;;  %v4606_v63 = vsub.f32 %v9415_v37, %v4604_v15  ;;  %4219 = vadd.xlane.f32.xlu1 %v4218_v31  ;;  %v4349_v36 = vsel %vm1284_vm1, %v9446_v17, 0.0  ;;  %v4084_v37 = vmul.f32 1.442695, %v4081_v35  ;;  %v4732_v0 = vpop.xlane.xlu1 %4731 }
0x16fb   :  { %8219 = vpow2.f32 %v4607_v9  ;;  %v4736_v1 = vsub.f32 %v9419_v60, %v4732_v0 }
0x16fc   :  { %v9449_v58 = vpop.eup %8209  ;;  %v4609_v16 = vmul.f32 1.442695, %v4606_v63 }
0x16fd   :  { %v4221_v22 = vsel %vm1284_vm1, %v9449_v58, 0.0  ;;  %v9456_v20 = vpop.eup %8211  ;;  %v4738_v2 = vmul.f32 1.442695, %v4736_v1  ;;  %v4735_v3 = vpop.xlane.xlu0 %4734 }
0x16fe   :  { %4350 = vadd.xlane.f32.xlu1 %v4349_v36  ;;  %4222 = vadd.xlane.f32.xlu0 %v4221_v22  ;;  %8221 = vpow2.f32 %v4609_v16  ;;  %v4480_v59 = vsel %vm1284_vm1, %v9456_v20, 0.0  ;;  %v4737_v43 = vsub.f32 %v9425_v44, %v4735_v3 }
0x16ff   :  { %8223 = vpow2.f32 %v4084_v37 }
0x1700   :  { %v9458_v19 = vpop.eup %8213  ;;  %8225 = vpow2.f32 %v4738_v2  ;;  %v4740_v4 = vmul.f32 1.442695, %v4737_v43 }
0x1701   :  { %v4352_v21 = vsel %vm1284_vm1, %v9458_v19, 0.0  ;;  %v9464_v39 = vpop.eup %8215 }
0x1702   :  { %4481 = vadd.xlane.f32.xlu1 %v4480_v59  ;;  %4353 = vadd.xlane.f32.xlu0 %v4352_v21  ;;  %v4086_v41 = vsel %vm1284_vm1, %v9464_v39, 0.0  ;;  %v4863_v42 = vpop.xlane.xlu1 %4862  ;;  %8227 = vpow2.f32 %v4740_v4 }
0x1703   :  { %v4867_v6 = vsub.f32 %v9429_v54, %v4863_v42 }
0x1704   :  { %v9466_v40 = vpop.eup %8217  ;;  %v4866_v33 = vpop.xlane.xlu0 %4865 }
0x1705   :  { %v4483_v45 = vsel %vm1284_vm1, %v9466_v40, 0.0  ;;  %v9472_v46 = vpop.eup %8219  ;;  %v4869_v34 = vmul.f32 1.442695, %v4867_v6  ;;  %v4868_v47 = vsub.f32 %v9433_v62, %v4866_v33 }
0x1706   :  { %4087 = vadd.xlane.f32.xlu1 %v4086_v41  ;;  %4484 = vadd.xlane.f32.xlu0 %v4483_v45  ;;  %v4611_v48 = vsel %vm1284_vm1, %v9472_v46, 0.0 }
0x1707   :  { %8229 = vpow2.f32 %v4869_v34  ;;  %v4871_v30 = vmul.f32 1.442695, %v4868_v47 }
0x1708   :  { %v9476_v56 = vpop.eup %8221 }
0x1709   :  { %v4614_v61 = vsel %vm1284_vm1, %v9476_v56, 0.0  ;;  %v8224_v38 = vpop.eup %8223  ;;  %8231 = vpow2.f32 %v4871_v30 }
0x170a   :  { %4612 = vadd.xlane.f32.xlu0 %v4611_v48  ;;  %v4089_v32 = vsel %vm1284_vm1, %v8224_v38, 0.0  ;;  %v9488_v8 = vpop.eup %8225 }
0x170b   :  { %v4742_v60 = vsel %vm1284_vm1, %v9488_v8, 0.0 }
0x170c   :  { %v9493_v11 = vpop.eup %8227 }
0x170d   :  { %v4745_v44 = vsel %vm1284_vm1, %v9493_v11, 0.0 }
0x170e   :  { %4615 = vadd.xlane.f32.xlu0 %v4614_v61 }
0x1711   :  { %v9497_v54 = vpop.eup %8229 }
0x1712   :  { %4090 = vadd.xlane.f32.xlu0 %v4089_v32  ;;  %v4873_v55 = vsel %vm1284_vm1, %v9497_v54, 0.0 }
0x1713   :  { %v9501_v57 = vpop.eup %8231 }
0x1714   :  { %v4876_v62 = vsel %vm1284_vm1, %v9501_v57, 0.0 }
0x1717   :  { %4098 = vrot.lane.b32.xlu1 %v9323_v10, %s8642_s21 }
0x1728   :  { %4229 = vrot.lane.b32.xlu0 %v9323_v10, %s8643_s19 }
0x173b   :  { %4743 = vadd.xlane.f32.xlu1 %v4742_v60 }
0x1747   :  { %4746 = vadd.xlane.f32.xlu0 %v4745_v44 }
0x174b   :  { %4874 = vadd.xlane.f32.xlu0 %v4873_v55 }
0x174c   :  { %4360 = vrot.lane.b32.xlu1 %v9323_v10, %s8644_s4 }
0x174f   :  { %4877 = vadd.xlane.f32.xlu0 %v4876_v62 }
0x1750   :  { %4491 = vrot.lane.b32.xlu1 %v9323_v10, %s8623_s1 }
0x1754   :  { %4753 = vrot.lane.b32.xlu1 %v9323_v10, %s8646_s23 }
0x1758   :  { %4884 = vrot.lane.b32.xlu1 %v9323_v10, %s8630_s3 }
0x1765   :  { %4622 = vrot.lane.b32.xlu0 %v9323_v10, %s8645_s28 }
0x1787   :  { %v4220_v14 = vpop.xlane.xlu1 %4219 }
0x178b   :  { %v4351_v53 = vpop.xlane.xlu1 %4350  ;;  %v4223_v18 = vpop.xlane.xlu0 %4222 }
0x178f   :  { %v4482_v7 = vpop.xlane.xlu1 %4481  ;;  %v4354_v23 = vpop.xlane.xlu0 %4353 }
0x1793   :  { %v4088_v13 = vpop.xlane.xlu1 %4087  ;;  %v4485_v26 = vpop.xlane.xlu0 %4484 }
0x1794   :  { %8233 = vrcp.f32 %v4088_v13 }
0x1797   :  { %v4099_v9 = vpop.permute.xlu1 %4098  ;;  %v4613_v52 = vpop.xlane.xlu0 %4612 }
0x1798   :  { %7450 = vmatpush3.bf16.msra.mxu1 %v4099_v9 }
0x1799   :  { %7461 = vmatprep.subr.bf16.mxu1 %v8639_v27 }
0x179b   :  { %v4616_v15 = vpop.xlane.xlu0 %4615 }
0x179e   :  { %v8234_v63 = vpop.eup %8233 }
0x179f   :  { %v4091_v31 = vpop.xlane.xlu0 %4090  ;;  %v4093_v35 = vmul.f32 %v8234_v63, %v9464_v39 }
0x17a0   :  { %8235 = vrcp.f32 %v4091_v31 }
0x17a1   :  { %8237 = vrcp.f32 %v4223_v18 }
0x17a2   :  { %8239 = vrcp.f32 %v4220_v14 }
0x17a3   :  { %v4230_v37 = vpop.permute.xlu0 %4229  ;;  %8241 = vrcp.f32 %v4354_v23 }
0x17a4   :  { %8243 = vrcp.f32 %v4351_v53 }
0x17a5   :  { %8245 = vrcp.f32 %v4485_v26 }
0x17a6   :  { %8247 = vrcp.f32 %v4482_v7 }
0x17a7   :  { %8249 = vrcp.f32 %v4616_v15 }
0x17a8   :  { %8251 = vrcp.f32 %v4613_v52 }
0x17aa   :  { %v8236_v10 = vpop.eup %8235 }
0x17ab   :  { %v4095_v16 = vmul.f32 %v8236_v10, %v8224_v38  ;;  %v8238_v22 = vpop.eup %8237 }
0x17ac   :  { %v8240_v59 = vpop.eup %8239  ;;  %v4227_v21 = vmul.f32 %v8238_v22, %v9449_v58 }
0x17ad   :  { %v4096_v36 = vpack.c.bf16 %v4095_v16, %v4093_v35  ;;  %v4225_v41 = vmul.f32 %v8240_v59, %v9442_v12  ;;  %v8242_v39 = vpop.eup %8241  ;;  %v8007_v59 = vld [vmem:[#allocation12 + $0x50] sm:$0xff]  }
0x17ae   :  { %v8244_v61 = vpop.eup %8243  ;;  %v4358_v38 = vmul.f32 %v8242_v39, %v9458_v19 }
0x17af   :  { %7452 = vmatmul.mubr.msk.bf16.vlgmr.msra.gmra.mrb[88].mxu1 %vm1284_vm1, %v4096_v36  ;;  %v4228_v45 = vpack.c.bf16 %v4227_v21, %v4225_v41  ;;  %v4356_v58 = vmul.f32 %v8244_v61, %v9446_v17  ;;  %v8246_v0 = vpop.eup %8245  ;;  %v8006_v36 = vld [vmem:[#allocation12 + $0x48] sm:$0xff]   ;;  %v8008_v41 = vld [vmem:[#allocation12 + $0x58] sm:$0xff]  }
0x17b0   :  { %7462 = vmatpush3.bf16.msra.mxu1 %v4230_v37  ;;  %7463 = vmatprep.mubr.msk.bf16.mxu1 %vm8641_vm0, %v8639_v27  ;;  %v8248_v2 = vpop.eup %8247  ;;  %v4489_v3 = vmul.f32 %v8246_v0, %v9466_v40 }
0x17b1   :  { %7473 = vmatprep.subr.bf16.mxu1 %v8639_v27  ;;  %v4359_v12 = vpack.c.bf16 %v4358_v38, %v4356_v58  ;;  %v4487_v17 = vmul.f32 %v8248_v2, %v9456_v20  ;;  %v8250_v4 = vpop.eup %8249  ;;  %v8010_v58 = vld [vmem:[#allocation12 + $0x68] sm:$0xff]   ;;  %v8012_v2 = vld [vmem:[#allocation12 + $0x78] sm:$0xff]  }
0x17b2   :  { %v8252_v33 = vpop.eup %8251  ;;  %v4620_v40 = vmul.f32 %v8250_v4, %v9476_v56 }
0x17b3   :  { %v4490_v43 = vpack.c.bf16 %v4489_v3, %v4487_v17  ;;  %v4618_v34 = vmul.f32 %v8252_v33, %v9472_v46 }
0x17b5   :  { %v4621_v20 = vpack.c.bf16 %v4620_v40, %v4618_v34 }
0x17b7   :  { %7464 = vmatmul.mubr.msk.bf16.vlgmr.msra.gmra.mrb[92].mxu1 %vm1284_vm1, %v4228_v45  ;;  %v8009_v45 = vld [vmem:[#allocation12 + $0x60] sm:$0xff]  }
0x17b8   :  { %7475 = vmatprep.mubr.msk.bf16.mxu1 %vm8641_vm0, %v8639_v27 }
0x17c8   :  { %v4744_v48 = vpop.xlane.xlu1 %4743 }
0x17cc   :  { %v4361_v32 = vpop.permute.xlu1 %4360 }
0x17cd   :  { %7474 = vmatpush3.bf16.msra.mxu1 %v4361_v32  ;;  %v8011_v32 = vld [vmem:[#allocation12 + $0x70] sm:$0xff]  }
0x17ce   :  { %7485 = vmatprep.subr.bf16.mxu1 %v8639_v27 }
0x17d0   :  { %v4492_v1 = vpop.permute.xlu1 %4491  ;;  %7476 = vmatmul.mubr.msk.bf16.vlgmr.msra.gmra.mrb[96].mxu1 %vm1284_vm1, %v4359_v12 }
0x17d1   :  { %7486 = vmatpush3.bf16.msra.mxu1 %v4492_v1  ;;  %7487 = vmatprep.mubr.msk.bf16.mxu1 %vm8641_vm0, %v8639_v27 }
0x17d2   :  { %7497 = vmatprep.subr.bf16.mxu1 %v8639_v27 }
0x17d4   :  { %v4747_v19 = vpop.xlane.xlu0 %4746  ;;  %v4754_v30 = vpop.permute.xlu1 %4753 }
0x17d5   :  { %8253 = vrcp.f32 %v4747_v19 }
0x17d6   :  { %8255 = vrcp.f32 %v4744_v48 }
0x17d8   :  { %7488 = vmatmul.mubr.msk.bf16.vlgmr.msra.gmra.mrb[100].mxu1 %vm1284_vm1, %v4490_v43  ;;  %v4875_v42 = vpop.xlane.xlu0 %4874  ;;  %v4885_v14 = vpop.permute.xlu1 %4884 }
0x17d9   :  { %7499 = vmatprep.mubr.msk.bf16.mxu1 %vm8641_vm0, %v8639_v27 }
0x17dc   :  { %v4878_v6 = vpop.xlane.xlu0 %4877 }
0x17dd   :  { %8257 = vrcp.f32 %v4878_v6 }
0x17de   :  { %8259 = vrcp.f32 %v4875_v42 }
0x17df   :  { %v8254_v60 = vpop.eup %8253 }
0x17e0   :  { %v4623_v47 = vpop.permute.xlu0 %4622  ;;  %v8256_v44 = vpop.eup %8255  ;;  %v4751_v56 = vmul.f32 %v8254_v60, %v9493_v11 }
0x17e1   :  { %7498 = vmatpush3.bf16.msra.mxu1 %v4623_v47  ;;  %v4749_v46 = vmul.f32 %v8256_v44, %v9488_v8 }
0x17e2   :  { %7509 = vmatprep.subr.bf16.mxu1 %v8639_v27 }
0x17e3   :  { %v4752_v55 = vpack.c.bf16 %v4751_v56, %v4749_v46 }
0x17e4   :  { %7500 = vmatmul.mubr.msk.bf16.vlgmr.msra.gmra.mrb[104].mxu1 %vm1284_vm1, %v4621_v20 }
0x17e5   :  { %7510 = vmatpush3.bf16.msra.mxu1 %v4754_v30  ;;  %7511 = vmatprep.mubr.msk.bf16.mxu1 %vm8641_vm0, %v8639_v27 }
0x17e6   :  { %7521 = vmatprep.subr.bf16.mxu1 %v8639_v27 }
0x17e7   :  { %v8258_v62 = vpop.eup %8257 }
0x17e8   :  { %v8260_v53 = vpop.eup %8259  ;;  %v4882_v18 = vmul.f32 %v8258_v62, %v9501_v57 }
0x17e9   :  { %v4880_v7 = vmul.f32 %v8260_v53, %v9497_v54  ;;  %v8005_v54 = vld [vmem:[#allocation12 + $0x40] sm:$0xff]  }
0x17ea   :  { %7528 = vmatpush3.bf16.msra.mxu0 %v8005_v54  ;;  %v8015_v54 = vld [vmem:[#allocation13 + $0x104] ss:$16 sps:$4 sm:$0xff]  }
0x17eb   :  { %v4883_v23 = vpack.c.bf16 %v4882_v18, %v4880_v7  ;;  %7529 = vmatprep.subr.bf16.mxu0 %v8639_v27  ;;  %v6762_v7 = vld [vmem:[%s9730_s27 + $0x1] ss:$0 sm:$0xff] }
0x17ec   :  { %7512 = vmatmul.mubr.msk.bf16.vlgmr.msra.gmra.mrb[108].mxu1 %vm1284_vm1, %v4752_v55 }
0x17ed   :  { %7522 = vmatpush3.bf16.msra.mxu1 %v4885_v14  ;;  %7523 = vmatprep.mubr.msk.bf16.mxu1 %vm8641_vm0, %v8639_v27 }
0x17ee   :  { %7530 = vmatpush3.bf16.msra.mxu0 %v8006_v36  ;;  %5319 = vmatprep.subr.bf16.mxu1 %v8015_v54  ;;  %v8064_v54 = vld [vmem:[#allocation15 + $0x180] sm:$0xff]  }
0x17ef   :  { %7531 = vmatprep.subr.bf16.mxu0 %v8639_v27 }
0x17f2   :  { %7532 = vmatpush3.bf16.msra.mxu0 %v8007_v59 }
0x17f3   :  { %7533 = vmatprep.subr.bf16.mxu0 %v8639_v27 }
0x17f4   :  { %7524 = vmatmul.mubr.msk.bf16.vlgmr.msra.gmra.mrb[112].mxu1 %vm1284_vm1, %v4883_v23 }
0x17f5   :  { %5351 = vmatprep.mubr.bf16.mxu1 %v8640_v50 }
0x17f6   :  { %7534 = vmatpush3.bf16.msra.mxu0 %v8008_v41 }
0x17f7   :  { %7535 = vmatprep.subr.bf16.mxu0 %v8639_v27 }
0x17fa   :  { %7536 = vmatpush3.bf16.msra.mxu0 %v8009_v45  ;;  %v8027_v45 = vld [vmem:[#allocation13 + $0x144] ss:$16 sps:$4 sm:$0xff]  }
0x17fb   :  { %7537 = vmatprep.subr.bf16.mxu0 %v8639_v27 }
0x17fe   :  { %7538 = vmatpush3.bf16.msra.mxu0 %v8010_v58  ;;  %v8036_v58 = vld [vmem:[#allocation13 + $0x16c] ss:$16 sps:$4 sm:$0xff]  }
0x17ff   :  { %7539 = vmatprep.subr.bf16.mxu0 %v8639_v27 }
0x1802   :  { %7540 = vmatpush3.bf16.msra.mxu0 %v8011_v32  ;;  %v8031_v32 = vld [vmem:[#allocation13 + $0x160] ss:$16 sps:$4 sm:$0xff]  }
0x1803   :  { %7541 = vmatprep.subr.bf16.mxu0 %v8639_v27 }
0x1806   :  { %7542 = vmatpush3.bf16.msra.mxu0 %v8012_v2  ;;  %v8037_v2 = vld [vmem:[#allocation13 + $0x180] ss:$16 sps:$4 sm:$0xff]  }
0x1882   :  { %v4138_v8 = vpop.f32.mrb[88].mxu1 }
0x1883   :  { %4147 = vrot.lane.b32.xlu1 %v4138_v8, %s8630_s3  ;;  %v7453_v11 = vpop.f32.mrb[89].mxu1 }
0x1884   :  { %v4141_v13 = vpop.f32.mrb[90].mxu1 }
0x1885   :  { %v7454_v26 = vpop.f32.mrb[91].mxu1 }
0x1887   :  { %4149 = vrot.lane.b32.xlu1 %v4141_v13, %s8630_s3  ;;  %s9738_s3 = sld [smem:[#allocation42_spill]] }
0x188a   :  { %v4269_v9 = vpop.f32.mrb[92].mxu1 }
0x188b   :  { %4278 = vrot.lane.b32.xlu1 %v4269_v9, %s8646_s23  ;;  %v7465_v52 = vpop.f32.mrb[93].mxu1 }
0x188c   :  { %v4272_v57 = vpop.f32.mrb[94].mxu1 }
0x188d   :  { %v7466_v15 = vpop.f32.mrb[95].mxu1 }
0x188e   :  { %v8013_v15 = vld [vmem:[#allocation13 + $0x100] ss:$16 sps:$4 sm:$0xff]  }
0x188f   :  { %4280 = vrot.lane.b32.xlu1 %v4272_v57, %s8646_s23  ;;  %5320 = vmatpush1.bf16.msra.mxu1 %v8013_v15  ;;  %v8063_v15 = vld [vmem:[#allocation15 + $0x100] sm:$0xff]  }
0x18a3   :  { %v4400_v31 = vpop.f32.mrb[96].mxu1 }
0x18a4   :  { %4409 = vrot.lane.b32.xlu0 %v4400_v31, %s8645_s28  ;;  %v7477_v63 = vpop.f32.mrb[97].mxu1  ;;  %v8016_v31 = vld [vmem:[#allocation13 + $0x108] ss:$16 sps:$4 sm:$0xff]  }
0x18a5   :  { %v4403_v10 = vpop.f32.mrb[98].mxu1  ;;  %v8018_v63 = vld [vmem:[#allocation13 + $0x10c] ss:$16 sps:$4 sm:$0xff]  }
0x18a6   :  { %4411 = vrot.lane.b32.xlu1 %v4403_v10, %s8645_s28  ;;  %v7478_v35 = vpop.f32.mrb[99].mxu1  ;;  %v8021_v10 = vld [vmem:[#allocation13 + $0x124] ss:$16 sps:$4 sm:$0xff]   ;;  %5362 = vmatprep.subr.bf16.mxu0 %v8018_v63  ;;  %v8065_v63 = vld [vmem:[#allocation15 + $0x148] sm:$0xff]  }
0x18a7   :  { %v8019_v35 = vld [vmem:[#allocation13 + $0x120] ss:$16 sps:$4 sm:$0xff]   ;;  %5321 = vmatprep.subr.bf16.mxu1 %v8021_v10  ;;  %v8066_v10 = vld [vmem:[#allocation15 + $0x1c8] sm:$0xff]  }
0x18a8   :  { %5322 = vmatpush1.bf16.msra.mxu1 %v8019_v35  ;;  %v8068_v35 = vld [vmem:[#allocation15 + $0x188] sm:$0xff]  }
0x18a9   :  { %5323 = vmatprep.subr.bf16.mxu1 %v8027_v45  ;;  %v8078_v45 = vld [vmem:[#allocation15 + $0x1e0] sm:$0xff]  }
0x18ab   :  { %v4531_v16 = vpop.f32.mrb[100].mxu1 }
0x18ac   :  { %4540 = vrot.lane.b32.xlu0 %v4531_v16, %s8623_s1  ;;  %v7489_v22 = vpop.f32.mrb[101].mxu1  ;;  %v8022_v16 = vld [vmem:[#allocation13 + $0x128] ss:$16 sps:$4 sm:$0xff]  }
0x18ad   :  { %v4534_v37 = vpop.f32.mrb[102].mxu1 }
0x18ae   :  { %4542 = vrot.lane.b32.xlu1 %v4534_v37, %s8623_s1  ;;  %v7490_v21 = vpop.f32.mrb[103].mxu1  ;;  %s9737_s1 = sld [smem:[#allocation43_spill]] }
0x18b7   :  { %v4662_v39 = vpop.f32.mrb[104].mxu1 }
0x18b8   :  { %4671 = vrot.lane.b32.xlu0 %v4662_v39, %s8644_s4  ;;  %v7501_v48 = vpop.f32.mrb[105].mxu1  ;;  %v8030_v39 = vld [vmem:[#allocation13 + $0x14c] ss:$16 sps:$4 sm:$0xff]  }
0x18b9   :  { %v4665_v61 = vpop.f32.mrb[106].mxu1  ;;  %v8025_v48 = vld [vmem:[#allocation13 + $0x140] ss:$16 sps:$4 sm:$0xff]  }
0x18ba   :  { %4673 = vrot.lane.b32.xlu1 %v4665_v61, %s8644_s4  ;;  %v7502_v38 = vpop.f32.mrb[107].mxu1  ;;  %v8028_v61 = vld [vmem:[#allocation13 + $0x148] ss:$16 sps:$4 sm:$0xff]   ;;  %5324 = vmatpush1.bf16.msra.mxu1 %v8025_v48  ;;  %v8080_v48 = vld [vmem:[#allocation15 + $0x1a0] sm:$0xff]  }
0x18bb   :  { %v8033_v38 = vld [vmem:[#allocation13 + $0x164] ss:$16 sps:$4 sm:$0xff]  }
0x18bc   :  { %5325 = vmatprep.subr.bf16.mxu1 %v8033_v38  ;;  %v8082_v38 = vld [vmem:[#allocation15 + $0x1e8] sm:$0xff]  }
0x18be   :  { %5326 = vmatpush1.bf16.msra.mxu1 %v8031_v32  ;;  %v8084_v32 = vld [vmem:[#allocation15 + $0x1a8] sm:$0xff]  }
0x18bf   :  { %v4793_v12 = vpop.f32.mrb[108].mxu1 }
0x18c0   :  { %4802 = vrot.lane.b32.xlu0 %v4793_v12, %s8643_s19  ;;  %v7513_v0 = vpop.f32.mrb[109].mxu1  ;;  %v8034_v12 = vld [vmem:[#allocation13 + $0x168] ss:$16 sps:$4 sm:$0xff]  }
0x18c1   :  { %v4796_v1 = vpop.f32.mrb[110].mxu1  ;;  %v8039_v0 = vld [vmem:[#allocation13 + $0x184] ss:$16 sps:$4 sm:$0xff]  }
0x18c2   :  { %4804 = vrot.lane.b32.xlu1 %v4796_v1, %s8643_s19  ;;  %v7514_v3 = vpop.f32.mrb[111].mxu1  ;;  %v8042_v1 = vld [vmem:[#allocation13 + $0x18c] ss:$16 sps:$4 sm:$0xff]   ;;  %5327 = vmatprep.subr.bf16.mxu1 %v8039_v0  ;;  %v8086_v0 = vld [vmem:[#allocation15 + $0x1f0] sm:$0xff]  }
0x18c3   :  { %v8040_v3 = vld [vmem:[#allocation13 + $0x188] ss:$16 sps:$4 sm:$0xff]   ;;  %5328 = vmatpush1.bf16.msra.mxu1 %v8037_v2  ;;  %v8088_v2 = vld [vmem:[#allocation15 + $0x1b0] sm:$0xff]  }
0x18c7   :  { %v4924_v17 = vpop.f32.mrb[112].mxu1 }
0x18c8   :  { %4933 = vrot.lane.b32.xlu0 %v4924_v17, %s8642_s21  ;;  %v7525_v19 = vpop.f32.mrb[113].mxu1  ;;  %v8045_v17 = vld [vmem:[#allocation13 + $0x1a4] ss:$16 sps:$4 sm:$0xff]  }
0x18c9   :  { %v4927_v43 = vpop.f32.mrb[114].mxu1  ;;  %v8048_v19 = vld [vmem:[#allocation13 + $0x1ac] ss:$16 sps:$4 sm:$0xff]   ;;  %5329 = vmatprep.subr.bf16.mxu1 %v8045_v17 }
0x18ca   :  { %4935 = vrot.lane.b32.xlu1 %v4927_v43, %s8642_s21  ;;  %v7526_v42 = vpop.f32.mrb[115].mxu1  ;;  %v8043_v43 = vld [vmem:[#allocation13 + $0x1a0] ss:$16 sps:$4 sm:$0xff]   ;;  %v8090_v17 = vld [vmem:[#allocation15 + $0x1f8] sm:$0xff]  }
0x18cb   :  { %v8046_v42 = vld [vmem:[#allocation13 + $0x1a8] ss:$16 sps:$4 sm:$0xff]   ;;  %5330 = vmatpush1.bf16.msra.mxu1 %v8043_v43 }
0x18cc   :  { %v8092_v43 = vld [vmem:[#allocation15 + $0x1b8] sm:$0xff]  }
0x18f5   :  { %v4148_v4 = vpop.permute.xlu1 %4147 }
0x18f6   :  { %4153 = vst.msk [vmem:[#allocation2] sm:$0xff] %vm1983_vm2, %v4148_v4  ;;  %v8051_v4 = vld [vmem:[#allocation13 + $0x1c4] ss:$16 sps:$4 sm:$0xff]  }
0x18f7   :  { %5331 = vmatprep.subr.bf16.mxu1 %v8051_v4 }
0x18f9   :  { %v4150_v6 = vpop.permute.xlu1 %4149 }
0x18fa   :  { %4154 = vst.msk [vmem:[#allocation2 + $0x8] sm:$0xff] %vm1983_vm2, %v4150_v6  ;;  %v8054_v6 = vld [vmem:[#allocation13 + $0x1cc] ss:$16 sps:$4 sm:$0xff]  }
0x18fd   :  { %v4279_v33 = vpop.permute.xlu1 %4278 }
0x18fe   :  { %4284 = vst.msk [vmem:[#allocation2] sm:$0xff] %vm2115_vm3, %v4279_v33  ;;  %v8049_v33 = vld [vmem:[#allocation13 + $0x1c0] ss:$16 sps:$4 sm:$0xff]  }
0x18ff   :  { %5332 = vmatpush1.bf16.msra.mxu1 %v8049_v33 }
0x1901   :  { %v4281_v40 = vpop.permute.xlu1 %4280 }
0x1902   :  { %4285 = vst.msk [vmem:[#allocation2 + $0x8] sm:$0xff] %vm2115_vm3, %v4281_v40  ;;  %v8052_v40 = vld [vmem:[#allocation13 + $0x1c8] ss:$16 sps:$4 sm:$0xff]  }
0x1916   :  { %v4410_v34 = vpop.permute.xlu0 %4409 }
0x1917   :  { %4415 = vst.msk [vmem:[#allocation2] sm:$0xff] %vm2247_vm4, %v4410_v34  ;;  %v8057_v34 = vld [vmem:[#allocation13 + $0x1e4] ss:$16 sps:$4 sm:$0xff]  }
0x1918   :  { %v4412_v47 = vpop.permute.xlu1 %4411  ;;  %5333 = vmatprep.subr.bf16.mxu1 %v8057_v34 }
0x1919   :  { %4416 = vst.msk [vmem:[#allocation2 + $0x8] sm:$0xff] %vm2247_vm4, %v4412_v47  ;;  %v8060_v47 = vld [vmem:[#allocation13 + $0x1ec] ss:$16 sps:$4 sm:$0xff]  }
0x191e   :  { %v4541_v20 = vpop.permute.xlu0 %4540 }
0x191f   :  { %4546 = vst.msk [vmem:[#allocation2] sm:$0xff] %vm2379_vm5, %v4541_v20  ;;  %v8055_v20 = vld [vmem:[#allocation13 + $0x1e0] ss:$16 sps:$4 sm:$0xff]  }
0x1920   :  { %v4543_v60 = vpop.permute.xlu1 %4542  ;;  %5334 = vmatpush1.bf16.msra.mxu1 %v8055_v20 }
0x1921   :  { %4547 = vst.msk [vmem:[#allocation2 + $0x8] sm:$0xff] %vm2379_vm5, %v4543_v60  ;;  %v8058_v60 = vld [vmem:[#allocation13 + $0x1e8] ss:$16 sps:$4 sm:$0xff]  }
0x192a   :  { %v4672_v30 = vpop.permute.xlu0 %4671 }
0x192b   :  { %4677 = vst.msk [vmem:[#allocation2] sm:$0xff] %vm2511_vm6, %v4672_v30  ;;  %v8061_v30 = vld [vmem:[#allocation15 + $0x140] sm:$0xff]  }
0x192c   :  { %v4674_v44 = vpop.permute.xlu1 %4673  ;;  %7129 = vmatprep.subr.bf16.mxu1 %v8061_v30 }
0x192d   :  { %4678 = vst.msk [vmem:[#allocation2 + $0x8] sm:$0xff] %vm2511_vm6, %v4674_v44  ;;  %v8062_v44 = vld [vmem:[#allocation15 + $0x1c0] sm:$0xff]  }
0x1932   :  { %v4803_v56 = vpop.permute.xlu0 %4802 }
0x1933   :  { %4808 = vst.msk [vmem:[#allocation2] sm:$0xff] %vm2643_vm7, %v4803_v56 }
0x1934   :  { %v4805_v46 = vpop.permute.xlu1 %4804 }
0x1935   :  { %4809 = vst.msk [vmem:[#allocation2 + $0x8] sm:$0xff] %vm2643_vm7, %v4805_v46 }
0x193a   :  { %v4934_v55 = vpop.permute.xlu0 %4933 }
0x193b   :  { %4939 = vst.msk [vmem:[#allocation2] sm:$0xff] %vm2775_vm8, %v4934_v55 }
0x193c   :  { %v4936_v62 = vpop.permute.xlu1 %4935 }
0x193d   :  { %4940 = vst.msk [vmem:[#allocation2 + $0x8] sm:$0xff] %vm2775_vm8, %v4936_v62 }
0x1942   :  { %v4941_v14 = vld [vmem:[#allocation2] sm:$0xff] }
0x1944   :  { %v4942_v53 = vld [vmem:[#allocation2 + $0x8] sm:$0xff] }
0x1945   :  { %v4960_v18 = vpack.c.bf16 %v4942_v53, %v4941_v14 }
0x1947   :  { %7544 = vmatmul.mubr.bf16.vlgmr.msra.gmra.mrb[84].mxu0 %v4960_v18 }
0x1948   :  { %5394 = vmatprep.mubr.bf16.mxu0 %v8640_v50  ;;  %v8024_v50 = vld [vmem:[#allocation13 + $0x12c] ss:$16 sps:$4 sm:$0xff]   ;;  %5363 = vmatpush1.bf16.msra.mxu0 %v8016_v31 }
0x1949   :  { %5364 = vmatprep.subr.bf16.mxu0 %v8024_v50  ;;  %v8067_v50 = vld [vmem:[#allocation15 + $0x108] sm:$0xff]  }
0x194c   :  { %5365 = vmatpush1.bf16.msra.mxu0 %v8022_v16  ;;  %v8069_v16 = vld [vmem:[#allocation15 + $0x150] sm:$0xff]  }
0x194d   :  { %5366 = vmatprep.subr.bf16.mxu0 %v8030_v39  ;;  %v8079_v39 = vld [vmem:[#allocation15 + $0x120] sm:$0xff]  }
0x1950   :  { %5367 = vmatpush1.bf16.msra.mxu0 %v8028_v61  ;;  %v8081_v61 = vld [vmem:[#allocation15 + $0x168] sm:$0xff]  }
0x1951   :  { %5368 = vmatprep.subr.bf16.mxu0 %v8036_v58  ;;  %v8083_v58 = vld [vmem:[#allocation15 + $0x128] sm:$0xff]  }
0x1954   :  { %5369 = vmatpush1.bf16.msra.mxu0 %v8034_v12  ;;  %v8085_v12 = vld [vmem:[#allocation15 + $0x170] sm:$0xff]  }
0x1955   :  { %5370 = vmatprep.subr.bf16.mxu0 %v8042_v1  ;;  %v8087_v1 = vld [vmem:[#allocation15 + $0x130] sm:$0xff]  }
0x1958   :  { %5371 = vmatpush1.bf16.msra.mxu0 %v8040_v3  ;;  %v8089_v3 = vld [vmem:[#allocation15 + $0x178] sm:$0xff]  }
0x1959   :  { %5372 = vmatprep.subr.bf16.mxu0 %v8048_v19  ;;  %v8091_v19 = vld [vmem:[#allocation15 + $0x138] sm:$0xff]  }
0x195c   :  { %5373 = vmatpush1.bf16.msra.mxu0 %v8046_v42  ;;  %v6775_v42 = vld [vmem:[%s9733_s5 + $0x4] sm:$0xf] }
0x195d   :  { %5374 = vmatprep.subr.bf16.mxu0 %v8054_v6  ;;  %v5142_v4 = vrot.slane %v6775_v42, %v8939_v25  ;;  %v5150_v6 = vrot.slane %v6775_v42, %v8943_v28  ;;  %v5146_v33 = vrot.slane %v6775_v42, %v8946_v29 }
0x1960   :  { %5375 = vmatpush1.bf16.msra.mxu0 %v8052_v40  ;;  %v5154_v40 = vrot.slane %v6775_v42, %v2985_v5 }
0x1961   :  { %5376 = vmatprep.subr.bf16.mxu0 %v8060_v47 }
0x1964   :  { %5377 = vmatpush1.bf16.msra.mxu0 %v8058_v60 }
0x1965   :  { %7151 = vmatprep.subr.bf16.mxu0 %v8062_v44 }
0x1a1a   :  { %v5051_v23 = vpop.f32.mrb[84].mxu0 }
0x1a1b   :  { %v5052_v8 = vadd.f32 %v6762_v7, %v5051_v23  ;;  %v7545_v11 = vpop.f32.mrb[85].mxu0  ;;  %v6773_v23 = vld [vmem:[%s9731_s26 + $0x1] ss:$0 sm:$0xff] }
0x1a1c   :  { %v5054_v13 = vpop.f32.mrb[86].mxu0 }
0x1a1d   :  { %v5058_v26 = vadd.f32 %v5052_v8, %v9309_v49  ;;  %v5055_v9 = vadd.f32 %v6762_v7, %v5054_v13  ;;  %v7546_v52 = vpop.f32.mrb[87].mxu0 }
0x1a1f   :  { %v5059_v57 = vadd.f32 %v5055_v9, %v9311_v51  ;;  %5064 = vadd.xlane.f32.xlu0 %v5058_v26 }
0x1a21   :  { %5066 = vadd.xlane.f32.xlu1 %v5059_v57 }
0x1aac   :  { %v5065_v49 = vpop.xlane.xlu0 %5064 }
0x1aad   :  { %v5068_v51 = vmul.f32 0.0078125, %v5065_v49  ;;  %v8070_v49 = vld [vmem:[#allocation15 + $0x1d0] sm:$0xff]  }
0x1aae   :  { %v5067_v36 = vpop.xlane.xlu1 %5066 }
0x1aaf   :  { %v9593_v22 = vsub.f32 %v5058_v26, %v5068_v51  ;;  %v5069_v37 = vmul.f32 0.0078125, %v5067_v36  ;;  %v6774_v26 = vld [vmem:[%s9732_s0 + $0x1] ss:$0 sm:$0xff] }
0x1ab0   :  { %v8071_v51 = vld [vmem:[#allocation15 + $0x110] sm:$0xff]  }
0x1ab1   :  { %v9595_v59 = vsub.f32 %v5059_v57, %v5069_v37  ;;  %v5072_v21 = vmul.f32 %v9593_v22, %v9593_v22  ;;  %v8072_v36 = vld [vmem:[#allocation15 + $0x190] sm:$0xff]   ;;  %v8074_v37 = vld [vmem:[#allocation15 + $0x1d8] sm:$0xff]  }
0x1ab3   :  { %5074 = vadd.xlane.f32.xlu0 %v5072_v21  ;;  %v5073_v41 = vmul.f32 %v9595_v59, %v9595_v59  ;;  %v8076_v21 = vld [vmem:[#allocation15 + $0x198] sm:$0xff]  }
0x1ab7   :  { %5076 = vadd.xlane.f32.xlu0 %v5073_v41  ;;  %v8077_v41 = vld [vmem:[#allocation15 + $0x160] sm:$0xff]  }
0x1b40   :  { %v5075_v56 = vpop.xlane.xlu0 %5074 }
0x1b41   :  { %v5078_v46 = vmul.f32 0.0078125, %v5075_v56 }
0x1b43   :  { %v5080_v55 = vadd.f32 1e-05, %v5078_v46 }
0x1b44   :  { %v5077_v62 = vpop.xlane.xlu0 %5076 }
0x1b45   :  { %8261 = vrsqrt.f32 %v5080_v55  ;;  %v5079_v14 = vmul.f32 0.0078125, %v5077_v62 }
0x1b47   :  { %v5081_v53 = vadd.f32 1e-05, %v5079_v14 }
0x1b49   :  { %8263 = vrsqrt.f32 %v5081_v53 }
0x1b4f   :  { %v8262_v18 = vpop.eup %8261 }
0x1b50   :  { %v5084_v7 = vmul.f32 %v8262_v18, %v9593_v22  ;;  %v8073_v22 = vld [vmem:[#allocation15 + $0x158] sm:$0xff]  }
0x1b52   :  { %v5092_v13 = vmul.f32 %v6773_v23, %v5084_v7 }
0x1b53   :  { %v8264_v8 = vpop.eup %8263 }
0x1b54   :  { %v5085_v11 = vmul.f32 %v8264_v8, %v9595_v59  ;;  %v9605_v52 = vadd.f32 %v6774_v26, %v5092_v13  ;;  %v8075_v59 = vld [vmem:[#allocation15 + $0x118] sm:$0xff]  }
0x1b56   :  { %v5093_v9 = vmul.f32 %v6773_v23, %v5085_v11 }
0x1b58   :  { %v9607_v57 = vadd.f32 %v6774_v26, %v5093_v9 }
0x1b5a   :  { %v5135_v31 = vpack.c.bf16 %v9607_v57, %v9605_v52 }
0x1b5c   :  { %5352 = vmatmul.mubr.bf16.vlgmr.msra.gmra.mrb[116].mxu1 %v5135_v31  ;;  %5395 = vmatmul.mubr.bf16.vlgmr.msra.gmra.mrb[88].mxu0 %v5135_v31 }
0x1b5d   :  { %7130 = vmatpush3.bf16.msra.mxu1 %v8063_v15  ;;  %7152 = vmatpush3.bf16.msra.mxu0 %v8064_v54 }
0x1b5e   :  { %7131 = vmatprep.subr.bf16.mxu1 %v8065_v63  ;;  %7153 = vmatprep.subr.bf16.mxu0 %v8066_v10 }
0x1b61   :  { %7132 = vmatpush3.bf16.msra.mxu1 %v8067_v50  ;;  %7154 = vmatpush3.bf16.msra.mxu0 %v8068_v35  ;;  %v6809_v35 = vld [vmem:[%s9734_s2 + $0x1] ss:$0 sm:$0xff] }
0x1b62   :  { %7133 = vmatprep.subr.bf16.mxu1 %v8069_v16  ;;  %7155 = vmatprep.subr.bf16.mxu0 %v8070_v49 }
0x1b65   :  { %7134 = vmatpush3.bf16.msra.mxu1 %v8071_v51  ;;  %7156 = vmatpush3.bf16.msra.mxu0 %v8072_v36 }
0x1b66   :  { %7135 = vmatprep.subr.bf16.mxu1 %v8073_v22  ;;  %7157 = vmatprep.subr.bf16.mxu0 %v8074_v37 }
0x1b69   :  { %7136 = vmatpush3.bf16.msra.mxu1 %v8075_v59  ;;  %7158 = vmatpush3.bf16.msra.mxu0 %v8076_v21 }
0x1b6a   :  { %7137 = vmatprep.subr.bf16.mxu1 %v8077_v41  ;;  %7159 = vmatprep.subr.bf16.mxu0 %v8078_v45 }
0x1b6d   :  { %7138 = vmatpush3.bf16.msra.mxu1 %v8079_v39  ;;  %7160 = vmatpush3.bf16.msra.mxu0 %v8080_v48 }
0x1b6e   :  { %7139 = vmatprep.subr.bf16.mxu1 %v8081_v61  ;;  %7161 = vmatprep.subr.bf16.mxu0 %v8082_v38 }
0x1b71   :  { %7140 = vmatpush3.bf16.msra.mxu1 %v8083_v58  ;;  %7162 = vmatpush3.bf16.msra.mxu0 %v8084_v32 }
0x1b72   :  { %7141 = vmatprep.subr.bf16.mxu1 %v8085_v12  ;;  %7163 = vmatprep.subr.bf16.mxu0 %v8086_v0  ;;  %v8093_v12 = vld [vmem:[#allocation16] sm:$0xff]  }
0x1b73   :  { %v8094_v0 = vld [vmem:[#allocation18] sm:$0xff]  }
0x1b75   :  { %7142 = vmatpush3.bf16.msra.mxu1 %v8087_v1  ;;  %7164 = vmatpush3.bf16.msra.mxu0 %v8088_v2  ;;  %v8095_v1 = vld [vmem:[#allocation16 + $0x8] sm:$0xff]  }
0x1b76   :  { %7143 = vmatprep.subr.bf16.mxu1 %v8089_v3  ;;  %7165 = vmatprep.subr.bf16.mxu0 %v8090_v17  ;;  %v8096_v2 = vld [vmem:[#allocation18 + $0x8] sm:$0xff]  }
0x1b79   :  { %7144 = vmatpush3.bf16.msra.mxu1 %v8091_v19  ;;  %7166 = vmatpush3.bf16.msra.mxu0 %v8092_v43 }
0x1b7a   :  { %7547 = vmatprep.subr.bf16.mxu1 %v8639_v27  ;;  %7567 = vmatprep.subr.bf16.mxu0 %v8639_v27 }
0x1c2f   :  { %v5353_v34 = vpop.f32.mrb[116].mxu1  ;;  %v5396_v47 = vpop.f32.mrb[88].mxu0 }
0x1c30   :  { %v5354_v20 = vadd.f32 %v5353_v34, %v5142_v4  ;;  %v5397_v60 = vadd.f32 %v5396_v47, %v5150_v6  ;;  %v5355_v30 = vpop.f32.mrb[117].mxu1  ;;  %v5398_v44 = vpop.f32.mrb[89].mxu0  ;;  %v8100_v34 = vld [vmem:[#allocation18 + $0x18] sm:$0xff]   ;;  %v8101_v47 = vld [vmem:[#allocation16 + $0x20] sm:$0xff]  }
0x1c31   :  { %v5356_v56 = vadd.f32 %v5355_v30, %v5146_v33  ;;  %v5399_v46 = vadd.f32 %v5398_v44, %v5154_v40  ;;  %v5357_v55 = vpop.f32.mrb[118].mxu1  ;;  %v5400_v62 = vpop.f32.mrb[90].mxu0  ;;  %v8104_v30 = vld [vmem:[#allocation18 + $0x28] sm:$0xff]   ;;  %v8105_v44 = vld [vmem:[#allocation16 + $0x30] sm:$0xff]  }
0x1c32   :  { %v5358_v14 = vadd.f32 %v5357_v55, %v5142_v4  ;;  %v5401_v53 = vadd.f32 %v5400_v62, %v5150_v6  ;;  %v5359_v18 = vpop.f32.mrb[119].mxu1  ;;  %v5402_v7 = vpop.f32.mrb[91].mxu0  ;;  %v5405_v29 = vmax.f32 %v5354_v20, 0.0  ;;  %v5407_v8 = vmax.f32 %v5397_v60, 0.0  ;;  %v8097_v6 = vld [vmem:[#allocation16 + $0x10] sm:$0xff]   ;;  %v8102_v20 = vld [vmem:[#allocation18 + $0x20] sm:$0xff]  }
0x1c33   :  { %v5360_v28 = vadd.f32 %v5359_v18, %v5146_v33  ;;  %v5403_v23 = vadd.f32 %v5402_v7, %v5154_v40  ;;  %v5406_v11 = vmax.f32 %v5356_v56, 0.0  ;;  %v5408_v13 = vmax.f32 %v5399_v46, 0.0  ;;  %v8098_v33 = vld [vmem:[#allocation18 + $0x10] sm:$0xff]   ;;  %v8099_v40 = vld [vmem:[#allocation16 + $0x18] sm:$0xff]   ;;  %v8103_v60 = vld [vmem:[#allocation16 + $0x28] sm:$0xff]  }
0x1c34   :  { %v5409_v24 = vmax.f32 %v5358_v14, 0.0  ;;  %v5411_v5 = vmax.f32 %v5401_v53, 0.0  ;;  %v8106_v56 = vld [vmem:[#allocation18 + $0x30] sm:$0xff]   ;;  %v8107_v46 = vld [vmem:[#allocation16 + $0x38] sm:$0xff]  }
0x1c35   :  { %v5410_v26 = vmax.f32 %v5360_v28, 0.0  ;;  %v5412_v9 = vmax.f32 %v5403_v23, 0.0  ;;  %v8108_v55 = vld [vmem:[#allocation18 + $0x38] sm:$0xff]  }
0x1c36   :  { %v5478_v15 = vpack.c.bf16 %v5409_v24, %v5405_v29  ;;  %v5480_v54 = vpack.c.bf16 %v5411_v5, %v5407_v8  ;;  %v6844_v29 = vld [vmem:[%s9735_s25 + $0x1] ss:$0 sm:$0xff] }
0x1c37   :  { %v5479_v31 = vpack.c.bf16 %v5410_v26, %v5406_v11  ;;  %v5481_v63 = vpack.c.bf16 %v5412_v9, %v5408_v13  ;;  %v6845_v13 = vld [vmem:[%s9736_s10 + $0x1] ss:$0 sm:$0xff] }
0x1c39   :  { %5714 = vmatprep.mubr.bf16.mxu1 %v5479_v31  ;;  %5755 = vmatprep.mubr.bf16.mxu0 %v5481_v63  ;;  %v8647_v31 = vmov 0.0|0.0   ;;  %v6050_v63 = vld [vmem:[#allocation3] sm:$0x1] }
0x1c3a   :  { %5715 = vmatmul.mubr.bf16.vlgmr.msra.gmra.mrb[120].mxu1 %v5478_v15  ;;  %5756 = vmatmul.mubr.bf16.vlgmr.msra.gmra.mrb[92].mxu0 %v5480_v54 }
0x1c3b   :  { %7563 = vmatprep.mubr.msk.bf16.mxu1 %vm8641_vm0, %v8639_v27  ;;  %7583 = vmatprep.mubr.msk.bf16.mxu0 %vm8641_vm0, %v8639_v27 }
0x1c3c   :  { %7548 = vmatpush3.bf16.msra.mxu1 %v8093_v12  ;;  %7568 = vmatpush3.bf16.msra.mxu0 %v8094_v0 }
0x1c3d   :  { %7549 = vmatprep.subr.bf16.mxu1 %v8639_v27  ;;  %7569 = vmatprep.subr.bf16.mxu0 %v8639_v27 }
0x1c40   :  { %7550 = vmatpush3.bf16.msra.mxu1 %v8095_v1  ;;  %7570 = vmatpush3.bf16.msra.mxu0 %v8096_v2 }
0x1c41   :  { %7551 = vmatprep.subr.bf16.mxu1 %v8639_v27  ;;  %7571 = vmatprep.subr.bf16.mxu0 %v8639_v27 }
0x1c44   :  { %7552 = vmatpush3.bf16.msra.mxu1 %v8097_v6  ;;  %7572 = vmatpush3.bf16.msra.mxu0 %v8098_v33 }
0x1c45   :  { %7553 = vmatprep.subr.bf16.mxu1 %v8639_v27  ;;  %7573 = vmatprep.subr.bf16.mxu0 %v8639_v27 }
0x1c48   :  { %7554 = vmatpush3.bf16.msra.mxu1 %v8099_v40  ;;  %7574 = vmatpush3.bf16.msra.mxu0 %v8100_v34 }
0x1c49   :  { %7555 = vmatprep.subr.bf16.mxu1 %v8639_v27  ;;  %7575 = vmatprep.subr.bf16.mxu0 %v8639_v27 }
0x1c4c   :  { %7556 = vmatpush3.bf16.msra.mxu1 %v8101_v47  ;;  %7576 = vmatpush3.bf16.msra.mxu0 %v8102_v20 }
0x1c4d   :  { %7557 = vmatprep.subr.bf16.mxu1 %v8639_v27  ;;  %7577 = vmatprep.subr.bf16.mxu0 %v8639_v27 }
0x1c50   :  { %7558 = vmatpush3.bf16.msra.mxu1 %v8103_v60  ;;  %7578 = vmatpush3.bf16.msra.mxu0 %v8104_v30 }
0x1c51   :  { %7559 = vmatprep.subr.bf16.mxu1 %v8639_v27  ;;  %7579 = vmatprep.subr.bf16.mxu0 %v8639_v27 }
0x1c54   :  { %7560 = vmatpush3.bf16.msra.mxu1 %v8105_v44  ;;  %7580 = vmatpush3.bf16.msra.mxu0 %v8106_v56 }
0x1c55   :  { %7561 = vmatprep.subr.bf16.mxu1 %v8639_v27  ;;  %7581 = vmatprep.subr.bf16.mxu0 %v8639_v27 }
0x1c58   :  { %7562 = vmatpush3.bf16.msra.mxu1 %v8107_v46  ;;  %7582 = vmatpush3.bf16.msra.mxu0 %v8108_v55  ;;  %v8109_v46 = vld [vmem:[#allocation19] sm:$0xff]  }
0x1c59   :  { %7656 = vmatprep.subr.bf16.mxu1 %v8647_v31  ;;  %7662 = vmatprep.subr.bf16.mxu0 %v8647_v31 }
0x1d0d   :  { %v7145_v10 = vpop.f32.mrb[120].mxu1  ;;  %v7167_v50 = vpop.f32.mrb[92].mxu0 }
0x1d0e   :  { %v7146_v16 = vpop.f32.mrb[121].mxu1  ;;  %v7168_v49 = vpop.f32.mrb[93].mxu0 }
0x1d0f   :  { %v7147_v51 = vadd.f32 %v7146_v16, %v7145_v10  ;;  %v7169_v36 = vadd.f32 %v7168_v49, %v7167_v50  ;;  %v7148_v22 = vpop.f32.mrb[122].mxu1  ;;  %v7170_v37 = vpop.f32.mrb[94].mxu0  ;;  %v6855_v10 = vld [vmem:[%s9737_s1] ss:$0 sm:$0xff] }
0x1d10   :  { %v7149_v59 = vpop.f32.mrb[123].mxu1  ;;  %v7171_v21 = vpop.f32.mrb[95].mxu0 }
0x1d11   :  { %v5717_v41 = vadd.f32 %v7147_v51, %v6809_v35  ;;  %v7150_v45 = vadd.f32 %v7149_v59, %v7148_v22  ;;  %v7172_v39 = vadd.f32 %v7171_v21, %v7170_v37 }
0x1d13   :  { %v5758_v48 = vadd.f32 %v7169_v36, %v5717_v41  ;;  %v5720_v61 = vadd.f32 %v7150_v45, %v6809_v35 }
0x1d15   :  { %v5761_v38 = vadd.f32 %v7172_v39, %v5720_v61  ;;  %v5764_v58 = vadd.f32 %v5758_v48, %v9605_v52  ;;  %v6846_v39 = vld [vmem:[%s9738_s3] ss:$0 sm:$0xff] }
0x1d17   :  { %5770 = vadd.xlane.f32.xlu0 %v5764_v58  ;;  %v5765_v32 = vadd.f32 %v5761_v38, %v9607_v57 }
0x1d19   :  { %5772 = vadd.xlane.f32.xlu1 %v5765_v32 }
0x1da4   :  { %v5771_v52 = vpop.xlane.xlu0 %5770 }
0x1da5   :  { %v5774_v3 = vmul.f32 0.0078125, %v5771_v52 }
0x1da6   :  { %v5773_v57 = vpop.xlane.xlu1 %5772 }
0x1da7   :  { %v5776_v17 = vsub.f32 %v5764_v58, %v5774_v3  ;;  %v5775_v19 = vmul.f32 0.0078125, %v5773_v57 }
0x1da9   :  { %v5777_v43 = vsub.f32 %v5765_v32, %v5775_v19  ;;  %v5778_v42 = vmul.f32 %v5776_v17, %v5776_v17  ;;  %v6049_v19 = vld [vmem:[%s9739_s7] sm:$0x1] }
0x1dab   :  { %5780 = vadd.xlane.f32.xlu0 %v5778_v42  ;;  %v5779_v4 = vmul.f32 %v5777_v43, %v5777_v43 }
0x1dad   :  { %5782 = vadd.xlane.f32.xlu1 %v5779_v4 }
0x1dc1   :  { %6053 = vperm.xlu0 %7748, %v6050_v63   ;;  %v6331_v63 = vld [vmem:[%s8794_s20 + $0x40] sm:$0xff] }
0x1e38   :  { %v5781_v62 = vpop.xlane.xlu0 %5780 }
0x1e39   :  { %v5784_v14 = vmul.f32 0.0078125, %v5781_v62  ;;  %v8111_v62 = vld [vmem:[#allocation19 + $0x10] sm:$0xff]  }
0x1e3a   :  { %v5783_v53 = vpop.xlane.xlu1 %5782 }
0x1e3b   :  { %v5786_v18 = vadd.f32 1e-05, %v5784_v14  ;;  %v5785_v7 = vmul.f32 0.0078125, %v5783_v53  ;;  %v8112_v14 = vld [vmem:[#allocation19 + $0x18] sm:$0xff]   ;;  %v8113_v53 = vld [vmem:[#allocation19 + $0x20] sm:$0xff]  }
0x1e3d   :  { %8265 = vrsqrt.f32 %v5786_v18  ;;  %v5787_v28 = vadd.f32 1e-05, %v5785_v7  ;;  %v8114_v18 = vld [vmem:[#allocation19 + $0x28] sm:$0xff]   ;;  %v8115_v7 = vld [vmem:[#allocation19 + $0x30] sm:$0xff]  }
0x1e3f   :  { %8267 = vrsqrt.f32 %v5787_v28  ;;  %v8116_v28 = vld [vmem:[#allocation19 + $0x38] sm:$0xff]  }
0x1e47   :  { %v8266_v23 = vpop.eup %8265 }
0x1e48   :  { %v5790_v8 = vmul.f32 %v8266_v23, %v5776_v17  ;;  %v6323_v23 = vld [vmem:[%s8794_s20] sm:$0xff] }
0x1e49   :  { %v8268_v24 = vpop.eup %8267 }
0x1e4a   :  { %v5791_v5 = vmul.f32 %v8268_v24, %v5777_v43  ;;  %v5798_v11 = vmul.f32 %v6844_v29, %v5790_v8  ;;  %v6054_v43 = vpop.permute.xlu0 %6053  ;;  %v6325_v8 = vld [vmem:[%s8794_s20 + $0x10] sm:$0xff] }
0x1e4b   :  { %v6059_v42 = vrot.slane %v6054_v43, %v8939_v25  ;;  %v8110_v25 = vld [vmem:[#allocation19 + $0x8] sm:$0xff]  }
0x1e4c   :  { %v5799_v26 = vmul.f32 %v6844_v29, %v5791_v5  ;;  %v5806_v9 = vadd.f32 %v6845_v13, %v5798_v11  ;;  %v6324_v29 = vld [vmem:[%s8794_s20 + $0x8] sm:$0xff]  ;;  %v6326_v5 = vld [vmem:[%s8794_s20 + $0x18] sm:$0xff] }
0x1e4d   :  { %v7663_v24 = vpack.c.bf16 %v6324_v29, %v6323_v23  ;;  %v7666_v11 = vpack.c.bf16 %v6326_v5, %v6325_v8 }
0x1e4e   :  { %v5807_v15 = vadd.f32 %v6845_v13, %v5799_v26  ;;  %v6327_v13 = vld [vmem:[%s8794_s20 + $0x20] sm:$0xff]  ;;  %v6328_v26 = vld [vmem:[%s8794_s20 + $0x28] sm:$0xff] }
0x1e50   :  { %v5824_v54 = vpack.c.bf16 %v5807_v15, %v5806_v9  ;;  %v6329_v9 = vld [vmem:[%s8794_s20 + $0x30] sm:$0xff]  ;;  %v6330_v15 = vld [vmem:[%s8794_s20 + $0x38] sm:$0xff] }
0x1e52   :  { %7564 = vmatmul.mubr.bf16.vlgmr.msra.gmra.mrb[124].mxu1 %v5824_v54  ;;  %7584 = vmatmul.mubr.bf16.vlgmr.msra.gmra.mrb[96].mxu0 %v5824_v54 }
0x1e53   :  { %7591 = vmatprep.mubr.msk.f32.mxu1 %vm8641_vm0, %v8639_v27  ;;  %7653 = vmatprep.mubr.msk.f32.mxu0 %vm8641_vm0, %v8639_v27 }
0x1e54   :  { %7664 = vmatpush3.bf16.msra.mxu0 %v7663_v24 }
0x1e55   :  { %7665 = vmatprep.subr.bf16.mxu0 %v8647_v31 }
0x1e58   :  { %7667 = vmatpush3.bf16.msra.mxu0 %v7666_v11 }
0x1e59   :  { %7668 = vmatprep.subr.bf16.mxu0 %v8647_v31 }
0x1f25   :  { %v5914_v50 = vpop.f32.mrb[124].mxu1  ;;  %v6028_v35 = vpop.f32.mrb[96].mxu0 }
0x1f26   :  { %v6029_v16 = vadd.f32 %v6855_v10, %v6028_v35  ;;  %v7565_v49 = vpop.f32.mrb[125].mxu1  ;;  %v7585_v51 = vpop.f32.mrb[97].mxu0  ;;  %v5915_v48 = vadd.f32 %v6846_v39, %v5914_v50  ;;  %v6333_v35 = vld [vmem:[%s8794_s20 + $0x50] sm:$0xff] }
0x1f27   :  { %v5917_v36 = vpop.f32.mrb[126].mxu1  ;;  %v6031_v22 = vpop.f32.mrb[98].mxu0  ;;  %v6335_v51 = vld [vmem:[%s8794_s20 + $0x60] sm:$0xff] }
0x1f28   :  { %v6864_v37 = vmul.f32 -1.442695, %v6029_v16  ;;  %v6032_v59 = vadd.f32 %v6855_v10, %v6031_v22  ;;  %v7566_v21 = vpop.f32.mrb[127].mxu1  ;;  %v7586_v41 = vpop.f32.mrb[99].mxu0  ;;  %v5918_v38 = vadd.f32 %v6846_v39, %v5917_v36  ;;  %v6332_v10 = vld [vmem:[%s8794_s20 + $0x48] sm:$0xff]  ;;  %v6334_v16 = vld [vmem:[%s8794_s20 + $0x58] sm:$0xff] }
0x1f29   :  { %v7675_v50 = vpack.c.bf16 %v6332_v10, %v6331_v63  ;;  %v7678_v49 = vpack.c.bf16 %v6334_v16, %v6333_v35  ;;  %v6336_v36 = vld [vmem:[%s8794_s20 + $0x68] sm:$0xff]  ;;  %v6337_v41 = vld [vmem:[%s8794_s20 + $0x70] sm:$0xff] }
0x1f2a   :  { %8269 = vpow2.f32 %v6864_v37  ;;  %v6865_v45 = vmul.f32 -1.442695, %v6032_v59  ;;  %v7681_v22 = vpack.c.bf16 %v6336_v36, %v6335_v51 }
0x1f2c   :  { %8271 = vpow2.f32 %v6865_v45  ;;  %v6338_v45 = vld [vmem:[%s8794_s20 + $0x78] sm:$0xff]  ;;  %s8648_s20 = smov [#allocation22]  }
0x1f2d   :  { %8273 = vtanh.f32 %v5915_v48  ;;  %v7684_v39 = vpack.c.bf16 %v6338_v45, %v6337_v41  ;;  %v6233_v48 = vld [vmem:[%s9740_s11] sm:$0x1]  ;;  %s6438_s16 = sshll.u32 %s8648_s20, 4  ;;  %s6439_s16 = int_to_ptr.vmem [resolvable:$true] %s6438_s16 }
0x1f2e   :  { %s8509_s24 = scalar_lea.vmem %s6439_s16, 256  ;;  %p8514_p11 = scmp.lt.s32.totalorder %s6439_s16, %s6439_s16 }
0x1f2f   :  { %p8510_p10 = scmp.ne.s32.totalorder %s6439_s16, %s8509_s24  ;;  %p8515_p12 = scmp.lt.s32.totalorder %s8509_s24, %s8509_s24 }
0x1f31   :  { %p8516_p13 = por %p8515_p12, %p8514_p11 }
0x1f33   :  { %p8517_p0 = pnand %p8516_p13, %p8510_p10 }
0x1f34   :  { %v8270_v61 = vpop.eup %8269 }
0x1f35   :  { %v6041_v58 = vadd.f32 1.0, %v8270_v61 }
0x1f36   :  { %v8272_v32 = vpop.eup %8271 }
0x1f37   :  { %8275 = vrcp.f32 %v6041_v58  ;;  %v6042_v12 = vadd.f32 1.0, %v8272_v32  ;;  %v8274_v0 = vpop.eup %8273 }
0x1f38   :  { %8277 = vtanh.f32 %v5918_v38 }
0x1f39   :  { %8279 = vrcp.f32 %v6042_v12 }
0x1f41   :  { %v8276_v1 = vpop.eup %8275 }
0x1f42   :  { %v8278_v2 = vpop.eup %8277  ;;  %v6047_v52 = vmul.f32 %v8276_v1, %v8274_v0  ;;  %v6339_v1 = vld [vmem:[%s8799_s8] sm:$0x1] }
0x1f43   :  { %v8280_v3 = vpop.eup %8279 }
0x1f44   :  { %v6048_v57 = vmul.f32 %v8280_v3, %v8278_v2 }
0x1f46   :  { %v7657_v17 = vpack.c.bf16 %v6048_v57, %v6047_v52 }
0x1f48   :  { %7658 = vmatpush3.bf16.xpose.msra.mxu1 %v7657_v17 }
0x1f49   :  { %7659 = vmatprep.subr.bf16.mxu1 %v8647_v31 }
0x1f4f   :  { %7592 = vmatmul.mubr.f32.vlgmr.msra.gmra.mrb[128].mxu1 %v6049_v19 }
0x1f50   :  { %7661 = vmatpush3.bf16.msra.mxu1 %v5824_v54  ;;  %7598 = vmatprep.mubr.msk.f32.mxu1 %vm8641_vm0, %v8639_v27  ;;  %v7672_v54 = vpack.c.bf16 %v6330_v15, %v6329_v9 }
0x1f51   :  { %7601 = vmatprep.subr.bf16.mxu1 %v8639_v27 }
0x2022   :  { %v6126_v4 = vpop.f32.mrb[128].mxu1 }
0x2023   :  { %v6127_v6 = vadd.f32 %v6126_v4, %v6059_v42  ;;  %v7593_v33 = vpop.f32.mrb[129].mxu1 }
0x2025   :  { %v6132_v40 = vsel %vm6130_vm9, %v6127_v6, -inf  ;;  %6131 = vst.msk [vmem:[#allocation24] sm:$0x1] %vm6130_vm9, %v6127_v6 }
0x2026   :  { %6133 = vmax.xlane.f32.xlu1 %v6132_v40 }
0x20b3   :  { %v6134_v34 = vpop.xlane.xlu1 %6133 }
0x20b4   :  { %v6135_v47 = vsub.f32 %v6127_v6, %v6134_v34 }
0x20b6   :  { %v6136_v20 = vmul.f32 1.442695, %v6135_v47 }
0x20b8   :  { %8281 = vpow2.f32 %v6136_v20 }
0x20c2   :  { %v8282_v60 = vpop.eup %8281 }
0x20c3   :  { %v6138_v30 = vsel %vm6130_vm9, %v8282_v60, 0.0 }
0x20c4   :  { %6139 = vadd.xlane.f32.xlu1 %v6138_v30 }
0x2151   :  { %v6140_v44 = vpop.xlane.xlu1 %6139 }
0x2152   :  { %8283 = vrcp.f32 %v6140_v44 }
0x215c   :  { %v8284_v56 = vpop.eup %8283 }
0x215d   :  { %v6142_v55 = vmul.f32 %v8284_v56, %v8282_v60 }
0x215f   :  { %7599 = vmatmul.mubr.msk.f32.vlgmr.msra.gmra.mrb[130].mxu1 %vm1284_vm1, %v6142_v55 }
0x2160   :  { %7602 = vmatpush3.bf16.msra.mxu1 %v8109_v46  ;;  %7617 = vmatprep.mubr.msk.bf16.mxu1 %vm8641_vm0, %v8639_v27 }
0x2161   :  { %7603 = vmatprep.subr.bf16.mxu1 %v8639_v27 }
0x2164   :  { %7604 = vmatpush3.bf16.msra.mxu1 %v8110_v25 }
0x2165   :  { %7605 = vmatprep.subr.bf16.mxu1 %v8639_v27 }
0x2168   :  { %7606 = vmatpush3.bf16.msra.mxu1 %v8111_v62 }
0x2169   :  { %7607 = vmatprep.subr.bf16.mxu1 %v8639_v27 }
0x216c   :  { %7608 = vmatpush3.bf16.msra.mxu1 %v8112_v14 }
0x216d   :  { %7609 = vmatprep.subr.bf16.mxu1 %v8639_v27 }
0x2170   :  { %7610 = vmatpush3.bf16.msra.mxu1 %v8113_v53 }
0x2171   :  { %7611 = vmatprep.subr.bf16.mxu1 %v8639_v27 }
0x2174   :  { %7612 = vmatpush3.bf16.msra.mxu1 %v8114_v18 }
0x2175   :  { %7613 = vmatprep.subr.bf16.mxu1 %v8639_v27 }
0x2178   :  { %7614 = vmatpush3.bf16.msra.mxu1 %v8115_v7 }
0x2179   :  { %7615 = vmatprep.subr.bf16.mxu1 %v8639_v27  ;;  %v7669_v27 = vpack.c.bf16 %v6328_v26, %v6327_v13 }
0x217b   :  { %7670 = vmatpush3.bf16.msra.mxu0 %v7669_v27 }
0x217c   :  { %7616 = vmatpush3.bf16.msra.mxu1 %v8116_v28  ;;  %7671 = vmatprep.subr.bf16.mxu0 %v8647_v31 }
0x217f   :  { %7673 = vmatpush3.bf16.msra.mxu0 %v7672_v54 }
0x2180   :  { %7674 = vmatprep.subr.bf16.mxu0 %v8647_v31 }
0x2183   :  { %7676 = vmatpush3.bf16.msra.mxu0 %v7675_v50 }
0x2184   :  { %7677 = vmatprep.subr.bf16.mxu0 %v8647_v31 }
0x2187   :  { %7679 = vmatpush3.bf16.msra.mxu0 %v7678_v49 }
0x2188   :  { %7680 = vmatprep.subr.bf16.mxu0 %v8647_v31 }
0x218b   :  { %7682 = vmatpush3.bf16.msra.mxu0 %v7681_v22 }
0x218c   :  { %7683 = vmatprep.subr.bf16.mxu0 %v8647_v31 }
0x218f   :  { %7685 = vmatpush3.bf16.msra.mxu0 %v7684_v39 }
0x2232   :  { %v6212_v37 = vpop.f32.mrb[130].mxu1 }
0x2233   :  { %v6232_v59 = vpack.c.bf16 %v6212_v37, %v6212_v37  ;;  %v7600_v21 = vpop.f32.mrb[131].mxu1 }
0x2235   :  { %7618 = vmatmul.mubr.bf16.vlgmr.msra.gmra.mrb[132].mxu1 %v6232_v59 }
0x2308   :  { %v6316_v61 = vpop.f32.mrb[132].mxu1 }
0x2309   :  { %v6317_v38 = vadd.f32 %v6316_v61, %v6233_v48  ;;  %v7619_v58 = vpop.f32.mrb[133].mxu1 }
0x230a   :  { %v6319_v32 = vpop.f32.mrb[134].mxu1 }
0x230b   :  { %v6322_v12 = vmax.f32 %v6317_v38, 0.0  ;;  %v7620_v0 = vpop.f32.mrb[135].mxu1 }
0x230d   :  { %7654 = vmatmul.mubr.f32.vlgmr.msra.gmra.mrb[100].mxu0 %v6322_v12 }
0x23e0   :  { %v6406_v2 = vpop.f32.mrb[100].mxu0 }
0x23e1   :  { %v6407_v31 = vadd.f32 %v6406_v2, %v6339_v1  ;;  %v7655_v52 = vpop.f32.mrb[101].mxu0 }
0x23e3   :  { %v6411_v3 = vsel %vm6410_vm10, %v6407_v31, -inf }
0x23e4   :  { %6412 = vmax.xlane.f32.xlu1 %v6411_v3 }
0x2471   :  { %v6413_v57 = vpop.xlane.xlu1 %6412 }
0x2472   :  { %v6414_v17 = vsub.f32 %v6407_v31, %v6413_v57 }
0x2474   :  { %v6415_v19 = vmul.f32 1.442695, %v6414_v17 }
0x2476   :  { %8285 = vpow2.f32 %v6415_v19 }
0x2480   :  { %v8286_v43 = vpop.eup %8285 }
0x2481   :  { %v6417_v42 = vsel %vm6410_vm10, %v8286_v43, 0.0 }
0x2482   :  { %6418 = vadd.xlane.f32.xlu1 %v6417_v42 }
0x2483   :  { %8520 = shalt.err (!%p8517_p0)
}
0x2484   :  { %s8521_s8 = scalar_lea.hbm %s8809_s12, 256 }
0x2485   :  { %p8522_p1 = scmp.ne.s32.totalorder %s8809_s12, %s8521_s8  ;;  %p8525_p2 = scmp.lt.u32.totalorder %s8521_s8, %s8809_s12 }
0x2487   :  { %p8527_p3 = pnand %p8525_p2, %p8522_p1 }
0x2489   :  { %8530 = shalt.err (!%p8527_p3)
}
0x248a   :  { %s8649_s14 = smov 128   ;;  %s8650_s9 = smov 8  }
0x248b   :  { %6444 = dma.vmem_to_hbm [thread:$0]  %s6439_s16, 256, %s8809_s12, [#allocation23], %s8649_s14, %s8649_s14, %s8650_s9  }
0x248c   :  { %s8651_s6 = smov [#allocation24]  }
0x248d   :  { %s6451_s15 = sshll.u32 %s8651_s6, 4  ;;  %s6452_s15 = int_to_ptr.vmem [resolvable:$true] %s6451_s15 }
0x248e   :  { %s8531_s30 = scalar_lea.vmem %s6452_s15, 16  ;;  %s8535_s18 = scalar_lea.vmem %s6452_s15, 32 }
0x248f   :  { %p8532_p4 = scmp.ne.s32.totalorder %s6452_s15, %s8531_s30  ;;  %p8536_p5 = scmp.lt.s32.totalorder %s6452_s15, %s6452_s15 }
0x2490   :  { %p8537_p6 = scmp.lt.s32.totalorder %s8535_s18, %s8531_s30 }
0x2492   :  { %p8538_p7 = por %p8537_p6, %p8536_p5 }
0x2494   :  { %p8539_p8 = pnand %p8538_p7, %p8532_p4 }
0x2496   :  { %8542 = shalt.err (!%p8539_p8)
}
0x2497   :  { %s8543_s13 = scalar_lea.hbm %s8814_s22, 16 }
0x2498   :  { %p8544_p9 = scmp.ne.s32.totalorder %s8814_s22, %s8543_s13  ;;  %p8547_p10 = scmp.lt.u32.totalorder %s8543_s13, %s8814_s22 }
0x249a   :  { %p8549_p11 = pnand %p8547_p10, %p8544_p9 }
0x249c   :  { %8552 = shalt.err (!%p8549_p11)
}
0x249d   :  { %6454 = dma.vmem_to_hbm [thread:$0]  %s6452_s15, 16, %s8814_s22, [#allocation23]  }
0x249e   :  { %s8652_s12 = smov [#allocation21]  }
0x249f   :  { %s6429_s17 = sshll.u32 %s8652_s12, 4  ;;  %s6430_s17 = int_to_ptr.vmem [resolvable:$true] %s6429_s17 }
0x24a0   :  { %s8553_s21 = scalar_lea.vmem %s6430_s17, 16  ;;  %s8557_s19 = scalar_lea.vmem %s6430_s17, 32 }
0x24a1   :  { %p8554_p12 = scmp.ne.s32.totalorder %s6430_s17, %s8553_s21  ;;  %p8558_p13 = scmp.lt.s32.totalorder %s6430_s17, %s6430_s17 }
0x24a2   :  { %p8559_p0 = scmp.lt.s32.totalorder %s8557_s19, %s8553_s21 }
0x24a4   :  { %p8560_p1 = por %p8559_p0, %p8558_p13 }
0x24a6   :  { %p8561_p2 = pnand %p8560_p1, %p8554_p12 }
0x250f   :  { %v6419_v4 = vpop.xlane.xlu1 %6418 }
0x2510   :  { %8287 = vrcp.f32 %v6419_v4 }
0x251a   :  { %v8288_v6 = vpop.eup %8287 }
0x251b   :  { %v6421_v33 = vmul.f32 %v8288_v6, %v8286_v43 }
0x251d   :  { %6422 = vst.msk [vmem:[#allocation21] sm:$0x1] %vm6410_vm10, %v6421_v33 }
0x251e   :  { %8564 = shalt.err (!%p8561_p2)
}
0x251f   :  { %s8565_s22 = scalar_lea.hbm %s8804_s29, 16 }
0x2520   :  { %p8566_p3 = scmp.ne.s32.totalorder %s8804_s29, %s8565_s22  ;;  %p8569_p4 = scmp.lt.u32.totalorder %s8565_s22, %s8804_s29 }
0x2522   :  { %p8571_p5 = pnand %p8569_p4, %p8566_p3 }
0x2524   :  { %8574 = shalt.err (!%p8571_p5)
}
0x2525   :  { %6432 = dma.vmem_to_hbm [thread:$0]  %s6430_s17, 16, %s8804_s29, [#allocation6]  }
0x2526   :  { %8587 = dma.done.wait [#allocation6], 16  }
0x2527   :  { %8588 = vsyncadd [#allocation6], 4294967280 }
0x2528   :  { %8589 = dma.done.wait [#allocation23], 272  }
0x2529   :  { %8590 = vsyncadd [#allocation23], 4294967024 }
0x252a   :  { %6464 = vsyncpa [#allocation5], 1 }
0x252b   :  { %6465 = vsyncpa [#allocation8], 1 }
0x252c   :  { %6466 = vsyncpa [#allocation11], 1 }
0x252d   :  { %6467 = vsyncpa [#allocation14], 1 }
0x252e   :  { %6468 = vsyncpa [#allocation17], 1 }
0x252f   :  { %6469 = vsyncpa [#allocation20], 1 }
0x2530   :  { %6470 = vsyncpa [#allocation6], 1 }
0x2531   :  { %6471 = vsyncpa [#allocation23], 1 }

</bundles_post_ra>
